<compile_context>
chip_gen: v7x
topology: tpu7x:2x2x1
jax: 0.10.0
libtpu: 0.0.40
codegen_flags: <defaults>
</compile_context>

<pallas_src>
import functools

import jax
import jax.numpy as jnp
from jax import lax
from jax.experimental import pallas as pl
from jax.experimental.pallas import tpu as pltpu

BN_EPS = 1e-5
MATMUL_DTYPE = jnp.bfloat16        # MXU input dtype; accumulation & elementwise math stay f32


def _round_up(x, m):
    return (x + m - 1) // m * m


def _vmem_capacity_bytes():
    """Physical VMEM of the current chip (128 MiB on v5e/v6e, 64 MiB on v7x); conservative fallback."""
    try:
        cap = getattr(pltpu.get_tpu_info(), "vmem_capacity_bytes", None)
        if cap:
            return int(cap)
    except Exception:
        pass
    return 64 * 1024 * 1024


# ----------------------------------- kernels ----------------------------------- #

def _fused_upconv_kernel(x_ref, w_ref, foldm_ref, foldt_ref, gamma_ref, beta_ref, alpha_ref,
                         o_ref, *, chunk, n_chunks):
    """Small-N fast path: X resident in VMEM; chunked stats sweep -> in-kernel BN fold -> apply sweep.

    x_ref: (n_pad, Cin) bf16   w_ref: (Cin, C8) bf16,  C8 = 8*C2 (lane-dense)
    foldm_ref: (C8, C2) f32 tap->channel fold, pre-divided by the BN element count
    foldt_ref: (C2, C8) f32 channel->column broadcast
    gamma_ref, beta_ref: (1, C2) f32   alpha_ref: (1, C8) f32 (pre-tiled per column)
    """
    w = w_ref[...]
    c8 = w.shape[1]

    def stats_body(i, carry):
        s, q = carry
        r0 = pl.multiple_of(i * chunk, chunk)
        y = jnp.dot(x_ref[pl.ds(r0, chunk), :], w, preferred_element_type=jnp.float32)
        return (s + jnp.sum(y, axis=0, keepdims=True),
                q + jnp.sum(y * y, axis=0, keepdims=True))

    zeros = jnp.zeros((1, c8), jnp.float32)
    col_sum, col_sq = lax.fori_loop(0, n_chunks, stats_body, (zeros, zeros),
                                    unroll=n_chunks <= 8)

    # BatchNorm fold (per channel, across the 8 taps), fully in-kernel -- no host round trip.
    mean = jnp.dot(col_sum, foldm_ref[...], preferred_element_type=jnp.float32)   # (1, C2) E[y]
    ex2 = jnp.dot(col_sq, foldm_ref[...], preferred_element_type=jnp.float32)     # (1, C2) E[y^2]
    var = jnp.maximum(ex2 - mean * mean, 0.0)          # biased batch variance (training mode)
    scale_c = gamma_ref[...] * lax.rsqrt(var + BN_EPS)
    shift_c = beta_ref[...] - mean * scale_c
    scale = jnp.dot(scale_c, foldt_ref[...], preferred_element_type=jnp.float32)  # (1, C8)
    shift = jnp.dot(shift_c, foldt_ref[...], preferred_element_type=jnp.float32)
    alpha = alpha_ref[...]

    def apply_body(i, _):
        r0 = pl.multiple_of(i * chunk, chunk)
        # Recompute the tiny-K matmul instead of caching Y: the MXU is nowhere near the bottleneck
        # and this keeps the VMEM footprint at X + output only.
        y = jnp.dot(x_ref[pl.ds(r0, chunk), :], w, preferred_element_type=jnp.float32)
        z = y * scale + shift
        o_ref[pl.ds(r0, chunk), :] = jnp.where(z >= 0.0, z, alpha * z).astype(o_ref.dtype)
        return 0

    lax.fori_loop(0, n_chunks, apply_body, 0, unroll=n_chunks <= 8)


def _gram_stats_kernel(x_ref, rsum_ref, gram_ref):
    """Two-pass path, pass 1: accumulate rowsum(X) and the Gram matrix G = X^T X per grid slice.

    Column statistics of Y = X @ W are recovered outside as rowsum@W and diag(W^T G W), so this
    pass never materializes the 8x wider Y (X-read bound, ~8x less MXU/VPU/XLU work than before).
    """
    @pl.when(pl.program_id(1) == 0)
    def _():
        rsum_ref[...] = jnp.zeros_like(rsum_ref)
        gram_ref[...] = jnp.zeros_like(gram_ref)

    x = x_ref[...]                                       # (tile_n, Cin) bf16
    rsum_ref[...] += jnp.sum(x.astype(jnp.float32), axis=0, keepdims=True)
    gram_ref[...] += lax.dot_general(x, x, (((0,), (0,)), ((), ())),
                                     preferred_element_type=jnp.float32)


def _apply_bn_prelu_kernel(x_ref, w_ref, scale_ref, shift_ref, alpha_ref, o_ref):
    """Two-pass path, pass 2: matmul + folded BatchNorm + per-channel PReLU, lane-dense stores."""
    y = jnp.dot(x_ref[...], w_ref[...], preferred_element_type=jnp.float32)
    z = y * scale_ref[...] + shift_ref[...]
    o_ref[...] = jnp.where(z >= 0.0, z, alpha_ref[...] * z).astype(o_ref.dtype)


# ------------------------------ pallas_call wrappers ----------------------------- #

def _fused_small_path(xb, wb, gamma, beta, alpha, *, n_valid, out_dtype, vmem_cap):
    n, cin = xb.shape
    c8 = wb.shape[1]
    c2 = c8 // 8
    chunk = 256
    n_pad = _round_up(max(n, chunk), chunk)
    xb = jnp.pad(xb, ((0, n_pad - n), (0, 0)))
    n_chunks = n_pad // chunk

    count = float(n_valid * 8)                            # elements per channel: B * 2D * 2H * 2W
    col_ch = jnp.tile(jnp.arange(c2, dtype=jnp.int32), 8)                 # channel id per column
    ch_ids = jnp.arange(c2, dtype=jnp.int32)
    foldm = (col_ch[:, None] == ch_ids[None, :]).astype(jnp.float32) / count   # (C8, C2)
    foldt = (col_ch[None, :] == ch_ids[:, None]).astype(jnp.float32)           # (C2, C8)

    gamma2 = gamma.reshape(1, c2).astype(jnp.float32)
    beta2 = beta.reshape(1, c2).astype(jnp.float32)
    alpha8 = jnp.tile(alpha.astype(jnp.float32), 8).reshape(1, c8)

    out_isz = jnp.dtype(out_dtype).itemsize
    need = 2 * n_pad * cin * 2 + 2 * n_pad * c8 * out_isz + cin * c8 * 2 + (1 << 20)
    vmem_limit = int(min(int(0.75 * vmem_cap), max(16 * 1024 * 1024, need + (4 << 20))))

    cost = pl.CostEstimate(
        flops=2 * (2 * n_pad * cin * c8) + 9 * n_pad * c8, transcendentals=c2,
        bytes_accessed=n_pad * cin * 2 + cin * c8 * 2 + n_pad * c8 * out_isz)

    return pl.pallas_call(
        functools.partial(_fused_upconv_kernel, chunk=chunk, n_chunks=n_chunks),
        out_shape=jax.ShapeDtypeStruct((n_pad, c8), out_dtype),
        grid=(1,),
        in_specs=[pl.BlockSpec((n_pad, cin), lambda i: (0, 0)),
                  pl.BlockSpec((cin, c8), lambda i: (0, 0)),
                  pl.BlockSpec((c8, c2), lambda i: (0, 0)),
                  pl.BlockSpec((c2, c8), lambda i: (0, 0)),
                  pl.BlockSpec((1, c2), lambda i: (0, 0)),
                  pl.BlockSpec((1, c2), lambda i: (0, 0)),
                  pl.BlockSpec((1, c8), lambda i: (0, 0))],
        out_specs=pl.BlockSpec((n_pad, c8), lambda i: (0, 0)),
        compiler_params=pltpu.CompilerParams(
            dimension_semantics=("arbitrary",), vmem_limit_bytes=vmem_limit),
        cost_estimate=cost,
    )(xb, wb, foldm, foldt, gamma2, beta2, alpha8)


def _two_pass_path(xb, wb, gamma, beta, alpha, *, n_valid, tile_n, out_dtype, vmem_cap):
    n, cin = xb.shape
    c8 = wb.shape[1]
    c2 = c8 // 8
    n_split = 2                                           # keep both v7x TensorCores busy in pass 1

    if tile_n is None:
        # Big tiles for HBM efficiency (>=85% of roofline needs >=512-row DMAs), but keep >= 4 tiles
        # so the "parallel" axes can feed both TensorCores on v7x.
        tile_n = max(256, min(4096, _round_up(pl.cdiv(n, 4), 256)))
    tile_n = _round_up(tile_n, 256)
    grid_n = pl.cdiv(n, tile_n)
    grid_half = pl.cdiv(grid_n, n_split)
    grid_n = n_split * grid_half
    n_pad = tile_n * grid_n
    xb = jnp.pad(xb, ((0, n_pad - n), (0, 0)))            # zero rows contribute 0 to the stats

    out_isz = jnp.dtype(out_dtype).itemsize
    footprint = (2 * tile_n * cin * 2 + 2 * cin * c8 * 2
                 + 2 * tile_n * c8 * out_isz + (1 << 20))
    vmem_limit = int(min(int(0.75 * vmem_cap), max(16 * 1024 * 1024, 2 * footprint)))

    # ---- pass 1: Gram-matrix batch statistics, per-core partial accumulators ----
    rsum_p, gram_p = pl.pallas_call(
        _gram_stats_kernel,
        out_shape=(jax.ShapeDtypeStruct((n_split, 1, cin), jnp.float32),
                   jax.ShapeDtypeStruct((n_split, cin, cin), jnp.float32)),
        grid=(n_split, grid_half),
        in_specs=[pl.BlockSpec((tile_n, cin), lambda p, i: (p * grid_half + i, 0))],
        out_specs=(pl.BlockSpec((None, 1, cin), lambda p, i: (p, 0, 0)),
                   pl.BlockSpec((None, cin, cin), lambda p, i: (p, 0, 0))),
        compiler_params=pltpu.CompilerParams(
            dimension_semantics=("parallel", "arbitrary"), vmem_limit_bytes=vmem_limit),
        cost_estimate=pl.CostEstimate(
            flops=2 * n_pad * cin * cin + 2 * n_pad * cin, transcendentals=0,
            bytes_accessed=n_pad * cin * 2 + n_split * (cin + cin * cin) * 4),
    )(xb)

    # ---- tiny JAX fold:  col_sum = rowsum(X) @ W ,  col_sq = diag(W^T G W) ----
    rsum = jnp.sum(rsum_p, axis=0)                        # (1, Cin)
    gram = jnp.sum(gram_p, axis=0)                        # (Cin, Cin)
    wf = wb.astype(jnp.float32)                           # bf16-rounded W, matching the kernels
    col_sum = jnp.dot(rsum, wf)                           # (1, C8)
    col_sq = jnp.sum(wf * jnp.dot(gram, wf), axis=0, keepdims=True)       # (1, C8)

    count = jnp.float32(n_valid * 8)
    ch_sum = jnp.sum(col_sum.reshape(8, c2), axis=0)      # fold the 8 taps per channel
    ch_sq = jnp.sum(col_sq.reshape(8, c2), axis=0)
    mean = ch_sum / count
    # NOTE: E[y^2] - E[y]^2 in f32 with a clamp at 0; fine for activation-scale data -- a centered
    # second sweep would only be needed if |mean| >> std.
    var = jnp.maximum(ch_sq / count - mean * mean, 0.0)
    scale_c = gamma.astype(jnp.float32) * lax.rsqrt(var + BN_EPS)
    shift_c = beta.astype(jnp.float32) - mean * scale_c
    scale8 = jnp.tile(scale_c, 8).reshape(1, c8)          # tap-major column layout
    shift8 = jnp.tile(shift_c, 8).reshape(1, c8)
    alpha8 = jnp.tile(alpha.astype(jnp.float32), 8).reshape(1, c8)

    # ---- pass 2: matmul + folded BN + PReLU, lane-dense tiles, megacore via "parallel" ----
    out = pl.pallas_call(
        _apply_bn_prelu_kernel,
        out_shape=jax.ShapeDtypeStruct((n_pad, c8), out_dtype),
        grid=(grid_n,),
        in_specs=[pl.BlockSpec((tile_n, cin), lambda i: (i, 0)),
                  pl.BlockSpec((cin, c8), lambda i: (0, 0)),        # weight resident
                  pl.BlockSpec((1, c8), lambda i: (0, 0)),
                  pl.BlockSpec((1, c8), lambda i: (0, 0)),
                  pl.BlockSpec((1, c8), lambda i: (0, 0))],
        out_specs=pl.BlockSpec((tile_n, c8), lambda i: (i, 0)),
        compiler_params=pltpu.CompilerParams(
            dimension_semantics=("parallel",), vmem_limit_bytes=vmem_limit),
        cost_estimate=pl.CostEstimate(
            flops=2 * n_pad * cin * c8 + 5 * n_pad * c8, transcendentals=0,
            bytes_accessed=n_pad * cin * 2 + cin * c8 * 2 + n_pad * c8 * out_isz),
    )(xb, wb, scale8, shift8, alpha8)
    return out


def upconv_bn_prelu_flat(x_flat, w_mat, gamma, beta, alpha, *, n_valid,
                         force_two_pass=False, tile_n=None, out_dtype=jnp.float32):
    """x_flat: (N, Cin) channels-last rows; w_mat: (Cin, 8*C2) tap-major columns (C2 lane-padded).
    Returns the BN-normalized / PReLU-activated transposed-conv output, (N_pad, 8*C2)."""
    n, cin = x_flat.shape
    c8 = w_mat.shape[1]
    xb = x_flat.astype(MATMUL_DTYPE)
    wb = w_mat.astype(MATMUL_DTYPE)
    cap = _vmem_capacity_bytes()

    out_isz = jnp.dtype(out_dtype).itemsize
    n_pad_f = _round_up(max(n, 256), 256)
    fast_bytes = 2 * n_pad_f * cin * 2 + 2 * n_pad_f * c8 * out_isz + cin * c8 * 2 + (2 << 20)
    if not force_two_pass and fast_bytes <= int(0.35 * cap):
        return _fused_small_path(xb, wb, gamma, beta, alpha, n_valid=n_valid,
                                 out_dtype=out_dtype, vmem_cap=cap)
    return _two_pass_path(xb, wb, gamma, beta, alpha, n_valid=n_valid, tile_n=tile_n,
                          out_dtype=out_dtype, vmem_cap=cap)


# ------------------------------------ JAX glue ------------------------------------ #

def up_trans_forward(x_ncdhw, skip_ncdhw, params, drop_rate=0.0,
                     force_two_pass=False, tile_n=None):
    """Pallas implementation of UpTrans.forward; inputs/outputs use the PyTorch NCDHW layout."""
    # TODO(synk): drop_rate > 0 (training-mode F.dropout) not implemented; module default is 0.
    b, cin, d, h, w = x_ncdhw.shape
    c2 = params["w"].shape[1]                          # num_out_features // 2
    c2p = _round_up(c2, 16)                            # lane-dense: 8*c2p is a multiple of 128
    c8 = 8 * c2p
    n = b * d * h * w

    # channels-last rows (B*D*H*W, Cin)
    x_flat = jnp.transpose(x_ncdhw, (0, 2, 3, 4, 1)).reshape(n, cin)

    # ConvTranspose3d weight (Cin, C2, 2,2,2) -> (Cin, (kd,kh,kw,cout)) with cout padded to c2p
    w_t = jnp.transpose(params["w"], (0, 2, 3, 4, 1))                    # (Cin, 2, 2, 2, C2)
    w_t = jnp.pad(w_t, ((0, 0),) * 4 + ((0, c2p - c2),))
    w_mat = w_t.reshape(cin, c8)
    gamma = jnp.pad(params["gamma"], (0, c2p - c2), constant_values=1.0)
    beta = jnp.pad(params["beta"], (0, c2p - c2))
    alpha = jnp.pad(params["alpha"], (0, c2p - c2))

    y = upconv_bn_prelu_flat(x_flat, w_mat, gamma, beta, alpha, n_valid=n,
                             force_two_pass=force_two_pass, tile_n=tile_n)[:n]

    # Single fused layout pass: (b,d,h,w,kd,kh,kw,c) -> NCDHW (b, c, 2d+kd, 2h+kh, 2w+kw).
    # The tap scatter and the NCDHW transpose are one permutation (one HBM copy instead of two);
    # the kernel output stays lane-dense (N, 8*C2) because the scattered minor dim C2 is lane-sparse.
    y = y.reshape(b, d, h, w, 2, 2, 2, c2p)[..., :c2]
    up = jnp.transpose(y, (0, 7, 1, 4, 2, 5, 3, 6)).reshape(b, c2, 2 * d, 2 * h, 2 * w)

    # torch.cat((out, skip), 1)
    return jnp.concatenate([up, skip_ncdhw.astype(up.dtype)], axis=1)


# --------------------------- pure-JAX reference (check) --------------------------- #

def ref_forward(x, skip, params):
    c2 = params["w"].shape[1]
    B, _, D, H, W = x.shape
    xm = x.astype(MATMUL_DTYPE)
    wm = params["w"].astype(MATMUL_DTYPE)
    # ConvTranspose3d(k=2,s=2,bias=False): out[b,o,2d+kd,2h+kh,2w+kw] = sum_c x[b,c,d,h,w] W[c,o,kd,kh,kw]
    y8 = jnp.einsum('bcdhw,coxyz->bodxhywz', xm, wm, preferred_element_type=jnp.float32)
    y = y8.reshape(B, c2, 2 * D, 2 * H, 2 * W)
    mean = jnp.mean(y, axis=(0, 2, 3, 4), keepdims=True)
    var = jnp.mean(jnp.square(y - mean), axis=(0, 2, 3, 4), keepdims=True)
    yn = (y - mean) * lax.rsqrt(var + BN_EPS)
    yn = yn * params["gamma"].reshape(1, c2, 1, 1, 1) + params["beta"].reshape(1, c2, 1, 1, 1)
    a = params["alpha"].reshape(1, c2, 1, 1, 1)
    out = jnp.where(yn >= 0, yn, a * yn)
    return jnp.concatenate([out, skip.astype(jnp.float32)], axis=1)


# -------------------------------------- main --------------------------------------- #

if __name__ == "__main__":
    B, CIN, D, H, W = 2, 16, 8, 8, 8
    NUM_OUT = 32                        # ConvTranspose3d out channels = 16 -> 8*C2 = 128 (lane-dense)
    C2 = NUM_OUT // 2

    key = jax.random.PRNGKey(0)
    kx, ks, kw, kg, kb = jax.random.split(key, 5)
    x = jax.random.normal(kx, (B, CIN, D, H, W), jnp.float32)
    skip = jax.random.normal(ks, (B, NUM_OUT - C2, 2 * D, 2 * H, 2 * W), jnp.float32)
    params = dict(
        w=jax.random.normal(kw, (CIN, C2, 2, 2, 2), jnp.float32) * 0.1,  # ConvTranspose3d weight
        gamma=1.0 + 0.1 * jax.random.normal(kg, (C2,), jnp.float32),     # BatchNorm3d weight
        beta=0.1 * jax.random.normal(kb, (C2,), jnp.float32),            # BatchNorm3d bias
        alpha=jnp.full((C2,), 0.25, jnp.float32),                        # PReLU default init
    )

    ref = ref_forward(x, skip, params)

    # fused single-kernel fast path (auto-selected for this problem size)
    fwd_fast = jax.jit(up_trans_forward)
    out_fast = jax.block_until_ready(fwd_fast(x, skip, params))

    # exercise the general two-pass (Gram-stats + apply) path as well
    fwd_tiled = jax.jit(functools.partial(up_trans_forward, force_two_pass=True, tile_n=256))
    out_tiled = jax.block_until_ready(fwd_tiled(x, skip, params))

    assert out_fast.shape == (B, NUM_OUT, 2 * D, 2 * H, 2 * W)
    assert out_tiled.shape == (B, NUM_OUT, 2 * D, 2 * H, 2 * W)
    err_fast = float(jnp.max(jnp.abs(out_fast - ref)))
    err_tiled = float(jnp.max(jnp.abs(out_tiled - ref)))
    if err_fast < 5e-3 and err_tiled < 5e-3:
        print("KERNEL_OK")
    else:
        print(f"MISMATCH fast={err_fast} tiled={err_tiled}")
</pallas_src>

<mosaic_0001>
module attributes {stable_mosaic.version = 11 : i64} {
  func.func @_fused_upconv_kernel(%arg0: i32, %arg1: memref<1024x16xbf16, #tpu.memory_space<vmem>>, %arg2: memref<16x128xbf16, #tpu.memory_space<vmem>>, %arg3: memref<128x16xf32, #tpu.memory_space<vmem>>, %arg4: memref<16x128xf32, #tpu.memory_space<vmem>>, %arg5: memref<1x16xf32, #tpu.memory_space<vmem>>, %arg6: memref<1x16xf32, #tpu.memory_space<vmem>>, %arg7: memref<1x128xf32, #tpu.memory_space<vmem>>, %arg8: memref<1024x128xf32, #tpu.memory_space<vmem>>) attributes {dimension_semantics = [#tpu.dimension_semantics<arbitrary>], iteration_bounds = array<i64: 1>, scalar_prefetch = 0 : i64, scratch_operands = 0 : i64, tpu.core_type = #tpu.core_type<tc>, window_params = [{pipeline_mode = #tpu.pipeline_mode<synchronous>, transform_indices = @transform_0, window_bounds = array<i64: 1024, 16>}, {pipeline_mode = #tpu.pipeline_mode<synchronous>, transform_indices = @transform_1, window_bounds = array<i64: 16, 128>}, {pipeline_mode = #tpu.pipeline_mode<synchronous>, transform_indices = @transform_2, window_bounds = array<i64: 128, 16>}, {pipeline_mode = #tpu.pipeline_mode<synchronous>, transform_indices = @transform_3, window_bounds = array<i64: 16, 128>}, {pipeline_mode = #tpu.pipeline_mode<synchronous>, transform_indices = @transform_4, window_bounds = array<i64: 1, 16>}, {pipeline_mode = #tpu.pipeline_mode<synchronous>, transform_indices = @transform_5, window_bounds = array<i64: 1, 16>}, {pipeline_mode = #tpu.pipeline_mode<synchronous>, transform_indices = @transform_6, window_bounds = array<i64: 1, 128>}, {pipeline_mode = #tpu.pipeline_mode<synchronous>, transform_indices = @transform_7, window_bounds = array<i64: 1024, 128>}]} {
    %c0 = arith.constant 0 : index
    %c0_0 = arith.constant 0 : index
    %0 = vector.load %arg2[%c0, %c0_0] : memref<16x128xbf16, #tpu.memory_space<vmem>>, vector<16x128xbf16>
    %cst = arith.constant 0.000000e+00 : f32
    %1 = vector.broadcast %cst : f32 to vector<1x128xf32>
    %c0_i32 = arith.constant 0 : i32
    %c256_i32 = arith.constant 256 : i32
    %2 = arith.muli %c0_i32, %c256_i32 : i32
    %3 = tpu.assume_multiple %2, 256 : i32
    %4 = arith.index_cast %3 : i32 to index
    %c0_1 = arith.constant 0 : index
    %5 = vector.load %arg1[%4, %c0_1] : memref<1024x16xbf16, #tpu.memory_space<vmem>>, vector<256x16xbf16>
    %cst_2 = arith.constant dense<0.000000e+00> : vector<256x128xf32>
    %6 = tpu.matmul %5, %0, %cst_2 {dimension_numbers = #tpu.dot_dimension_numbers<[1], [0], [0], [1], [0, 0, 1, 1], [], []>} : vector<256x16xbf16>, vector<16x128xbf16>, vector<256x128xf32> -> vector<256x128xf32>
    %cst_3 = arith.constant dense<0.000000e+00> : vector<128xf32>
    %7 = vector.multi_reduction <add>, %6, %cst_3 [0] : vector<256x128xf32> to vector<128xf32>
    %8 = vector.shape_cast %7 : vector<128xf32> to vector<1x128xf32>
    %9 = arith.addf %1, %8 : vector<1x128xf32>
    %10 = arith.mulf %6, %6 : vector<256x128xf32>
    %cst_4 = arith.constant dense<0.000000e+00> : vector<128xf32>
    %11 = vector.multi_reduction <add>, %10, %cst_4 [0] : vector<256x128xf32> to vector<128xf32>
    %12 = vector.shape_cast %11 : vector<128xf32> to vector<1x128xf32>
    %13 = arith.addf %1, %12 : vector<1x128xf32>
    %c1_i32 = arith.constant 1 : i32
    %c256_i32_5 = arith.constant 256 : i32
    %14 = arith.muli %c1_i32, %c256_i32_5 : i32
    %15 = tpu.assume_multiple %14, 256 : i32
    %16 = arith.index_cast %15 : i32 to index
    %c0_6 = arith.constant 0 : index
    %17 = vector.load %arg1[%16, %c0_6] : memref<1024x16xbf16, #tpu.memory_space<vmem>>, vector<256x16xbf16>
    %cst_7 = arith.constant dense<0.000000e+00> : vector<256x128xf32>
    %18 = tpu.matmul %17, %0, %cst_7 {dimension_numbers = #tpu.dot_dimension_numbers<[1], [0], [0], [1], [0, 0, 1, 1], [], []>} : vector<256x16xbf16>, vector<16x128xbf16>, vector<256x128xf32> -> vector<256x128xf32>
    %cst_8 = arith.constant dense<0.000000e+00> : vector<128xf32>
    %19 = vector.multi_reduction <add>, %18, %cst_8 [0] : vector<256x128xf32> to vector<128xf32>
    %20 = vector.shape_cast %19 : vector<128xf32> to vector<1x128xf32>
    %21 = arith.addf %9, %20 : vector<1x128xf32>
    %22 = arith.mulf %18, %18 : vector<256x128xf32>
    %cst_9 = arith.constant dense<0.000000e+00> : vector<128xf32>
    %23 = vector.multi_reduction <add>, %22, %cst_9 [0] : vector<256x128xf32> to vector<128xf32>
    %24 = vector.shape_cast %23 : vector<128xf32> to vector<1x128xf32>
    %25 = arith.addf %13, %24 : vector<1x128xf32>
    %c2_i32 = arith.constant 2 : i32
    %c256_i32_10 = arith.constant 256 : i32
    %26 = arith.muli %c2_i32, %c256_i32_10 : i32
    %27 = tpu.assume_multiple %26, 256 : i32
    %28 = arith.index_cast %27 : i32 to index
    %c0_11 = arith.constant 0 : index
    %29 = vector.load %arg1[%28, %c0_11] : memref<1024x16xbf16, #tpu.memory_space<vmem>>, vector<256x16xbf16>
    %cst_12 = arith.constant dense<0.000000e+00> : vector<256x128xf32>
    %30 = tpu.matmul %29, %0, %cst_12 {dimension_numbers = #tpu.dot_dimension_numbers<[1], [0], [0], [1], [0, 0, 1, 1], [], []>} : vector<256x16xbf16>, vector<16x128xbf16>, vector<256x128xf32> -> vector<256x128xf32>
    %cst_13 = arith.constant dense<0.000000e+00> : vector<128xf32>
    %31 = vector.multi_reduction <add>, %30, %cst_13 [0] : vector<256x128xf32> to vector<128xf32>
    %32 = vector.shape_cast %31 : vector<128xf32> to vector<1x128xf32>
    %33 = arith.addf %21, %32 : vector<1x128xf32>
    %34 = arith.mulf %30, %30 : vector<256x128xf32>
    %cst_14 = arith.constant dense<0.000000e+00> : vector<128xf32>
    %35 = vector.multi_reduction <add>, %34, %cst_14 [0] : vector<256x128xf32> to vector<128xf32>
    %36 = vector.shape_cast %35 : vector<128xf32> to vector<1x128xf32>
    %37 = arith.addf %25, %36 : vector<1x128xf32>
    %c3_i32 = arith.constant 3 : i32
    %c256_i32_15 = arith.constant 256 : i32
    %38 = arith.muli %c3_i32, %c256_i32_15 : i32
    %39 = tpu.assume_multiple %38, 256 : i32
    %40 = arith.index_cast %39 : i32 to index
    %c0_16 = arith.constant 0 : index
    %41 = vector.load %arg1[%40, %c0_16] : memref<1024x16xbf16, #tpu.memory_space<vmem>>, vector<256x16xbf16>
    %cst_17 = arith.constant dense<0.000000e+00> : vector<256x128xf32>
    %42 = tpu.matmul %41, %0, %cst_17 {dimension_numbers = #tpu.dot_dimension_numbers<[1], [0], [0], [1], [0, 0, 1, 1], [], []>} : vector<256x16xbf16>, vector<16x128xbf16>, vector<256x128xf32> -> vector<256x128xf32>
    %cst_18 = arith.constant dense<0.000000e+00> : vector<128xf32>
    %43 = vector.multi_reduction <add>, %42, %cst_18 [0] : vector<256x128xf32> to vector<128xf32>
    %44 = vector.shape_cast %43 : vector<128xf32> to vector<1x128xf32>
    %45 = arith.addf %33, %44 : vector<1x128xf32>
    %46 = arith.mulf %42, %42 : vector<256x128xf32>
    %cst_19 = arith.constant dense<0.000000e+00> : vector<128xf32>
    %47 = vector.multi_reduction <add>, %46, %cst_19 [0] : vector<256x128xf32> to vector<128xf32>
    %48 = vector.shape_cast %47 : vector<128xf32> to vector<1x128xf32>
    %49 = arith.addf %37, %48 : vector<1x128xf32>
    %c4_i32 = arith.constant 4 : i32
    %c0_20 = arith.constant 0 : index
    %c0_21 = arith.constant 0 : index
    %50 = vector.load %arg3[%c0_20, %c0_21] : memref<128x16xf32, #tpu.memory_space<vmem>>, vector<128x16xf32>
    %cst_22 = arith.constant dense<0.000000e+00> : vector<1x16xf32>
    %51 = tpu.matmul %45, %50, %cst_22 {dimension_numbers = #tpu.dot_dimension_numbers<[1], [0], [0], [1], [0, 0, 1, 1], [], []>} : vector<1x128xf32>, vector<128x16xf32>, vector<1x16xf32> -> vector<1x16xf32>
    %c0_23 = arith.constant 0 : index
    %c0_24 = arith.constant 0 : index
    %52 = vector.load %arg3[%c0_23, %c0_24] : memref<128x16xf32, #tpu.memory_space<vmem>>, vector<128x16xf32>
    %cst_25 = arith.constant dense<0.000000e+00> : vector<1x16xf32>
    %53 = tpu.matmul %49, %52, %cst_25 {dimension_numbers = #tpu.dot_dimension_numbers<[1], [0], [0], [1], [0, 0, 1, 1], [], []>} : vector<1x128xf32>, vector<128x16xf32>, vector<1x16xf32> -> vector<1x16xf32>
    %54 = arith.mulf %51, %51 : vector<1x16xf32>
    %55 = arith.subf %53, %54 : vector<1x16xf32>
    %cst_26 = arith.constant 0.000000e+00 : f32
    %56 = vector.broadcast %cst_26 : f32 to vector<1x16xf32>
    %57 = arith.maximumf %55, %56 : vector<1x16xf32>
    %c0_27 = arith.constant 0 : index
    %c0_28 = arith.constant 0 : index
    %58 = vector.load %arg5[%c0_27, %c0_28] : memref<1x16xf32, #tpu.memory_space<vmem>>, vector<1x16xf32>
    %cst_29 = arith.constant 9.99999974E-6 : f32
    %59 = vector.broadcast %cst_29 : f32 to vector<1x16xf32>
    %60 = arith.addf %57, %59 : vector<1x16xf32>
    %61 = math.rsqrt %60 : vector<1x16xf32>
    %62 = arith.mulf %58, %61 : vector<1x16xf32>
    %c0_30 = arith.constant 0 : index
    %c0_31 = arith.constant 0 : index
    %63 = vector.load %arg6[%c0_30, %c0_31] : memref<1x16xf32, #tpu.memory_space<vmem>>, vector<1x16xf32>
    %64 = arith.mulf %51, %62 : vector<1x16xf32>
    %65 = arith.subf %63, %64 : vector<1x16xf32>
    %c0_32 = arith.constant 0 : index
    %c0_33 = arith.constant 0 : index
    %66 = vector.load %arg4[%c0_32, %c0_33] : memref<16x128xf32, #tpu.memory_space<vmem>>, vector<16x128xf32>
    %cst_34 = arith.constant dense<0.000000e+00> : vector<1x128xf32>
    %67 = tpu.matmul %62, %66, %cst_34 {dimension_numbers = #tpu.dot_dimension_numbers<[1], [0], [0], [1], [0, 0, 1, 1], [], []>} : vector<1x16xf32>, vector<16x128xf32>, vector<1x128xf32> -> vector<1x128xf32>
    %c0_35 = arith.constant 0 : index
    %c0_36 = arith.constant 0 : index
    %68 = vector.load %arg4[%c0_35, %c0_36] : memref<16x128xf32, #tpu.memory_space<vmem>>, vector<16x128xf32>
    %cst_37 = arith.constant dense<0.000000e+00> : vector<1x128xf32>
    %69 = tpu.matmul %65, %68, %cst_37 {dimension_numbers = #tpu.dot_dimension_numbers<[1], [0], [0], [1], [0, 0, 1, 1], [], []>} : vector<1x16xf32>, vector<16x128xf32>, vector<1x128xf32> -> vector<1x128xf32>
    %c0_38 = arith.constant 0 : index
    %c0_39 = arith.constant 0 : index
    %70 = vector.load %arg7[%c0_38, %c0_39] : memref<1x128xf32, #tpu.memory_space<vmem>>, vector<1x128xf32>
    %c0_i32_40 = arith.constant 0 : i32
    %c256_i32_41 = arith.constant 256 : i32
    %71 = arith.muli %c0_i32_40, %c256_i32_41 : i32
    %72 = tpu.assume_multiple %71, 256 : i32
    %73 = arith.index_cast %72 : i32 to index
    %c0_42 = arith.constant 0 : index
    %74 = vector.load %arg1[%73, %c0_42] : memref<1024x16xbf16, #tpu.memory_space<vmem>>, vector<256x16xbf16>
    %cst_43 = arith.constant dense<0.000000e+00> : vector<256x128xf32>
    %75 = tpu.matmul %74, %0, %cst_43 {dimension_numbers = #tpu.dot_dimension_numbers<[1], [0], [0], [1], [0, 0, 1, 1], [], []>} : vector<256x16xbf16>, vector<16x128xbf16>, vector<256x128xf32> -> vector<256x128xf32>
    %76 = vector.broadcast %67 : vector<1x128xf32> to vector<256x128xf32>
    %77 = arith.mulf %75, %76 : vector<256x128xf32>
    %78 = vector.broadcast %69 : vector<1x128xf32> to vector<256x128xf32>
    %79 = arith.addf %77, %78 : vector<256x128xf32>
    %cst_44 = arith.constant 0.000000e+00 : f32
    %80 = vector.broadcast %cst_44 : f32 to vector<256x128xf32>
    %81 = arith.cmpf oge, %79, %80 : vector<256x128xf32>
    %82 = vector.broadcast %70 : vector<1x128xf32> to vector<256x128xf32>
    %83 = arith.mulf %82, %79 : vector<256x128xf32>
    %84 = arith.select %81, %79, %83 : vector<256x128xi1>, vector<256x128xf32>
    %85 = arith.index_cast %72 : i32 to index
    %c0_45 = arith.constant 0 : index
    %86 = vector.load %arg8[%85, %c0_45] : memref<1024x128xf32, #tpu.memory_space<vmem>>, vector<256x128xf32>
    tpu.vector_store %arg8[%85, %c0_45], %84 {strides = array<i32>} : memref<1024x128xf32, #tpu.memory_space<vmem>>, vector<256x128xf32>,
    %c1_i32_46 = arith.constant 1 : i32
    %c256_i32_47 = arith.constant 256 : i32
    %87 = arith.muli %c1_i32_46, %c256_i32_47 : i32
    %88 = tpu.assume_multiple %87, 256 : i32
    %89 = arith.index_cast %88 : i32 to index
    %c0_48 = arith.constant 0 : index
    %90 = vector.load %arg1[%89, %c0_48] : memref<1024x16xbf16, #tpu.memory_space<vmem>>, vector<256x16xbf16>
    %cst_49 = arith.constant dense<0.000000e+00> : vector<256x128xf32>
    %91 = tpu.matmul %90, %0, %cst_49 {dimension_numbers = #tpu.dot_dimension_numbers<[1], [0], [0], [1], [0, 0, 1, 1], [], []>} : vector<256x16xbf16>, vector<16x128xbf16>, vector<256x128xf32> -> vector<256x128xf32>
    %92 = vector.broadcast %67 : vector<1x128xf32> to vector<256x128xf32>
    %93 = arith.mulf %91, %92 : vector<256x128xf32>
    %94 = vector.broadcast %69 : vector<1x128xf32> to vector<256x128xf32>
    %95 = arith.addf %93, %94 : vector<256x128xf32>
    %cst_50 = arith.constant 0.000000e+00 : f32
    %96 = vector.broadcast %cst_50 : f32 to vector<256x128xf32>
    %97 = arith.cmpf oge, %95, %96 : vector<256x128xf32>
    %98 = vector.broadcast %70 : vector<1x128xf32> to vector<256x128xf32>
    %99 = arith.mulf %98, %95 : vector<256x128xf32>
    %100 = arith.select %97, %95, %99 : vector<256x128xi1>, vector<256x128xf32>
    %101 = arith.index_cast %88 : i32 to index
    %c0_51 = arith.constant 0 : index
    %102 = vector.load %arg8[%101, %c0_51] : memref<1024x128xf32, #tpu.memory_space<vmem>>, vector<256x128xf32>
    tpu.vector_store %arg8[%101, %c0_51], %100 {strides = array<i32>} : memref<1024x128xf32, #tpu.memory_space<vmem>>, vector<256x128xf32>,
    %c2_i32_52 = arith.constant 2 : i32
    %c256_i32_53 = arith.constant 256 : i32
    %103 = arith.muli %c2_i32_52, %c256_i32_53 : i32
    %104 = tpu.assume_multiple %103, 256 : i32
    %105 = arith.index_cast %104 : i32 to index
    %c0_54 = arith.constant 0 : index
    %106 = vector.load %arg1[%105, %c0_54] : memref<1024x16xbf16, #tpu.memory_space<vmem>>, vector<256x16xbf16>
    %cst_55 = arith.constant dense<0.000000e+00> : vector<256x128xf32>
    %107 = tpu.matmul %106, %0, %cst_55 {dimension_numbers = #tpu.dot_dimension_numbers<[1], [0], [0], [1], [0, 0, 1, 1], [], []>} : vector<256x16xbf16>, vector<16x128xbf16>, vector<256x128xf32> -> vector<256x128xf32>
    %108 = vector.broadcast %67 : vector<1x128xf32> to vector<256x128xf32>
    %109 = arith.mulf %107, %108 : vector<256x128xf32>
    %110 = vector.broadcast %69 : vector<1x128xf32> to vector<256x128xf32>
    %111 = arith.addf %109, %110 : vector<256x128xf32>
    %cst_56 = arith.constant 0.000000e+00 : f32
    %112 = vector.broadcast %cst_56 : f32 to vector<256x128xf32>
    %113 = arith.cmpf oge, %111, %112 : vector<256x128xf32>
    %114 = vector.broadcast %70 : vector<1x128xf32> to vector<256x128xf32>
    %115 = arith.mulf %114, %111 : vector<256x128xf32>
    %116 = arith.select %113, %111, %115 : vector<256x128xi1>, vector<256x128xf32>
    %117 = arith.index_cast %104 : i32 to index
    %c0_57 = arith.constant 0 : index
    %118 = vector.load %arg8[%117, %c0_57] : memref<1024x128xf32, #tpu.memory_space<vmem>>, vector<256x128xf32>
    tpu.vector_store %arg8[%117, %c0_57], %116 {strides = array<i32>} : memref<1024x128xf32, #tpu.memory_space<vmem>>, vector<256x128xf32>,
    %c3_i32_58 = arith.constant 3 : i32
    %c256_i32_59 = arith.constant 256 : i32
    %119 = arith.muli %c3_i32_58, %c256_i32_59 : i32
    %120 = tpu.assume_multiple %119, 256 : i32
    %121 = arith.index_cast %120 : i32 to index
    %c0_60 = arith.constant 0 : index
    %122 = vector.load %arg1[%121, %c0_60] : memref<1024x16xbf16, #tpu.memory_space<vmem>>, vector<256x16xbf16>
    %cst_61 = arith.constant dense<0.000000e+00> : vector<256x128xf32>
    %123 = tpu.matmul %122, %0, %cst_61 {dimension_numbers = #tpu.dot_dimension_numbers<[1], [0], [0], [1], [0, 0, 1, 1], [], []>} : vector<256x16xbf16>, vector<16x128xbf16>, vector<256x128xf32> -> vector<256x128xf32>
    %124 = vector.broadcast %67 : vector<1x128xf32> to vector<256x128xf32>
    %125 = arith.mulf %123, %124 : vector<256x128xf32>
    %126 = vector.broadcast %69 : vector<1x128xf32> to vector<256x128xf32>
    %127 = arith.addf %125, %126 : vector<256x128xf32>
    %cst_62 = arith.constant 0.000000e+00 : f32
    %128 = vector.broadcast %cst_62 : f32 to vector<256x128xf32>
    %129 = arith.cmpf oge, %127, %128 : vector<256x128xf32>
    %130 = vector.broadcast %70 : vector<1x128xf32> to vector<256x128xf32>
    %131 = arith.mulf %130, %127 : vector<256x128xf32>
    %132 = arith.select %129, %127, %131 : vector<256x128xi1>, vector<256x128xf32>
    %133 = arith.index_cast %120 : i32 to index
    %c0_63 = arith.constant 0 : index
    %134 = vector.load %arg8[%133, %c0_63] : memref<1024x128xf32, #tpu.memory_space<vmem>>, vector<256x128xf32>
    tpu.vector_store %arg8[%133, %c0_63], %132 {strides = array<i32>} : memref<1024x128xf32, #tpu.memory_space<vmem>>, vector<256x128xf32>,
    %c4_i32_64 = arith.constant 4 : i32
    return
  }
  func.func @transform_0(%arg0: i32) -> (i32, i32) {
    %c0_i32 = arith.constant 0 : i32
    %c0_i32_0 = arith.constant 0 : i32
    %c0_i32_1 = arith.constant 0 : i32
    return %c0_i32, %c0_i32_0 : i32, i32
  }
  func.func @transform_1(%arg0: i32) -> (i32, i32) {
    %c0_i32 = arith.constant 0 : i32
    %c0_i32_0 = arith.constant 0 : i32
    %c0_i32_1 = arith.constant 0 : i32
    return %c0_i32, %c0_i32_0 : i32, i32
  }
  func.func @transform_2(%arg0: i32) -> (i32, i32) {
    %c0_i32 = arith.constant 0 : i32
    %c0_i32_0 = arith.constant 0 : i32
    %c0_i32_1 = arith.constant 0 : i32
    return %c0_i32, %c0_i32_0 : i32, i32
  }
  func.func @transform_3(%arg0: i32) -> (i32, i32) {
    %c0_i32 = arith.constant 0 : i32
    %c0_i32_0 = arith.constant 0 : i32
    %c0_i32_1 = arith.constant 0 : i32
    return %c0_i32, %c0_i32_0 : i32, i32
  }
  func.func @transform_4(%arg0: i32) -> (i32, i32) {
    %c0_i32 = arith.constant 0 : i32
    %c0_i32_0 = arith.constant 0 : i32
    %c0_i32_1 = arith.constant 0 : i32
    return %c0_i32, %c0_i32_0 : i32, i32
  }
  func.func @transform_5(%arg0: i32) -> (i32, i32) {
    %c0_i32 = arith.constant 0 : i32
    %c0_i32_0 = arith.constant 0 : i32
    %c0_i32_1 = arith.constant 0 : i32
    return %c0_i32, %c0_i32_0 : i32, i32
  }
  func.func @transform_6(%arg0: i32) -> (i32, i32) {
    %c0_i32 = arith.constant 0 : i32
    %c0_i32_0 = arith.constant 0 : i32
    %c0_i32_1 = arith.constant 0 : i32
    return %c0_i32, %c0_i32_0 : i32, i32
  }
  func.func @transform_7(%arg0: i32) -> (i32, i32) {
    %c0_i32 = arith.constant 0 : i32
    %c0_i32_0 = arith.constant 0 : i32
    %c0_i32_1 = arith.constant 0 : i32
    return %c0_i32, %c0_i32_0 : i32, i32
  }
}

</mosaic_0001>

<bundles_post_ra>
// kernel: tile.20
= control target key start
LH: loop header
LB: loop body
LE: loop exit
PB: predicated region body
PF: predicated region fallthrough
CT: control target
= control target key end

     0   :  { %2 = vsyncpa [#allocation1], 0  ;;  %s44_s6 = smov [#allocation0]   ;;  %s70_s0 = inlined_call_operand.hbm [shape: f32[16], index: 0, kind: input, shape index: {}]   ;;  %s71_s1 = inlined_call_operand.vmem [shape: f32[8,16], index: 1, kind: output, shape index: {}]  }
   0x1   :  { %s9_s7 = sshll.u32 %s44_s6, 4  ;;  %s20_s10 = scalar_lea.hbm %s70_s0, 16  ;;  %s10_s7 = int_to_ptr.vmem [resolvable:$true] %s9_s7 }
   0x2   :  { %p21_p0 = scmp.ne.s32.totalorder %s70_s0, %s20_s10  ;;  %p24_p1 = scmp.lt.u32.totalorder %s20_s10, %s70_s0 }
   0x4   :  { %p26_p2 = pnand %p24_p1, %p21_p0 }
   0x6   :  { %29 = shalt.err (!%p26_p2)
}
   0x7   :  { %s30_s15 = scalar_lea.vmem %s10_s7, 16  ;;  %s34_s16 = scalar_lea.vmem %s10_s7, 32 }
   0x8   :  { %p31_p3 = scmp.ne.s32.totalorder %s10_s7, %s30_s15  ;;  %p35_p4 = scmp.lt.s32.totalorder %s10_s7, %s10_s7 }
   0x9   :  { %p36_p5 = scmp.lt.s32.totalorder %s34_s16, %s30_s15 }
   0xb   :  { %p37_p6 = por %p36_p5, %p35_p4 }
   0xd   :  { %p38_p7 = pnand %p37_p6, %p31_p3 }
   0xf   :  { %41 = shalt.err (!%p38_p7)
}
  0x10   :  { %12 = dma.hbm_to_vmem [thread:$0]  %s70_s0, 16, %s10_s7, [#allocation1]  }
  0x11   :  { %42 = dma.done.wait [#allocation1], 16  }
  0x12   :  { %43 = vsyncadd [#allocation1], 4294967280  ;;  %v16_v0 = vld [vmem:[#allocation0] ss:$0 sm:$0xff] }
  0x13   :  { %17 = vst [vmem:[%s71_s1] sm:$0xff] %v16_v0 }
  0x14   :  { %18 = vsyncpa [#allocation1], 1 }

// kernel: eq.15
= control target key start
LH: loop header
LB: loop body
LE: loop exit
PB: predicated region body
PF: predicated region fallthrough
CT: control target
= control target key end

     0   :  { %s67_s10 = smov 112   ;;  %s68_s11 = smov 80   ;;  %vm3_vm0 = vcmask 130048   ;;  %vm9_vm1 = vcmask 1048448   ;;  %vm15_vm2 = vcmask 917248   ;;  %vm21_vm3 = vcmask 786048   ;;  %s111_s0 = inlined_call_operand.vmem [shape: s32[8,16], index: 0, kind: input, shape index: {}]   ;;  %s112_s1 = inlined_call_operand.vmem [shape: s32[128], index: 1, kind: output, shape index: {}]  }
   0x1   :  { %v53_v0 = vld [vmem:[%s111_s0 + $0x7] sm:$0x1]   ;;  %v55_v1 = vld [vmem:[%s111_s0 + $0x5] sm:$0x1]   ;;  %v54_v2 = vld [vmem:[%s111_s0 + $0x6] sm:$0x1]  }
   0x2   :  { %7 = vrot.lane.b32.xlu0 %v53_v0, %s67_s10  ;;  %19 = vrot.lane.b32.xlu1 %v55_v1, %s68_s11  ;;  %v56_v3 = vld [vmem:[%s111_s0 + $0x4] sm:$0x1]   ;;  %v2_v4 = vld [vmem:[%s111_s0] sm:$0x1]   ;;  %s69_s18 = smov 96   ;;  %s70_s19 = smov 64  }
   0x3   :  { %4 = vst.msk [vmem:[#allocation0] sm:$0x1] %vm3_vm0, %v2_v4   ;;  %v57_v5 = vld [vmem:[%s111_s0 + $0x3] sm:$0x1]   ;;  %v58_v6 = vld [vmem:[%s111_s0 + $0x2] sm:$0x1]  }
   0x4   :  { %s71_s24 = smov 48   ;;  %s72_s25 = smov 32   ;;  %v59_v7 = vld [vmem:[%s111_s0 + $0x1] sm:$0x1]   ;;  %vm27_vm4 = vcmask 654848   ;;  %vm33_vm5 = vcmask 523648  }
   0x5   :  { %s73_s0 = smov 16   ;;  %vm39_vm6 = vcmask 392448   ;;  %vm45_vm7 = vcmask 261248  }
   0x6   :  { %13 = vrot.lane.b32.xlu0 %v54_v2, %s69_s18  ;;  %25 = vrot.lane.b32.xlu1 %v56_v3, %s70_s19 }
   0xa   :  { %31 = vrot.lane.b32.xlu0 %v57_v5, %s71_s24  ;;  %37 = vrot.lane.b32.xlu1 %v58_v6, %s72_s25 }
   0xe   :  { %43 = vrot.lane.b32.xlu0 %v59_v7, %s73_s0 }
  0x74   :  { %v8_v8 = vpop.permute.xlu0 %7   ;;  %v20_v9 = vpop.permute.xlu1 %19  }
  0x75   :  { %10 = vst.msk [vmem:[#allocation0] sm:$0x1] %vm9_vm1, %v8_v8  }
  0x78   :  { %v14_v10 = vpop.permute.xlu0 %13   ;;  %v26_v11 = vpop.permute.xlu1 %25  }
  0x79   :  { %16 = vst.msk [vmem:[#allocation0] sm:$0x1] %vm15_vm2, %v14_v10  }
  0x7a   :  { %22 = vst.msk [vmem:[#allocation0] sm:$0x1] %vm21_vm3, %v20_v9  }
  0x7b   :  { %28 = vst.msk [vmem:[#allocation0] sm:$0x1] %vm27_vm4, %v26_v11  }
  0x7c   :  { %v32_v12 = vpop.permute.xlu0 %31   ;;  %v38_v13 = vpop.permute.xlu1 %37  }
  0x7d   :  { %34 = vst.msk [vmem:[#allocation0] sm:$0x1] %vm33_vm5, %v32_v12  }
  0x7e   :  { %40 = vst.msk [vmem:[#allocation0] sm:$0x1] %vm39_vm6, %v38_v13  }
  0x80   :  { %v44_v14 = vpop.permute.xlu0 %43  }
  0x81   :  { %46 = vst.msk [vmem:[#allocation0] sm:$0x1] %vm45_vm7, %v44_v14  }
  0x88   :  { %v50_v15 = vld [vmem:[#allocation0] sm:$0x1] }
  0x89   :  { %52 = vst [vmem:[%s112_s1] sm:$0x1] %v50_v15 }

// kernel: tile.21
= control target key start
LH: loop header
LB: loop body
LE: loop exit
PB: predicated region body
PF: predicated region fallthrough
CT: control target
= control target key end

     0   :  { %s67_s10 = smov 112   ;;  %s68_s11 = smov 80   ;;  %vm3_vm0 = vcmask 130048   ;;  %vm9_vm1 = vcmask 1048448   ;;  %vm15_vm2 = vcmask 917248   ;;  %vm21_vm3 = vcmask 786048   ;;  %s111_s0 = inlined_call_operand.vmem [shape: f32[8,16], index: 0, kind: input, shape index: {}]   ;;  %s112_s1 = inlined_call_operand.vmem [shape: f32[1,128], index: 1, kind: output, shape index: {}]  }
   0x1   :  { %v53_v0 = vld [vmem:[%s111_s0 + $0x7] sm:$0x1]   ;;  %v55_v1 = vld [vmem:[%s111_s0 + $0x5] sm:$0x1]   ;;  %v54_v2 = vld [vmem:[%s111_s0 + $0x6] sm:$0x1]  }
   0x2   :  { %7 = vrot.lane.b32.xlu0 %v53_v0, %s67_s10  ;;  %19 = vrot.lane.b32.xlu1 %v55_v1, %s68_s11  ;;  %v56_v3 = vld [vmem:[%s111_s0 + $0x4] sm:$0x1]   ;;  %v2_v4 = vld [vmem:[%s111_s0] sm:$0x1]   ;;  %s69_s18 = smov 96   ;;  %s70_s19 = smov 64  }
   0x3   :  { %4 = vst.msk [vmem:[#allocation0] sm:$0x1] %vm3_vm0, %v2_v4   ;;  %v57_v5 = vld [vmem:[%s111_s0 + $0x3] sm:$0x1]   ;;  %v58_v6 = vld [vmem:[%s111_s0 + $0x2] sm:$0x1]  }
   0x4   :  { %s71_s24 = smov 48   ;;  %s72_s25 = smov 32   ;;  %v59_v7 = vld [vmem:[%s111_s0 + $0x1] sm:$0x1]   ;;  %vm27_vm4 = vcmask 654848   ;;  %vm33_vm5 = vcmask 523648  }
   0x5   :  { %s73_s0 = smov 16   ;;  %vm39_vm6 = vcmask 392448   ;;  %vm45_vm7 = vcmask 261248  }
   0x6   :  { %13 = vrot.lane.b32.xlu0 %v54_v2, %s69_s18  ;;  %25 = vrot.lane.b32.xlu1 %v56_v3, %s70_s19 }
   0xa   :  { %31 = vrot.lane.b32.xlu0 %v57_v5, %s71_s24  ;;  %37 = vrot.lane.b32.xlu1 %v58_v6, %s72_s25 }
   0xe   :  { %43 = vrot.lane.b32.xlu0 %v59_v7, %s73_s0 }
  0x74   :  { %v8_v8 = vpop.permute.xlu0 %7   ;;  %v20_v9 = vpop.permute.xlu1 %19  }
  0x75   :  { %10 = vst.msk [vmem:[#allocation0] sm:$0x1] %vm9_vm1, %v8_v8  }
  0x78   :  { %v14_v10 = vpop.permute.xlu0 %13   ;;  %v26_v11 = vpop.permute.xlu1 %25  }
  0x79   :  { %16 = vst.msk [vmem:[#allocation0] sm:$0x1] %vm15_vm2, %v14_v10  }
  0x7a   :  { %22 = vst.msk [vmem:[#allocation0] sm:$0x1] %vm21_vm3, %v20_v9  }
  0x7b   :  { %28 = vst.msk [vmem:[#allocation0] sm:$0x1] %vm27_vm4, %v26_v11  }
  0x7c   :  { %v32_v12 = vpop.permute.xlu0 %31   ;;  %v38_v13 = vpop.permute.xlu1 %37  }
  0x7d   :  { %34 = vst.msk [vmem:[#allocation0] sm:$0x1] %vm33_vm5, %v32_v12  }
  0x7e   :  { %40 = vst.msk [vmem:[#allocation0] sm:$0x1] %vm39_vm6, %v38_v13  }
  0x80   :  { %v44_v14 = vpop.permute.xlu0 %43  }
  0x81   :  { %46 = vst.msk [vmem:[#allocation0] sm:$0x1] %vm45_vm7, %v44_v14  }
  0x88   :  { %v50_v15 = vld [vmem:[#allocation0] sm:$0x1] }
  0x89   :  { %52 = vst [vmem:[%s112_s1] sm:$0x1] %v50_v15 }

// kernel: up_trans_forward.1
= control target key start
LH: loop header
LB: loop body
LE: loop exit
PB: predicated region body
PF: predicated region fallthrough
CT: control target
= control target key end

     0   :  { %12 = vsyncpa [#allocation3], 0  ;;  %s7224_s0 = inlined_call_operand.vmem [shape: bf16[1024,16], index: 0, kind: input, shape index: {}]   ;;  %s7225_s1 = inlined_call_operand.vmem [shape: bf16[16,128], index: 1, kind: input, shape index: {}]   ;;  %s7226_s2 = inlined_call_operand.vmem [shape: f32[128,16], index: 2, kind: input, shape index: {}]   ;;  %s7227_s3 = inlined_call_operand.vmem [shape: f32[16,128], index: 3, kind: input, shape index: {}]   ;;  %s7228_s4 = inlined_call_operand.hbm [shape: f32[1,16], index: 4, kind: input, shape index: {}]   ;;  %s7229_s5 = inlined_call_operand.hbm [shape: f32[1,16], index: 5, kind: input, shape index: {}]   ;;  %s7230_s6 = inlined_call_operand.vmem [shape: f32[1,128], index: 6, kind: input, shape index: {}]   ;;  %s7231_s7 = inlined_call_operand.vmem [shape: f32[1024,128], index: 7, kind: output, shape index: {}]  }
   0x1   :  { %13 = vsyncpa [#allocation5], 0  ;;  %s5071_s24 = smov [#allocation2]   ;;  %s5072_s26 = smov [#allocation4]  }
   0x2   :  { %s28_s25 = sshll.u32 %s5071_s24, 4  ;;  %s38_s27 = sshll.u32 %s5072_s26, 4  ;;  %s29_s25 = int_to_ptr.vmem [resolvable:$true] %s28_s25  ;;  %s39_s27 = int_to_ptr.vmem [resolvable:$true] %s38_s27 }
   0x3   :  { %s5023_s30 = scalar_lea.hbm %s7228_s4, 16 }
   0x4   :  { %p5024_p0 = scmp.ne.s32.totalorder %s7228_s4, %s5023_s30  ;;  %p5027_p1 = scmp.lt.u32.totalorder %s5023_s30, %s7228_s4 }
   0x6   :  { %p5029_p2 = pnand %p5027_p1, %p5024_p0 }
   0x8   :  { %5032 = shalt.err (!%p5029_p2)
}
   0x9   :  { %s5033_s12 = scalar_lea.vmem %s29_s25, 16  ;;  %s5037_s13 = scalar_lea.vmem %s29_s25, 32 }
   0xa   :  { %p5034_p3 = scmp.ne.s32.totalorder %s29_s25, %s5033_s12  ;;  %p5038_p4 = scmp.lt.s32.totalorder %s29_s25, %s29_s25 }
   0xb   :  { %p5039_p5 = scmp.lt.s32.totalorder %s5037_s13, %s5033_s12 }
   0xd   :  { %p5040_p6 = por %p5039_p5, %p5038_p4 }
   0xf   :  { %p5041_p7 = pnand %p5040_p6, %p5034_p3 }
  0x11   :  { %5044 = shalt.err (!%p5041_p7)
}
  0x12   :  { %31 = dma.hbm_to_vmem [thread:$0]  %s7228_s4, 16, %s29_s25, [#allocation3]  }
  0x13   :  { %s5045_s18 = scalar_lea.hbm %s7229_s5, 16 }
  0x14   :  { %p5046_p8 = scmp.ne.s32.totalorder %s7229_s5, %s5045_s18  ;;  %p5049_p9 = scmp.lt.u32.totalorder %s5045_s18, %s7229_s5 }
  0x16   :  { %p5051_p10 = pnand %p5049_p9, %p5046_p8 }
  0x18   :  { %5054 = shalt.err (!%p5051_p10)
}
  0x19   :  { %s5055_s23 = scalar_lea.vmem %s39_s27, 16  ;;  %s5059_s24 = scalar_lea.vmem %s39_s27, 32 }
  0x1a   :  { %p5056_p11 = scmp.ne.s32.totalorder %s39_s27, %s5055_s23  ;;  %p5060_p12 = scmp.lt.s32.totalorder %s39_s27, %s39_s27 }
  0x1b   :  { %p5061_p13 = scmp.lt.s32.totalorder %s5059_s24, %s5055_s23 }
  0x1d   :  { %p5062_p0 = por %p5061_p13, %p5060_p12 }
  0x1f   :  { %p5063_p1 = pnand %p5062_p0, %p5056_p11 }
  0x21   :  { %5066 = shalt.err (!%p5063_p1)
}
  0x22   :  { %41 = dma.hbm_to_vmem [thread:$0]  %s7229_s5, 16, %s39_s27, [#allocation5]  }
  0x23   :  { %5067 = dma.done.wait [#allocation3], 16  }
  0x24   :  { %5068 = vsyncadd [#allocation3], 4294967280 }
  0x25   :  { %5069 = dma.done.wait [#allocation5], 16  }
  0x26   :  { %5070 = vsyncadd [#allocation5], 4294967280  ;;  %v4906_v0 = vld [vmem:[%s7225_s1] sm:$0xff]   ;;  %vm171_vm0 = vcmask 130048   ;;  %v4909_v3 = vld [vmem:[%s7224_s0 + $0x8] sm:$0xff]   ;;  %vm5074_vm1 = vmmov 0  }
  0x27   :  { %v4907_v1 = vld [vmem:[%s7224_s0] sm:$0xff]   ;;  %4523 = vmatprep.subr.bf16.mxu0 %v4906_v0  ;;  %4899 = vmatprep.subr.bf16.mxu1 %v4906_v0  ;;  %v4910_v4 = vld [vmem:[%s7224_s0 + $0x48] sm:$0xff]   ;;  %v4911_v5 = vld [vmem:[%s7224_s0 + $0x10] sm:$0xff]  }
  0x28   :  { %v4908_v2 = vld [vmem:[%s7224_s0 + $0x40] sm:$0xff]   ;;  %4524 = vmatpush3.bf16.msra.mxu0 %v4906_v0  ;;  %4900 = vmatpush3.bf16.msra.mxu1 %v4906_v0  ;;  %v4912_v6 = vld [vmem:[%s7224_s0 + $0x50] sm:$0xff]   ;;  %v4913_v7 = vld [vmem:[%s7224_s0 + $0x18] sm:$0xff]  }
  0x29   :  { %4525 = vmatprep.mubr.msk.bf16.mxu0 %vm171_vm0, %v4907_v1  ;;  %4541 = vmatprep.mubr.msk.bf16.mxu1 %vm171_vm0, %v4908_v2  ;;  %v4914_v8 = vld [vmem:[%s7224_s0 + $0x58] sm:$0xff]   ;;  %v4915_v9 = vld [vmem:[%s7224_s0 + $0x20] sm:$0xff]   ;;  %v4917_v11 = vld [vmem:[%s7224_s0 + $0x28] sm:$0xff]   ;;  %v7232_v1 = vmov 0.0|0.0  }
  0x2a   :  { %4557 = vmatprep.subr.bf16.mxu1 %v4906_v0  ;;  %4591 = vmatprep.subr.bf16.mxu0 %v4906_v0  ;;  %v4916_v10 = vld [vmem:[%s7224_s0 + $0x60] sm:$0xff]   ;;  %v4918_v12 = vld [vmem:[%s7224_s0 + $0x68] sm:$0xff]   ;;  %v4919_v13 = vld [vmem:[%s7224_s0 + $0x30] sm:$0xff]  }
  0x2b   :  { %4526 = vmatmul.mubr.msk.bf16.vlgmr.msra.gmra.mrb[0].mxu0 %vm171_vm0, %v4909_v3  ;;  %4542 = vmatmul.mubr.msk.bf16.vlgmr.msra.gmra.mrb[0].mxu1 %vm171_vm0, %v4910_v4  ;;  %v4920_v14 = vld [vmem:[%s7224_s0 + $0x70] sm:$0xff]   ;;  %v4921_v15 = vld [vmem:[%s7224_s0 + $0x38] sm:$0xff]   ;;  %v4923_v17 = vld [vmem:[%s7224_s0 + $0x80] sm:$0xff]  }
  0x2c   :  { %4558 = vmatpush3.bf16.msra.mxu1 %v4906_v0  ;;  %4529 = vmatprep.mubr.msk.bf16.mxu0 %vm171_vm0, %v4911_v5  ;;  %v4922_v16 = vld [vmem:[%s7224_s0 + $0x78] sm:$0xff]   ;;  %v4925_v18 = vld [vmem:[%s7224_s0 + $0x100] sm:$0xff]   ;;  %v4924_v19 = vld [vmem:[%s7224_s0 + $0x88] sm:$0xff]  }
  0x2d   :  { %4545 = vmatprep.mubr.msk.bf16.mxu1 %vm171_vm0, %v4912_v6  ;;  %4592 = vmatpush3.bf16.msra.mxu0 %v4906_v0  ;;  %v4926_v20 = vld [vmem:[%s7224_s0 + $0x108] sm:$0xff]   ;;  %v4927_v21 = vld [vmem:[%s7224_s0 + $0x90] sm:$0xff]   ;;  %v4928_v23 = vld [vmem:[%s7224_s0 + $0x98] sm:$0xff]  }
  0x2e   :  { %4625 = vmatprep.subr.bf16.mxu1 %v4906_v0  ;;  %v4929_v22 = vld [vmem:[%s7224_s0 + $0x110] sm:$0xff]   ;;  %v4930_v24 = vld [vmem:[%s7224_s0 + $0x118] sm:$0xff]   ;;  %v4931_v25 = vld [vmem:[%s7224_s0 + $0xa0] sm:$0xff]   ;;  %4845 = vmatprep.subr.bf16.mxu0 %v7232_v1 }
  0x2f   :  { %v4933_v26 = vld [vmem:[%s7224_s0 + $0x120] sm:$0xff]   ;;  %v4932_v27 = vld [vmem:[%s7224_s0 + $0xa8] sm:$0xff]   ;;  %v4935_v29 = vld [vmem:[%s7224_s0 + $0xb0] sm:$0xff]  }
  0x30   :  { %v4934_v28 = vld [vmem:[%s7224_s0 + $0x128] sm:$0xff]   ;;  %v4937_v30 = vld [vmem:[%s7224_s0 + $0x130] sm:$0xff]   ;;  %v4936_v31 = vld [vmem:[%s7224_s0 + $0xb8] sm:$0xff]  }
  0x31   :  { %v4938_v32 = vld [vmem:[%s7224_s0 + $0x138] sm:$0xff]   ;;  %v4939_v33 = vld [vmem:[%s7224_s0 + $0xc0] sm:$0xff]   ;;  %v4940_v35 = vld [vmem:[%s7224_s0 + $0xc8] sm:$0xff]  }
  0x32   :  { %v4941_v34 = vld [vmem:[%s7224_s0 + $0x140] sm:$0xff]   ;;  %v4942_v36 = vld [vmem:[%s7224_s0 + $0x148] sm:$0xff]   ;;  %v4943_v37 = vld [vmem:[%s7224_s0 + $0xd0] sm:$0xff]  }
  0x33   :  { %4530 = vmatmul.mubr.msk.bf16.gmra.mrb[4].mxu0 %vm171_vm0, %v4913_v7  ;;  %4546 = vmatmul.mubr.msk.bf16.gmra.mrb[4].mxu1 %vm171_vm0, %v4914_v8  ;;  %v4945_v38 = vld [vmem:[%s7224_s0 + $0x150] sm:$0xff]   ;;  %v4944_v39 = vld [vmem:[%s7224_s0 + $0xd8] sm:$0xff]   ;;  %v4947_v41 = vld [vmem:[%s7224_s0 + $0xe0] sm:$0xff]  }
  0x34   :  { %4533 = vmatprep.mubr.msk.bf16.mxu0 %vm171_vm0, %v4915_v9  ;;  %4549 = vmatprep.mubr.msk.bf16.mxu1 %vm171_vm0, %v4916_v10  ;;  %v4946_v40 = vld [vmem:[%s7224_s0 + $0x158] sm:$0xff]   ;;  %v4949_v42 = vld [vmem:[%s7224_s0 + $0x160] sm:$0xff]   ;;  %v4948_v43 = vld [vmem:[%s7224_s0 + $0xe8] sm:$0xff]  }
  0x35   :  { %v4950_v44 = vld [vmem:[%s7224_s0 + $0x168] sm:$0xff]   ;;  %v4951_v45 = vld [vmem:[%s7224_s0 + $0xf0] sm:$0xff]   ;;  %v4952_v47 = vld [vmem:[%s7224_s0 + $0xf8] sm:$0xff]  }
  0x36   :  { %v4953_v46 = vld [vmem:[%s7224_s0 + $0x170] sm:$0xff]   ;;  %v4954_v48 = vld [vmem:[%s7224_s0 + $0x178] sm:$0xff]   ;;  %v4955_v49 = vld [vmem:[%s7224_s0 + $0x180] sm:$0xff]  }
  0x37   :  { %v4956_v50 = vld [vmem:[%s7224_s0 + $0x188] sm:$0xff]   ;;  %v4957_v51 = vld [vmem:[%s7224_s0 + $0x190] sm:$0xff]   ;;  %v4958_v52 = vld [vmem:[%s7224_s0 + $0x198] sm:$0xff]  }
  0x38   :  { %v4959_v53 = vld [vmem:[%s7224_s0 + $0x1a0] sm:$0xff]   ;;  %v4960_v54 = vld [vmem:[%s7224_s0 + $0x1a8] sm:$0xff]   ;;  %v4961_v55 = vld [vmem:[%s7224_s0 + $0x1b0] sm:$0xff]  }
  0x39   :  { %v4962_v56 = vld [vmem:[%s7224_s0 + $0x1b8] sm:$0xff]   ;;  %v4963_v57 = vld [vmem:[%s7224_s0 + $0x1c0] sm:$0xff]   ;;  %v4964_v58 = vld [vmem:[%s7224_s0 + $0x1c8] sm:$0xff]  }
  0x3a   :  { %v4965_v59 = vld [vmem:[%s7224_s0 + $0x1d0] sm:$0xff]   ;;  %v4966_v60 = vld [vmem:[%s7224_s0 + $0x1d8] sm:$0xff]   ;;  %v4967_v61 = vld [vmem:[%s7224_s0 + $0x1e0] sm:$0xff]  }
  0x3b   :  { %4534 = vmatmul.mubr.msk.bf16.gmra.mrb[8].mxu0 %vm171_vm0, %v4917_v11  ;;  %4550 = vmatmul.mubr.msk.bf16.gmra.mrb[8].mxu1 %vm171_vm0, %v4918_v12  ;;  %v4968_v62 = vld [vmem:[%s7224_s0 + $0x1e8] sm:$0xff]   ;;  %v4969_v63 = vld [vmem:[%s7224_s0 + $0x1f0] sm:$0xff]   ;;  %v1779_v2 = vld [vmem:[%s7226_s2] sm:$0xff] }
  0x3c   :  { %4537 = vmatprep.mubr.msk.bf16.mxu0 %vm171_vm0, %v4919_v13  ;;  %4553 = vmatprep.mubr.msk.bf16.mxu1 %vm171_vm0, %v4920_v14  ;;  %v1780_v3 = vld [vmem:[%s7226_s2 + $0x8] sm:$0xff]  ;;  %v1781_v5 = vld [vmem:[%s7226_s2 + $0x10] sm:$0xff]  ;;  %v1782_v6 = vld [vmem:[%s7226_s2 + $0x18] sm:$0xff] }
  0x3d   :  { %v4846_v4 = vpack.c.bf16 %v1780_v3, %v1779_v2  ;;  %v4849_v7 = vpack.c.bf16 %v1782_v6, %v1781_v5  ;;  %v1787_v3 = vld [vmem:[%s7226_s2 + $0x40] sm:$0xff] }
  0x43   :  { %4538 = vmatmul.mubr.msk.bf16.gmra.mrb[12].mxu0 %vm171_vm0, %v4921_v15  ;;  %4554 = vmatmul.mubr.msk.bf16.gmra.mrb[12].mxu1 %vm171_vm0, %v4922_v16 }
  0x44   :  { %4559 = vmatprep.mubr.msk.bf16.mxu1 %vm171_vm0, %v4923_v17  ;;  %4593 = vmatprep.mubr.msk.bf16.mxu0 %vm171_vm0, %v4925_v18 }
  0x4b   :  { %4560 = vmatmul.mubr.msk.bf16.vlgmr.msra.gmra.mrb[16].mxu1 %vm171_vm0, %v4924_v19  ;;  %4594 = vmatmul.mubr.msk.bf16.vlgmr.msra.gmra.mrb[16].mxu0 %vm171_vm0, %v4926_v20  ;;  %v1783_v20 = vld [vmem:[%s7226_s2 + $0x20] sm:$0xff] }
  0x4c   :  { %4626 = vmatpush3.bf16.msra.mxu1 %v4906_v0  ;;  %4563 = vmatprep.mubr.msk.bf16.mxu1 %vm171_vm0, %v4927_v21  ;;  %v4970_v0 = vld [vmem:[%s7224_s0 + $0x1f8] sm:$0xff]   ;;  %v1784_v21 = vld [vmem:[%s7226_s2 + $0x28] sm:$0xff] }
  0x4d   :  { %4597 = vmatprep.mubr.msk.bf16.mxu0 %vm171_vm0, %v4929_v22  ;;  %4869 = vmatprep.subr.bf16.mxu1 %v7232_v1 }
  0x4e   :  { %4847 = vmatpush3.bf16.msra.mxu0 %v4846_v4 }
  0x4f   :  { %4848 = vmatprep.subr.bf16.mxu0 %v7232_v1 }
  0x52   :  { %4850 = vmatpush3.bf16.msra.mxu0 %v4849_v7 }
  0x53   :  { %4564 = vmatmul.mubr.msk.bf16.gmra.mrb[20].mxu1 %vm171_vm0, %v4928_v23  ;;  %4598 = vmatmul.mubr.msk.bf16.gmra.mrb[20].mxu0 %vm171_vm0, %v4930_v24 }
  0x54   :  { %4567 = vmatprep.mubr.msk.bf16.mxu1 %vm171_vm0, %v4931_v25  ;;  %4601 = vmatprep.mubr.msk.bf16.mxu0 %vm171_vm0, %v4933_v26  ;;  %v4852_v25 = vpack.c.bf16 %v1784_v21, %v1783_v20 }
  0x55   :  { %4851 = vmatprep.subr.bf16.mxu0 %v7232_v1 }
  0x56   :  { %4853 = vmatpush3.bf16.msra.mxu0 %v4852_v25 }
  0x57   :  { %4854 = vmatprep.subr.bf16.mxu0 %v7232_v1 }
  0x5b   :  { %4568 = vmatmul.mubr.msk.bf16.gmra.mrb[24].mxu1 %vm171_vm0, %v4932_v27  ;;  %4602 = vmatmul.mubr.msk.bf16.gmra.mrb[24].mxu0 %vm171_vm0, %v4934_v28 }
  0x5c   :  { %4571 = vmatprep.mubr.msk.bf16.mxu1 %vm171_vm0, %v4935_v29  ;;  %4605 = vmatprep.mubr.msk.bf16.mxu0 %vm171_vm0, %v4937_v30 }
  0x63   :  { %4572 = vmatmul.mubr.msk.bf16.gmra.mrb[28].mxu1 %vm171_vm0, %v4936_v31  ;;  %4606 = vmatmul.mubr.msk.bf16.gmra.mrb[28].mxu0 %vm171_vm0, %v4938_v32 }
  0x64   :  { %4575 = vmatprep.mubr.msk.bf16.mxu1 %vm171_vm0, %v4939_v33  ;;  %4609 = vmatprep.mubr.msk.bf16.mxu0 %vm171_vm0, %v4941_v34 }
  0x6b   :  { %4576 = vmatmul.mubr.msk.bf16.gmra.mrb[32].mxu1 %vm171_vm0, %v4940_v35  ;;  %4610 = vmatmul.mubr.msk.bf16.gmra.mrb[32].mxu0 %vm171_vm0, %v4942_v36 }
  0x6c   :  { %4579 = vmatprep.mubr.msk.bf16.mxu1 %vm171_vm0, %v4943_v37  ;;  %4613 = vmatprep.mubr.msk.bf16.mxu0 %vm171_vm0, %v4945_v38 }
  0x73   :  { %4580 = vmatmul.mubr.msk.bf16.gmra.mrb[36].mxu1 %vm171_vm0, %v4944_v39  ;;  %4614 = vmatmul.mubr.msk.bf16.gmra.mrb[36].mxu0 %vm171_vm0, %v4946_v40 }
  0x74   :  { %4583 = vmatprep.mubr.msk.bf16.mxu1 %vm171_vm0, %v4947_v41  ;;  %4617 = vmatprep.mubr.msk.bf16.mxu0 %vm171_vm0, %v4949_v42 }
  0x7b   :  { %4584 = vmatmul.mubr.msk.bf16.gmra.mrb[40].mxu1 %vm171_vm0, %v4948_v43  ;;  %4618 = vmatmul.mubr.msk.bf16.gmra.mrb[40].mxu0 %vm171_vm0, %v4950_v44  ;;  %v1785_v43 = vld [vmem:[%s7226_s2 + $0x30] sm:$0xff]  ;;  %v1786_v44 = vld [vmem:[%s7226_s2 + $0x38] sm:$0xff] }
  0x7c   :  { %4587 = vmatprep.mubr.msk.bf16.mxu1 %vm171_vm0, %v4951_v45  ;;  %4621 = vmatprep.mubr.msk.bf16.mxu0 %vm171_vm0, %v4953_v46 }
  0x83   :  { %4588 = vmatmul.mubr.msk.bf16.gmra.mrb[44].mxu1 %vm171_vm0, %v4952_v47  ;;  %4622 = vmatmul.mubr.msk.bf16.gmra.mrb[44].mxu0 %vm171_vm0, %v4954_v48  ;;  %v4855_v48 = vpack.c.bf16 %v1786_v44, %v1785_v43  ;;  %v1789_v44 = vld [vmem:[%s7226_s2 + $0x50] sm:$0xff] }
  0x84   :  { %4627 = vmatprep.mubr.msk.bf16.mxu1 %vm171_vm0, %v4955_v49 }
  0x85   :  { %4856 = vmatpush3.bf16.msra.mxu0 %v4855_v48 }
  0x86   :  { %4857 = vmatprep.subr.bf16.mxu0 %v7232_v1 }
  0x8b   :  { %4628 = vmatmul.mubr.msk.bf16.vlgmr.msra.gmra.mrb[48].mxu1 %vm171_vm0, %v4956_v50 }
  0x8c   :  { %4631 = vmatprep.mubr.msk.bf16.mxu1 %vm171_vm0, %v4957_v51  ;;  %4871 = vmatpush3.bf16.msra.mxu1 %v4846_v4  ;;  %v1788_v4 = vld [vmem:[%s7226_s2 + $0x48] sm:$0xff] }
  0x8d   :  { %4872 = vmatprep.subr.bf16.mxu1 %v7232_v1 }
  0x90   :  { %4874 = vmatpush3.bf16.msra.mxu1 %v4849_v7 }
  0x91   :  { %4875 = vmatprep.subr.bf16.mxu1 %v7232_v1 }
  0x93   :  { %4632 = vmatmul.mubr.msk.bf16.gmra.mrb[52].mxu1 %vm171_vm0, %v4958_v52 }
  0x94   :  { %4635 = vmatprep.mubr.msk.bf16.mxu1 %vm171_vm0, %v4959_v53  ;;  %4877 = vmatpush3.bf16.msra.mxu1 %v4852_v25 }
  0x95   :  { %4878 = vmatprep.subr.bf16.mxu1 %v7232_v1 }
  0x98   :  { %4880 = vmatpush3.bf16.msra.mxu1 %v4855_v48 }
  0x99   :  { %4881 = vmatprep.subr.bf16.mxu1 %v7232_v1 }
  0x9b   :  { %4636 = vmatmul.mubr.msk.bf16.gmra.mrb[56].mxu1 %vm171_vm0, %v4960_v54 }
  0x9c   :  { %4639 = vmatprep.mubr.msk.bf16.mxu1 %vm171_vm0, %v4961_v55 }
  0xa3   :  { %4640 = vmatmul.mubr.msk.bf16.gmra.mrb[60].mxu1 %vm171_vm0, %v4962_v56 }
  0xa4   :  { %4643 = vmatprep.mubr.msk.bf16.mxu1 %vm171_vm0, %v4963_v57 }
  0xab   :  { %4644 = vmatmul.mubr.msk.bf16.gmra.mrb[64].mxu1 %vm171_vm0, %v4964_v58 }
  0xac   :  { %4647 = vmatprep.mubr.msk.bf16.mxu1 %vm171_vm0, %v4965_v59 }
  0xb3   :  { %4648 = vmatmul.mubr.msk.bf16.gmra.mrb[68].mxu1 %vm171_vm0, %v4966_v60 }
  0xb4   :  { %4651 = vmatprep.mubr.msk.bf16.mxu1 %vm171_vm0, %v4967_v61 }
  0xbb   :  { %4652 = vmatmul.mubr.msk.bf16.gmra.mrb[72].mxu1 %vm171_vm0, %v4968_v62 }
  0xbc   :  { %4655 = vmatprep.mubr.msk.bf16.mxu1 %vm171_vm0, %v4969_v63 }
  0xc3   :  { %4656 = vmatmul.mubr.msk.bf16.gmra.mrb[76].mxu1 %vm171_vm0, %v4970_v0 }
  0xfe   :  { %v5415_v8 = vpop.f32.mrb[0].mxu0  ;;  %v5417_v9 = vpop.f32.mrb[0].mxu1 }
  0xff   :  { %7264 = vst [vmem:[#allocation8_spill] sm:$0xff] %v5417_v9  ;;  %v5419_v10 = vpop.f32.mrb[1].mxu0  ;;  %v5421_v11 = vpop.f32.mrb[1].mxu1  ;;  %v421_v17 = vmul.f32 %v5415_v8, %v5415_v8 }
 0x100   :  { %7265 = vst [vmem:[#allocation9_spill] sm:$0xff] %v5421_v11  ;;  %v419_v12 = vmul.f32 %v5419_v10, %v5419_v10  ;;  %v5427_v13 = vpop.f32.mrb[2].mxu0  ;;  %v5429_v14 = vpop.f32.mrb[2].mxu1  ;;  %v435_v43 = vmul.f32 %v5421_v11, %v5421_v11 }
 0x101   :  { %v5431_v15 = vpop.f32.mrb[3].mxu0  ;;  %v5433_v16 = vpop.f32.mrb[3].mxu1  ;;  %v422_v22 = vmul.f32 %v5427_v13, %v5427_v13 }
 0x102   :  { %7266 = vst [vmem:[#allocation10_spill] sm:$0xff] %v5433_v16  ;;  %v381_v18 = vadd.f32 %v5431_v15, %v5419_v10  ;;  %v420_v19 = vmul.f32 %v5431_v15, %v5431_v15 }
 0x104   :  { %v382_v23 = vadd.f32 %v5415_v8, %v381_v18  ;;  %v451_v24 = vadd.f32 %v420_v19, %v419_v12  ;;  %v4858_v12 = vpack.c.bf16 %v1788_v4, %v1787_v3 }
 0x106   :  { %v452_v26 = vadd.f32 %v451_v24, %v421_v17  ;;  %v5450_v27 = vpop.f32.mrb[4].mxu0  ;;  %v5452_v28 = vpop.f32.mrb[4].mxu1  ;;  %v383_v29 = vadd.f32 %v5427_v13, %v382_v23  ;;  %4859 = vmatpush3.bf16.msra.mxu0 %v4858_v12  ;;  %4883 = vmatpush3.bf16.msra.mxu1 %v4858_v12 }
 0x107   :  { %v5455_v30 = vpop.f32.mrb[5].mxu0  ;;  %v5457_v31 = vpop.f32.mrb[5].mxu1  ;;  %v425_v39 = vmul.f32 %v5450_v27, %v5450_v27  ;;  %4860 = vmatprep.subr.bf16.mxu0 %v7232_v1  ;;  %4884 = vmatprep.subr.bf16.mxu1 %v7232_v1 }
 0x108   :  { %v384_v32 = vadd.f32 %v383_v29, %v5455_v30  ;;  %v423_v33 = vmul.f32 %v5455_v30, %v5455_v30  ;;  %v453_v34 = vadd.f32 %v452_v26, %v422_v22  ;;  %v5464_v35 = vpop.f32.mrb[6].mxu0  ;;  %v5466_v36 = vpop.f32.mrb[6].mxu1 }
 0x109   :  { %7267 = vst [vmem:[#allocation11_spill] sm:$0xff] %v5464_v35  ;;  %v5468_v37 = vpop.f32.mrb[7].mxu0  ;;  %v5470_v38 = vpop.f32.mrb[7].mxu1  ;;  %v426_v45 = vmul.f32 %v5464_v35, %v5464_v35 }
 0x10a   :  { %v454_v40 = vadd.f32 %v453_v34, %v423_v33  ;;  %v385_v41 = vadd.f32 %v384_v32, %v5468_v37  ;;  %v424_v42 = vmul.f32 %v5468_v37, %v5468_v37  ;;  %v5581_v4 = vmul.f32 %v5470_v38, %v5470_v38 }
 0x10c   :  { %v386_v46 = vadd.f32 %v5450_v27, %v385_v41  ;;  %v455_v47 = vadd.f32 %v454_v40, %v424_v42  ;;  %v437_v42 = vmul.f32 %v5417_v9, %v5417_v9 }
 0x10e   :  { %v456_v49 = vadd.f32 %v455_v47, %v425_v39  ;;  %v5486_v50 = vpop.f32.mrb[8].mxu0  ;;  %v5488_v51 = vpop.f32.mrb[8].mxu1  ;;  %v387_v52 = vadd.f32 %v5464_v35, %v386_v46 }
 0x10f   :  { %7268 = vst [vmem:[#allocation12_spill] sm:$0xff] %v5486_v50  ;;  %v5491_v53 = vpop.f32.mrb[9].mxu0  ;;  %v5493_v54 = vpop.f32.mrb[9].mxu1  ;;  %v429_v62 = vmul.f32 %v5486_v50, %v5486_v50 }
 0x110   :  { %7269 = vst [vmem:[#allocation13_spill] sm:$0xff] %v5491_v53  ;;  %v388_v55 = vadd.f32 %v387_v52, %v5491_v53  ;;  %v427_v56 = vmul.f32 %v5491_v53, %v5491_v53  ;;  %v457_v57 = vadd.f32 %v456_v49, %v426_v45  ;;  %v5500_v58 = vpop.f32.mrb[10].mxu0  ;;  %v5502_v59 = vpop.f32.mrb[10].mxu1  ;;  %v1790_v45 = vld [vmem:[%s7226_s2 + $0x58] sm:$0xff]  ;;  %v438_v52 = vmul.f32 %v5429_v14, %v5429_v14 }
 0x111   :  { %7270 = vst [vmem:[#allocation14_spill] sm:$0xff] %v5500_v58  ;;  %v5504_v60 = vpop.f32.mrb[11].mxu0  ;;  %v5506_v61 = vpop.f32.mrb[11].mxu1  ;;  %v430_v5 = vmul.f32 %v5500_v58, %v5500_v58  ;;  %v4861_v49 = vpack.c.bf16 %v1790_v45, %v1789_v44 }
 0x112   :  { %7271 = vst [vmem:[#allocation15_spill] sm:$0xff] %v5504_v60  ;;  %v458_v63 = vadd.f32 %v457_v57, %v427_v56  ;;  %v389_v0 = vadd.f32 %v388_v55, %v5504_v60  ;;  %v428_v2 = vmul.f32 %v5504_v60, %v5504_v60  ;;  %v436_v55 = vmul.f32 %v5433_v16, %v5433_v16 }
 0x113   :  { %v5568_v56 = vmul.f32 %v5452_v28, %v5452_v28  ;;  %v5572_v57 = vmul.f32 %v5457_v31, %v5457_v31  ;;  %4862 = vmatpush3.bf16.msra.mxu0 %v4861_v49  ;;  %4886 = vmatpush3.bf16.msra.mxu1 %v4861_v49 }
 0x114   :  { %v390_v6 = vadd.f32 %v5486_v50, %v389_v0  ;;  %v459_v7 = vadd.f32 %v458_v63, %v428_v2  ;;  %4863 = vmatprep.subr.bf16.mxu0 %v7232_v1  ;;  %4887 = vmatprep.subr.bf16.mxu1 %v7232_v1 }
 0x116   :  { %v460_v17 = vadd.f32 %v459_v7, %v429_v62  ;;  %v5522_v18 = vpop.f32.mrb[12].mxu0  ;;  %v5524_v19 = vpop.f32.mrb[12].mxu1  ;;  %v391_v20 = vadd.f32 %v5500_v58, %v390_v6  ;;  %v5576_v62 = vmul.f32 %v5466_v36, %v5466_v36  ;;  %v5589_v6 = vmul.f32 %v5493_v54, %v5493_v54 }
 0x117   :  { %7272 = vst [vmem:[#allocation16_spill] sm:$0xff] %v5522_v18  ;;  %v5527_v21 = vpop.f32.mrb[13].mxu0  ;;  %v5529_v22 = vpop.f32.mrb[13].mxu1  ;;  %v433_v34 = vmul.f32 %v5522_v18, %v5522_v18 }
 0x118   :  { %7273 = vst [vmem:[#allocation17_spill] sm:$0xff] %v5527_v21  ;;  %v392_v23 = vadd.f32 %v391_v20, %v5527_v21  ;;  %v431_v24 = vmul.f32 %v5527_v21, %v5527_v21  ;;  %v461_v25 = vadd.f32 %v460_v17, %v430_v5  ;;  %v5536_v26 = vpop.f32.mrb[14].mxu0  ;;  %v5538_v29 = vpop.f32.mrb[14].mxu1  ;;  %v5585_v5 = vmul.f32 %v5488_v51, %v5488_v51 }
 0x119   :  { %7274 = vst [vmem:[#allocation18_spill] sm:$0xff] %v5536_v26  ;;  %v5540_v32 = vpop.f32.mrb[15].mxu0  ;;  %v5542_v33 = vpop.f32.mrb[15].mxu1  ;;  %v434_v46 = vmul.f32 %v5536_v26, %v5536_v26  ;;  %v5595_v17 = vmul.f32 %v5502_v59, %v5502_v59  ;;  %v5599_v20 = vmul.f32 %v5506_v61, %v5506_v61  ;;  %v5614_v50 = vmul.f32 %v5538_v29, %v5538_v29 }
 0x11a   :  { %7275 = vst [vmem:[#allocation19_spill] sm:$0xff] %v5540_v32  ;;  %v462_v39 = vadd.f32 %v461_v25, %v431_v24  ;;  %v393_v40 = vadd.f32 %v392_v23, %v5540_v32  ;;  %v432_v41 = vmul.f32 %v5540_v32, %v5540_v32  ;;  %v5618_v60 = vmul.f32 %v5542_v33, %v5542_v33 }
 0x11c   :  { %v394_v47 = vadd.f32 %v5522_v18, %v393_v40  ;;  %v463_v48 = vadd.f32 %v462_v39, %v432_v41  ;;  %v5604_v39 = vmul.f32 %v5524_v19, %v5524_v19  ;;  %v5608_v40 = vmul.f32 %v5529_v22, %v5529_v22 }
 0x11e   :  { %v395_v63 = vadd.f32 %v5536_v26, %v394_v47  ;;  %v464_v0 = vadd.f32 %v463_v48, %v433_v34  ;;  %v4561_v2 = vpop.f32.mrb[16].mxu1  ;;  %v4595_v3 = vpop.f32.mrb[16].mxu0 }
 0x11f   :  { %v684_v7 = vpop.f32.mrb[17].mxu1  ;;  %v1114_v12 = vpop.f32.mrb[17].mxu0 }
 0x120   :  { %v396_v23 = vadd.f32 %v395_v63, %v5421_v11  ;;  %v465_v24 = vadd.f32 %v464_v0, %v434_v46  ;;  %v4562_v25 = vpop.f32.mrb[18].mxu1  ;;  %v4596_v34 = vpop.f32.mrb[18].mxu0  ;;  %v849_v41 = vmul.f32 %v684_v7, %v684_v7  ;;  %v1279_v45 = vmul.f32 %v1114_v12, %v1114_v12 }
 0x121   :  { %v687_v44 = vpop.f32.mrb[19].mxu1  ;;  %v1117_v47 = vpop.f32.mrb[19].mxu0  ;;  %v851_v46 = vmul.f32 %v4561_v2, %v4561_v2  ;;  %v1281_v0 = vmul.f32 %v4595_v3, %v4595_v3 }
 0x122   :  { %v397_v48 = vadd.f32 %v396_v23, %v5433_v16  ;;  %v466_v49 = vadd.f32 %v465_v24, %v435_v43  ;;  %v811_v1 = vadd.f32 %v687_v44, %v684_v7  ;;  %v850_v63 = vmul.f32 %v687_v44, %v687_v44 }
 0x123   :  { %v1241_v11 = vadd.f32 %v1117_v47, %v1114_v12  ;;  %v1280_v26 = vmul.f32 %v1117_v47, %v1117_v47 }
 0x124   :  { %v398_v18 = vadd.f32 %v5417_v9, %v397_v48  ;;  %v467_v32 = vadd.f32 %v466_v49, %v436_v55  ;;  %v812_v21 = vadd.f32 %v4561_v2, %v811_v1  ;;  %v881_v58 = vadd.f32 %v850_v63, %v849_v41 }
 0x125   :  { %v1242_v43 = vadd.f32 %v4595_v3, %v1241_v11  ;;  %v1311_v7 = vadd.f32 %v1280_v26, %v1279_v45  ;;  %v852_v55 = vmul.f32 %v4562_v25, %v4562_v25  ;;  %v1282_v1 = vmul.f32 %v4596_v34, %v4596_v34 }
 0x126   :  { %v399_v23 = vadd.f32 %v5429_v14, %v398_v18  ;;  %v468_v24 = vadd.f32 %v467_v32, %v437_v42  ;;  %v882_v12 = vadd.f32 %v881_v58, %v851_v46  ;;  %v4565_v44 = vpop.f32.mrb[20].mxu1  ;;  %v813_v47 = vadd.f32 %v4562_v25, %v812_v21  ;;  %v4599_v48 = vpop.f32.mrb[20].mxu0 }
 0x127   :  { %v1312_v2 = vadd.f32 %v1311_v7, %v1281_v0  ;;  %v700_v41 = vpop.f32.mrb[21].mxu1  ;;  %v1130_v49 = vpop.f32.mrb[21].mxu0  ;;  %v1243_v63 = vadd.f32 %v4596_v34, %v1242_v43  ;;  %v855_v3 = vmul.f32 %v4565_v44, %v4565_v44  ;;  %v1792_v34 = vld [vmem:[%s7226_s2 + $0x68] sm:$0xff]  ;;  %v1285_v7 = vmul.f32 %v4599_v48, %v4599_v48 }
 0x128   :  { %v400_v9 = vadd.f32 %v399_v23, %v5457_v31  ;;  %v469_v16 = vadd.f32 %v468_v24, %v438_v52  ;;  %v814_v53 = vadd.f32 %v813_v47, %v700_v41  ;;  %v853_v35 = vmul.f32 %v700_v41, %v700_v41  ;;  %v4566_v11 = vpop.f32.mrb[22].mxu1  ;;  %v4600_v26 = vpop.f32.mrb[22].mxu0  ;;  %v1791_v52 = vld [vmem:[%s7226_s2 + $0x60] sm:$0xff]  ;;  %v1794_v47 = vld [vmem:[%s7226_s2 + $0x78] sm:$0xff] }
 0x129   :  { %v883_v18 = vadd.f32 %v882_v12, %v852_v55  ;;  %v703_v32 = vpop.f32.mrb[23].mxu1  ;;  %v1244_v58 = vadd.f32 %v1243_v63, %v1130_v49  ;;  %v1283_v42 = vmul.f32 %v1130_v49, %v1130_v49  ;;  %v1133_v21 = vpop.f32.mrb[23].mxu0  ;;  %v1313_v23 = vadd.f32 %v1312_v2, %v1282_v1 }
 0x12a   :  { %v470_v25 = vadd.f32 %v469_v16, %v5572_v57  ;;  %v401_v45 = vadd.f32 %v400_v9, %v5470_v38  ;;  %v815_v46 = vadd.f32 %v814_v53, %v703_v32  ;;  %v854_v0 = vmul.f32 %v703_v32, %v703_v32  ;;  %v1793_v53 = vld [vmem:[%s7226_s2 + $0x70] sm:$0xff] }
 0x12b   :  { %v884_v43 = vadd.f32 %v883_v18, %v853_v35  ;;  %v1245_v24 = vadd.f32 %v1244_v58, %v1133_v21  ;;  %v1284_v9 = vmul.f32 %v1133_v21, %v1133_v21  ;;  %v1314_v41 = vadd.f32 %v1313_v23, %v1283_v42 }
 0x12c   :  { %v402_v12 = vadd.f32 %v5452_v28, %v401_v45  ;;  %v471_v16 = vadd.f32 %v470_v25, %v5581_v4  ;;  %v816_v57 = vadd.f32 %v4565_v44, %v815_v46  ;;  %v4864_v49 = vpack.c.bf16 %v1792_v34, %v1791_v52 }
 0x12d   :  { %v885_v55 = vadd.f32 %v884_v43, %v854_v0  ;;  %v1246_v35 = vadd.f32 %v4599_v48, %v1245_v24  ;;  %v856_v63 = vmul.f32 %v4566_v11, %v4566_v11  ;;  %v1286_v58 = vmul.f32 %v4600_v26, %v4600_v26 }
 0x12e   :  { %v403_v1 = vadd.f32 %v5466_v36, %v402_v12  ;;  %v472_v2 = vadd.f32 %v471_v16, %v5568_v56  ;;  %v4569_v4 = vpop.f32.mrb[24].mxu1  ;;  %v817_v44 = vadd.f32 %v4566_v11, %v816_v57  ;;  %v4603_v18 = vpop.f32.mrb[24].mxu0  ;;  %v1315_v21 = vadd.f32 %v1314_v41, %v1284_v9  ;;  %4865 = vmatpush3.bf16.msra.mxu0 %v4864_v49 }
 0x12f   :  { %v886_v32 = vadd.f32 %v885_v55, %v855_v3  ;;  %v716_v25 = vpop.f32.mrb[25].mxu1  ;;  %v1146_v45 = vpop.f32.mrb[25].mxu0  ;;  %v4867_v46 = vpack.c.bf16 %v1794_v47, %v1793_v53  ;;  %4889 = vmatpush3.bf16.msra.mxu1 %v4864_v49  ;;  %v859_v23 = vmul.f32 %v4569_v4, %v4569_v4  ;;  %v1247_v3 = vadd.f32 %v4600_v26, %v1246_v35 }
 0x130   :  { %v404_v0 = vadd.f32 %v403_v1, %v5493_v54  ;;  %v473_v48 = vadd.f32 %v472_v2, %v5576_v62  ;;  %v818_v42 = vadd.f32 %v817_v44, %v716_v25  ;;  %v857_v52 = vmul.f32 %v716_v25, %v716_v25  ;;  %v4570_v34 = vpop.f32.mrb[26].mxu1  ;;  %v4604_v43 = vpop.f32.mrb[26].mxu0 }
 0x131   :  { %v1316_v56 = vadd.f32 %v1315_v21, %v1285_v7  ;;  %v887_v11 = vadd.f32 %v886_v32, %v856_v63  ;;  %v719_v24 = vpop.f32.mrb[27].mxu1  ;;  %v1149_v12 = vpop.f32.mrb[27].mxu0  ;;  %v7276_v16 = vmov 0.0|0.0   ;;  %v1248_v55 = vadd.f32 %v1247_v3, %v1146_v45 }
 0x132   :  { %4866 = vmatprep.subr.bf16.mxu0 %v7276_v16  ;;  %v405_v57 = vadd.f32 %v404_v0, %v5506_v61  ;;  %v474_v9 = vadd.f32 %v473_v48, %v5589_v6  ;;  %v819_v53 = vadd.f32 %v818_v42, %v719_v24  ;;  %v858_v47 = vmul.f32 %v719_v24, %v719_v24 }
 0x133   :  { %4890 = vmatprep.subr.bf16.mxu1 %v7276_v16  ;;  %v888_v62 = vadd.f32 %v887_v11, %v857_v52  ;;  %v1287_v41 = vmul.f32 %v1146_v45, %v1146_v45  ;;  %v1317_v49 = vadd.f32 %v1316_v56, %v1286_v58  ;;  %4868 = vmatpush3.bf16.msra.mxu0 %v4867_v46 }
 0x134   :  { %v406_v7 = vadd.f32 %v5488_v51, %v405_v57  ;;  %v475_v26 = vadd.f32 %v474_v9, %v5599_v20  ;;  %v1289_v35 = vmul.f32 %v4603_v18, %v4603_v18  ;;  %v820_v1 = vadd.f32 %v4569_v4, %v819_v53  ;;  %4892 = vmatpush3.bf16.msra.mxu1 %v4867_v46 }
 0x135   :  { %v889_v2 = vadd.f32 %v888_v62, %v858_v47  ;;  %v1318_v63 = vadd.f32 %v1317_v49, %v1287_v41  ;;  %v1249_v44 = vadd.f32 %v1248_v55, %v1149_v12  ;;  %v1288_v6 = vmul.f32 %v1149_v12, %v1149_v12  ;;  %4893 = vmatprep.subr.bf16.mxu0 %v7276_v16 }
 0x136   :  { %v407_v32 = vadd.f32 %v5502_v59, %v406_v7  ;;  %v476_v21 = vadd.f32 %v475_v26, %v5585_v5  ;;  %v860_v25 = vmul.f32 %v4570_v34, %v4570_v34  ;;  %v4573_v58 = vpop.f32.mrb[28].mxu1  ;;  %v821_v45 = vadd.f32 %v4570_v34, %v820_v1  ;;  %v4607_v0 = vpop.f32.mrb[28].mxu0  ;;  %4896 = vmatprep.subr.bf16.mxu1 %v7276_v16 }
 0x137   :  { %v890_v20 = vadd.f32 %v889_v2, %v859_v23  ;;  %v1290_v48 = vmul.f32 %v4604_v43, %v4604_v43  ;;  %v1250_v4 = vadd.f32 %v4603_v18, %v1249_v44  ;;  %v1319_v46 = vadd.f32 %v1318_v63, %v1288_v6  ;;  %v732_v42 = vpop.f32.mrb[29].mxu1  ;;  %v1162_v52 = vpop.f32.mrb[29].mxu0 }
 0x138   :  { %v408_v56 = vadd.f32 %v407_v32, %v5529_v22  ;;  %v477_v11 = vadd.f32 %v476_v21, %v5595_v17  ;;  %v822_v24 = vadd.f32 %v821_v45, %v732_v42  ;;  %v861_v3 = vmul.f32 %v732_v42, %v732_v42  ;;  %v4574_v12 = vpop.f32.mrb[30].mxu1  ;;  %v4608_v5 = vpop.f32.mrb[30].mxu0 }
 0x139   :  { %v1320_v57 = vadd.f32 %v1319_v46, %v1289_v35  ;;  %v863_v9 = vmul.f32 %v4573_v58, %v4573_v58  ;;  %v891_v34 = vadd.f32 %v890_v20, %v860_v25  ;;  %v735_v53 = vpop.f32.mrb[31].mxu1  ;;  %v1165_v47 = vpop.f32.mrb[31].mxu0  ;;  %v1251_v41 = vadd.f32 %v4604_v43, %v1250_v4 }
 0x13a   :  { %v409_v23 = vadd.f32 %v408_v56, %v5542_v33  ;;  %v478_v18 = vadd.f32 %v477_v11, %v5608_v40  ;;  %v823_v16 = vadd.f32 %v822_v24, %v735_v53  ;;  %v862_v62 = vmul.f32 %v735_v53, %v735_v53 }
 0x13b   :  { %v892_v55 = vadd.f32 %v891_v34, %v861_v3  ;;  %v1291_v49 = vmul.f32 %v1162_v52, %v1162_v52  ;;  %v1321_v7 = vadd.f32 %v1320_v57, %v1290_v48  ;;  %v1293_v1 = vmul.f32 %v4607_v0, %v4607_v0 }
 0x13c   :  { %v410_v17 = vadd.f32 %v5524_v19, %v409_v23  ;;  %v479_v26 = vadd.f32 %v478_v18, %v5618_v60  ;;  %v824_v35 = vadd.f32 %v4573_v58, %v823_v16  ;;  %v1252_v63 = vadd.f32 %v1251_v41, %v1162_v52 }
 0x13d   :  { %v893_v2 = vadd.f32 %v892_v55, %v862_v62  ;;  %v1322_v44 = vadd.f32 %v1321_v7, %v1291_v49  ;;  %v1292_v6 = vmul.f32 %v1165_v47, %v1165_v47  ;;  %v864_v45 = vmul.f32 %v4574_v12, %v4574_v12 }
 0x13e   :  { %v5659_v32 = vadd.f32 %v5538_v29, %v410_v17  ;;  %v480_v40 = vadd.f32 %v479_v26, %v5604_v39  ;;  %v4577_v21 = vpop.f32.mrb[32].mxu1  ;;  %v825_v25 = vadd.f32 %v4574_v12, %v824_v35  ;;  %v4611_v43 = vpop.f32.mrb[32].mxu0  ;;  %v1253_v48 = vadd.f32 %v1252_v63, %v1165_v47 }
 0x13f   :  { %v894_v20 = vadd.f32 %v893_v2, %v863_v9  ;;  %v1323_v4 = vadd.f32 %v1322_v44, %v1292_v6  ;;  %v748_v46 = vpop.f32.mrb[33].mxu1  ;;  %v1178_v60 = vpop.f32.mrb[33].mxu0  ;;  %v5075_v58 = vmov 0.0   ;;  %v1294_v52 = vmul.f32 %v4608_v5, %v4608_v5 }
 0x140   :  { %4691 = vmatprep.mubr.msk.f32.mxu0 %vm5074_vm1, %v5075_v58  ;;  %v5665_v42 = vadd.f32 %v480_v40, %v5614_v50  ;;  %v826_v56 = vadd.f32 %v825_v25, %v748_v46  ;;  %v865_v39 = vmul.f32 %v748_v46, %v748_v46  ;;  %v4578_v11 = vpop.f32.mrb[34].mxu1  ;;  %v4612_v24 = vpop.f32.mrb[34].mxu0  ;;  %4726 = vmatprep.mubr.msk.f32.mxu1 %vm5074_vm1, %v5075_v58 }
 0x141   :  { %v1254_v3 = vadd.f32 %v4607_v0, %v1253_v48  ;;  %v1324_v12 = vadd.f32 %v1323_v4, %v1293_v1  ;;  %v895_v57 = vadd.f32 %v894_v20, %v864_v45  ;;  %v751_v9 = vpop.f32.mrb[35].mxu1  ;;  %v1181_v34 = vpop.f32.mrb[35].mxu0  ;;  %v1295_v16 = vmul.f32 %v1178_v60, %v1178_v60 }
 0x142   :  { %v827_v53 = vadd.f32 %v826_v56, %v751_v9  ;;  %v866_v23 = vmul.f32 %v751_v9, %v751_v9  ;;  %v867_v55 = vmul.f32 %v4577_v21, %v4577_v21  ;;  %v1296_v7 = vmul.f32 %v1181_v34, %v1181_v34 }
 0x143   :  { %v896_v47 = vadd.f32 %v895_v57, %v865_v39  ;;  %v1255_v18 = vadd.f32 %v4608_v5, %v1254_v3  ;;  %v1325_v62 = vadd.f32 %v1324_v12, %v1294_v52  ;;  %v1297_v17 = vmul.f32 %v4611_v43, %v4611_v43 }
 0x144   :  { %v828_v50 = vadd.f32 %v4577_v21, %v827_v53  ;;  %v868_v1 = vmul.f32 %v4578_v11, %v4578_v11  ;;  %v1298_v25 = vmul.f32 %v4612_v24, %v4612_v24 }
 0x145   :  { %v897_v41 = vadd.f32 %v896_v47, %v866_v23  ;;  %v1256_v49 = vadd.f32 %v1255_v18, %v1178_v60  ;;  %v1326_v26 = vadd.f32 %v1325_v62, %v1295_v16 }
 0x146   :  { %v4581_v35 = vpop.f32.mrb[36].mxu1  ;;  %v829_v2 = vadd.f32 %v4578_v11, %v828_v50  ;;  %v4615_v0 = vpop.f32.mrb[36].mxu0 }
 0x147   :  { %v898_v63 = vadd.f32 %v897_v41, %v867_v55  ;;  %v1257_v44 = vadd.f32 %v1256_v49, %v1181_v34  ;;  %v764_v6 = vpop.f32.mrb[37].mxu1  ;;  %v1194_v40 = vpop.f32.mrb[37].mxu0  ;;  %v1327_v45 = vadd.f32 %v1326_v26, %v1296_v7  ;;  %v871_v53 = vmul.f32 %v4581_v35, %v4581_v35 }
 0x148   :  { %v830_v5 = vadd.f32 %v829_v2, %v764_v6  ;;  %v4582_v20 = vpop.f32.mrb[38].mxu1  ;;  %v4616_v48 = vpop.f32.mrb[38].mxu0  ;;  %v869_v21 = vmul.f32 %v764_v6, %v764_v6  ;;  %v1299_v11 = vmul.f32 %v1194_v40, %v1194_v40  ;;  %v1301_v16 = vmul.f32 %v4615_v0, %v4615_v0 }
 0x149   :  { %v1258_v4 = vadd.f32 %v4611_v43, %v1257_v44  ;;  %v899_v46 = vadd.f32 %v898_v63, %v868_v1  ;;  %v767_v60 = vpop.f32.mrb[39].mxu1  ;;  %v1197_v52 = vpop.f32.mrb[39].mxu0  ;;  %v1328_v56 = vadd.f32 %v1327_v45, %v1297_v17  ;;  %v872_v41 = vmul.f32 %v4582_v20, %v4582_v20 }
 0x14a   :  { %v831_v39 = vadd.f32 %v830_v5, %v767_v60  ;;  %v870_v12 = vmul.f32 %v767_v60, %v767_v60  ;;  %v1300_v18 = vmul.f32 %v1197_v52, %v1197_v52  ;;  %v1302_v2 = vmul.f32 %v4616_v48, %v4616_v48 }
 0x14b   :  { %v900_v3 = vadd.f32 %v899_v46, %v869_v21  ;;  %v1259_v57 = vadd.f32 %v4612_v24, %v1258_v4  ;;  %v1329_v34 = vadd.f32 %v1328_v56, %v1298_v25 }
 0x14c   :  { %v832_v9 = vadd.f32 %v4581_v35, %v831_v39 }
 0x14d   :  { %v901_v47 = vadd.f32 %v900_v3, %v870_v12  ;;  %v1260_v23 = vadd.f32 %v1259_v57, %v1194_v40  ;;  %v1330_v50 = vadd.f32 %v1329_v34, %v1299_v11  ;;  %v412_v3 = vrot.slane %v5659_v32, 4 }
 0x14e   :  { %v4585_v62 = vpop.f32.mrb[40].mxu1  ;;  %v833_v43 = vadd.f32 %v4582_v20, %v832_v9  ;;  %v4619_v55 = vpop.f32.mrb[40].mxu0 }
 0x14f   :  { %v902_v49 = vadd.f32 %v901_v47, %v871_v53  ;;  %v1261_v7 = vadd.f32 %v1260_v23, %v1197_v52  ;;  %v780_v17 = vpop.f32.mrb[41].mxu1  ;;  %v1210_v26 = vpop.f32.mrb[41].mxu0  ;;  %v1331_v1 = vadd.f32 %v1330_v50, %v1300_v18  ;;  %v875_v12 = vmul.f32 %v4585_v62, %v4585_v62 }
 0x150   :  { %v834_v24 = vadd.f32 %v833_v43, %v780_v17  ;;  %v873_v63 = vmul.f32 %v780_v17, %v780_v17  ;;  %v4586_v44 = vpop.f32.mrb[42].mxu1  ;;  %v4620_v6 = vpop.f32.mrb[42].mxu0  ;;  %v1303_v46 = vmul.f32 %v1210_v26, %v1210_v26  ;;  %v1305_v9 = vmul.f32 %v4619_v55, %v4619_v55 }
 0x151   :  { %v1262_v35 = vadd.f32 %v4615_v0, %v1261_v7  ;;  %v903_v25 = vadd.f32 %v902_v49, %v872_v41  ;;  %v783_v40 = vpop.f32.mrb[43].mxu1  ;;  %v1213_v45 = vpop.f32.mrb[43].mxu0  ;;  %v1332_v5 = vadd.f32 %v1331_v1, %v1301_v16  ;;  %v482_v23 = vrot.slane %v5665_v42, 4 }
 0x152   :  { %v835_v4 = vadd.f32 %v834_v24, %v783_v40  ;;  %v874_v21 = vmul.f32 %v783_v40, %v783_v40  ;;  %v1304_v39 = vmul.f32 %v1213_v45, %v1213_v45  ;;  %v876_v18 = vmul.f32 %v4586_v44, %v4586_v44 }
 0x153   :  { %v904_v60 = vadd.f32 %v903_v25, %v873_v63  ;;  %v1263_v20 = vadd.f32 %v4616_v48, %v1262_v35  ;;  %v1333_v52 = vadd.f32 %v1332_v5, %v1302_v2  ;;  %v1306_v41 = vmul.f32 %v4620_v6, %v4620_v6 }
 0x154   :  { %v836_v56 = vadd.f32 %v4585_v62, %v835_v4 }
 0x155   :  { %v905_v57 = vadd.f32 %v904_v60, %v874_v21  ;;  %v1264_v11 = vadd.f32 %v1263_v20, %v1210_v26  ;;  %v1334_v34 = vadd.f32 %v1333_v52, %v1303_v46  ;;  %v413_v26 = vadd.f32 %v412_v3, %v5659_v32 }
 0x156   :  { %v4589_v0 = vpop.f32.mrb[44].mxu1  ;;  %v837_v53 = vadd.f32 %v4586_v44, %v836_v56  ;;  %v4623_v47 = vpop.f32.mrb[44].mxu0 }
 0x157   :  { %v906_v16 = vadd.f32 %v905_v57, %v875_v12  ;;  %v1265_v50 = vadd.f32 %v1264_v11, %v1213_v45  ;;  %v796_v43 = vpop.f32.mrb[45].mxu1  ;;  %v1226_v48 = vpop.f32.mrb[45].mxu0  ;;  %v1335_v49 = vadd.f32 %v1334_v34, %v1304_v39  ;;  %v483_v45 = vadd.f32 %v482_v23, %v5665_v42 }
 0x158   :  { %v838_v7 = vadd.f32 %v837_v53, %v796_v43  ;;  %v877_v17 = vmul.f32 %v796_v43, %v796_v43  ;;  %v4590_v2 = vpop.f32.mrb[46].mxu1  ;;  %v4624_v62 = vpop.f32.mrb[46].mxu0  ;;  %v1307_v44 = vmul.f32 %v1226_v48, %v1226_v48  ;;  %v414_v56 = vrot.slane %v413_v26, 2 }
 0x159   :  { %v1266_v1 = vadd.f32 %v4619_v55, %v1265_v50  ;;  %v907_v24 = vadd.f32 %v906_v16, %v876_v18  ;;  %v799_v63 = vpop.f32.mrb[47].mxu1  ;;  %v1229_v35 = vpop.f32.mrb[47].mxu0  ;;  %v1336_v25 = vadd.f32 %v1335_v49, %v1305_v9  ;;  %v879_v52 = vmul.f32 %v4589_v0, %v4589_v0 }
 0x15a   :  { %v839_v40 = vadd.f32 %v838_v7, %v799_v63  ;;  %v878_v5 = vmul.f32 %v799_v63, %v799_v63  ;;  %v1308_v20 = vmul.f32 %v1229_v35, %v1229_v35  ;;  %v1309_v32 = vmul.f32 %v4623_v47, %v4623_v47 }
 0x15b   :  { %v908_v4 = vadd.f32 %v907_v24, %v877_v17  ;;  %v1267_v21 = vadd.f32 %v4620_v6, %v1266_v1  ;;  %v1337_v60 = vadd.f32 %v1336_v25, %v1306_v41  ;;  %v484_v11 = vrot.slane %v483_v45, 2 }
 0x15c   :  { %v840_v46 = vadd.f32 %v4589_v0, %v839_v40  ;;  %v880_v9 = vmul.f32 %v4590_v2, %v4590_v2  ;;  %v1310_v42 = vmul.f32 %v4624_v62, %v4624_v62  ;;  %v415_v50 = vadd.f32 %v414_v56, %v413_v26 }
 0x15d   :  { %v909_v39 = vadd.f32 %v908_v4, %v878_v5  ;;  %v1268_v12 = vadd.f32 %v1267_v21, %v1226_v48  ;;  %v1338_v3 = vadd.f32 %v1337_v60, %v1307_v44  ;;  %v485_v24 = vadd.f32 %v484_v11, %v483_v45 }
 0x15e   :  { %v841_v55 = vadd.f32 %v4590_v2, %v840_v46  ;;  %v4629_v57 = vpop.f32.mrb[48].mxu1  ;;  %v416_v4 = vrot.slane %v415_v50, 1 }
 0x15f   :  { %v910_v34 = vadd.f32 %v909_v39, %v879_v52  ;;  %v1269_v53 = vadd.f32 %v1268_v12, %v1229_v35  ;;  %v1544_v18 = vpop.f32.mrb[49].mxu1  ;;  %v1339_v23 = vadd.f32 %v1338_v3, %v1308_v20  ;;  %v1711_v2 = vmul.f32 %v4629_v57, %v4629_v57 }
 0x160   :  { %v842_v16 = vrot.slane %v841_v55, 4  ;;  %v4630_v6 = vpop.f32.mrb[50].mxu1  ;;  %v1709_v49 = vmul.f32 %v1544_v18, %v1544_v18  ;;  %v486_v52 = vrot.slane %v485_v24, 1 }
 0x161   :  { %v911_v43 = vadd.f32 %v910_v34, %v880_v9  ;;  %v1270_v41 = vadd.f32 %v4623_v47, %v1269_v53  ;;  %v1547_v0 = vpop.f32.mrb[51].mxu1  ;;  %v1340_v48 = vadd.f32 %v1339_v23, %v1309_v32  ;;  %v1712_v32 = vmul.f32 %v4630_v6, %v4630_v6 }
 0x162   :  { %v843_v7 = vadd.f32 %v842_v16, %v841_v55  ;;  %v1671_v17 = vadd.f32 %v1547_v0, %v1544_v18  ;;  %v1710_v1 = vmul.f32 %v1547_v0, %v1547_v0 }
 0x163   :  { %v912_v63 = vrot.slane %v911_v43, 4  ;;  %v1271_v25 = vadd.f32 %v4624_v62, %v1270_v41  ;;  %v1341_v35 = vadd.f32 %v1340_v48, %v1310_v42  ;;  %v487_v48 = vadd.f32 %v486_v52, %v485_v24 }
 0x164   :  { %v844_v40 = vrot.slane %v843_v7, 2  ;;  %v1672_v5 = vadd.f32 %v4629_v57, %v1671_v17  ;;  %v1741_v44 = vadd.f32 %v1710_v1, %v1709_v49  ;;  %v417_v57 = vadd.f32 %v416_v4, %v415_v50 }
 0x165   :  { %v913_v21 = vadd.f32 %v912_v63, %v911_v43  ;;  %v1272_v46 = vrot.slane %v1271_v25, 4  ;;  %v1342_v60 = vrot.slane %v1341_v35, 4 }
 0x166   :  { %v845_v26 = vadd.f32 %v844_v40, %v843_v7  ;;  %v1742_v47 = vadd.f32 %v1741_v44, %v1711_v2  ;;  %v4633_v20 = vpop.f32.mrb[52].mxu1  ;;  %v1673_v56 = vadd.f32 %v4630_v6, %v1672_v5 }
 0x167   :  { %v914_v39 = vrot.slane %v913_v21, 2  ;;  %v1273_v12 = vadd.f32 %v1272_v46, %v1271_v25  ;;  %v1560_v45 = vpop.f32.mrb[53].mxu1  ;;  %v1343_v62 = vadd.f32 %v1342_v60, %v1341_v35  ;;  %v1715_v2 = vmul.f32 %v4633_v20, %v4633_v20 }
 0x168   :  { %v846_v55 = vrot.slane %v845_v26, 1  ;;  %v1674_v3 = vadd.f32 %v1673_v56, %v1560_v45  ;;  %v1713_v11 = vmul.f32 %v1560_v45, %v1560_v45  ;;  %v4634_v9 = vpop.f32.mrb[54].mxu1  ;;  %v1743_v18 = vadd.f32 %v1742_v47, %v1712_v32 }
 0x169   :  { %v915_v34 = vadd.f32 %v914_v39, %v913_v21  ;;  %v1274_v53 = vrot.slane %v1273_v12, 2  ;;  %v1563_v16 = vpop.f32.mrb[55].mxu1  ;;  %v1344_v23 = vrot.slane %v1343_v62, 2  ;;  %v1716_v21 = vmul.f32 %v4634_v9, %v4634_v9 }
 0x16a   :  { %v847_v42 = vadd.f32 %v846_v55, %v845_v26  ;;  %v1675_v43 = vadd.f32 %v1674_v3, %v1563_v16  ;;  %v1714_v41 = vmul.f32 %v1563_v16, %v1563_v16  ;;  %v1744_v7 = vadd.f32 %v1743_v18, %v1713_v11 }
 0x16b   :  { %v916_v49 = vrot.slane %v915_v34, 1  ;;  %v1275_v0 = vadd.f32 %v1274_v53, %v1273_v12  ;;  %v1345_v17 = vadd.f32 %v1344_v23, %v1343_v62 }
 0x16c   :  { %v848_v6 = vadd.f32 %v847_v42, %v417_v57  ;;  %v1676_v1 = vadd.f32 %v4633_v20, %v1675_v43  ;;  %v1745_v40 = vadd.f32 %v1744_v7, %v1714_v41 }
 0x16d   :  { %v917_v63 = vadd.f32 %v916_v49, %v915_v34  ;;  %v1276_v25 = vrot.slane %v1275_v0, 1  ;;  %v1346_v50 = vrot.slane %v1345_v17, 1 }
 0x16e   :  { %v4637_v35 = vpop.f32.mrb[56].mxu1  ;;  %v1677_v5 = vadd.f32 %v4634_v9, %v1676_v1  ;;  %v1746_v46 = vadd.f32 %v1745_v40, %v1715_v2 }
 0x16f   :  { %v918_v44 = vadd.f32 %v917_v63, %v487_v48  ;;  %v1277_v4 = vadd.f32 %v1276_v25, %v1275_v0  ;;  %v1576_v26 = vpop.f32.mrb[57].mxu1  ;;  %v1347_v60 = vadd.f32 %v1346_v50, %v1345_v17  ;;  %v1719_v3 = vmul.f32 %v4637_v35, %v4637_v35 }
 0x170   :  { %v1678_v47 = vadd.f32 %v1677_v5, %v1576_v26  ;;  %v1717_v56 = vmul.f32 %v1576_v26, %v1576_v26  ;;  %v4638_v39 = vpop.f32.mrb[58].mxu1  ;;  %v1747_v52 = vadd.f32 %v1746_v46, %v1716_v21 }
 0x171   :  { %v5673_v24 = vadd.f32 %v1277_v4, %v848_v6  ;;  %v1579_v12 = vpop.f32.mrb[59].mxu1  ;;  %v5675_v20 = vadd.f32 %v1347_v60, %v918_v44  ;;  %v1720_v34 = vmul.f32 %v4638_v39, %v4638_v39 }
 0x172   :  { %v1679_v32 = vadd.f32 %v1678_v47, %v1579_v12  ;;  %v1718_v45 = vmul.f32 %v1579_v12, %v1579_v12  ;;  %v1748_v55 = vadd.f32 %v1747_v52, %v1717_v56 }
 0x174   :  { %v1680_v62 = vadd.f32 %v4637_v35, %v1679_v32  ;;  %v1749_v11 = vadd.f32 %v1748_v55, %v1718_v45 }
 0x176   :  { %v4641_v57 = vpop.f32.mrb[60].mxu1  ;;  %v1681_v9 = vadd.f32 %v4638_v39, %v1680_v62  ;;  %v1750_v53 = vadd.f32 %v1749_v11, %v1719_v3 }
 0x177   :  { %v1592_v18 = vpop.f32.mrb[61].mxu1  ;;  %v1723_v6 = vmul.f32 %v4641_v57, %v4641_v57 }
 0x178   :  { %v1682_v16 = vadd.f32 %v1681_v9, %v1592_v18  ;;  %v1721_v42 = vmul.f32 %v1592_v18, %v1592_v18  ;;  %v4642_v23 = vpop.f32.mrb[62].mxu1  ;;  %v1751_v43 = vadd.f32 %v1750_v53, %v1720_v34 }
 0x179   :  { %v1595_v41 = vpop.f32.mrb[63].mxu1  ;;  %v1724_v25 = vmul.f32 %v4642_v23, %v4642_v23 }
 0x17a   :  { %v1683_v49 = vadd.f32 %v1682_v16, %v1595_v41  ;;  %v1722_v0 = vmul.f32 %v1595_v41, %v1595_v41  ;;  %v1752_v7 = vadd.f32 %v1751_v43, %v1721_v42 }
 0x17c   :  { %v1684_v48 = vadd.f32 %v4641_v57, %v1683_v49  ;;  %v1753_v17 = vadd.f32 %v1752_v7, %v1722_v0 }
 0x17e   :  { %v4645_v1 = vpop.f32.mrb[64].mxu1  ;;  %v1685_v63 = vadd.f32 %v4642_v23, %v1684_v48  ;;  %v1754_v2 = vadd.f32 %v1753_v17, %v1723_v6 }
 0x17f   :  { %v1608_v40 = vpop.f32.mrb[65].mxu1  ;;  %v1727_v47 = vmul.f32 %v4645_v1, %v4645_v1 }
 0x180   :  { %v1686_v50 = vadd.f32 %v1685_v63, %v1608_v40  ;;  %v1725_v35 = vmul.f32 %v1608_v40, %v1608_v40  ;;  %v4646_v5 = vpop.f32.mrb[66].mxu1  ;;  %v1755_v44 = vadd.f32 %v1754_v2, %v1724_v25 }
 0x181   :  { %v1611_v4 = vpop.f32.mrb[67].mxu1  ;;  %v1728_v12 = vmul.f32 %v4646_v5, %v4646_v5 }
 0x182   :  { %v1687_v21 = vadd.f32 %v1686_v50, %v1611_v4  ;;  %v1726_v46 = vmul.f32 %v1611_v4, %v1611_v4  ;;  %v1756_v26 = vadd.f32 %v1755_v44, %v1725_v35 }
 0x184   :  { %v1688_v60 = vadd.f32 %v4645_v1, %v1687_v21  ;;  %v1757_v56 = vadd.f32 %v1756_v26, %v1726_v46 }
 0x186   :  { %v4649_v39 = vpop.f32.mrb[68].mxu1  ;;  %v1689_v52 = vadd.f32 %v4646_v5, %v1688_v60  ;;  %v1758_v32 = vadd.f32 %v1757_v56, %v1727_v47 }
 0x187   :  { %v1624_v45 = vpop.f32.mrb[69].mxu1  ;;  %v1731_v16 = vmul.f32 %v4649_v39, %v4649_v39 }
 0x188   :  { %v1690_v55 = vadd.f32 %v1689_v52, %v1624_v45  ;;  %v1729_v62 = vmul.f32 %v1624_v45, %v1624_v45  ;;  %v4650_v3 = vpop.f32.mrb[70].mxu1  ;;  %v1759_v11 = vadd.f32 %v1758_v32, %v1728_v12 }
 0x189   :  { %v1627_v57 = vpop.f32.mrb[71].mxu1  ;;  %v1732_v41 = vmul.f32 %v4650_v3, %v4650_v3 }
 0x18a   :  { %v1691_v9 = vadd.f32 %v1690_v55, %v1627_v57  ;;  %v1730_v34 = vmul.f32 %v1627_v57, %v1627_v57  ;;  %v1760_v53 = vadd.f32 %v1759_v11, %v1729_v62 }
 0x18c   :  { %v1692_v18 = vadd.f32 %v4649_v39, %v1691_v9  ;;  %v1761_v42 = vadd.f32 %v1760_v53, %v1730_v34 }
 0x18e   :  { %v4653_v23 = vpop.f32.mrb[72].mxu1  ;;  %v1693_v43 = vadd.f32 %v4650_v3, %v1692_v18  ;;  %v1762_v49 = vadd.f32 %v1761_v42, %v1731_v16 }
 0x18f   :  { %v1640_v0 = vpop.f32.mrb[73].mxu1  ;;  %v1735_v50 = vmul.f32 %v4653_v23, %v4653_v23 }
 0x190   :  { %v1694_v7 = vadd.f32 %v1693_v43, %v1640_v0  ;;  %v1733_v48 = vmul.f32 %v1640_v0, %v1640_v0  ;;  %v4654_v6 = vpop.f32.mrb[74].mxu1  ;;  %v1763_v17 = vadd.f32 %v1762_v49, %v1732_v41 }
 0x191   :  { %v1643_v1 = vpop.f32.mrb[75].mxu1  ;;  %v1736_v4 = vmul.f32 %v4654_v6, %v4654_v6 }
 0x192   :  { %v1695_v63 = vadd.f32 %v1694_v7, %v1643_v1  ;;  %v1734_v25 = vmul.f32 %v1643_v1, %v1643_v1  ;;  %v1764_v2 = vadd.f32 %v1763_v17, %v1733_v48  ;;  %v1945_v1 = vld [vmem:[%s7227_s3] sm:$0xff] }
 0x194   :  { %v1696_v40 = vadd.f32 %v4653_v23, %v1695_v63  ;;  %v1765_v35 = vadd.f32 %v1764_v2, %v1734_v25  ;;  %v1946_v63 = vld [vmem:[%s7227_s3 + $0x8] sm:$0xff] }
 0x196   :  { %v4657_v5 = vpop.f32.mrb[76].mxu1  ;;  %v1697_v44 = vadd.f32 %v4654_v6, %v1696_v40  ;;  %v1766_v21 = vadd.f32 %v1765_v35, %v1735_v50 }
 0x197   :  { %v1656_v46 = vpop.f32.mrb[77].mxu1  ;;  %v1739_v55 = vmul.f32 %v4657_v5, %v4657_v5 }
 0x198   :  { %v1698_v26 = vadd.f32 %v1697_v44, %v1656_v46  ;;  %v1737_v60 = vmul.f32 %v1656_v46, %v1656_v46  ;;  %v4658_v47 = vpop.f32.mrb[78].mxu1  ;;  %v1767_v56 = vadd.f32 %v1766_v21, %v1736_v4  ;;  %v1938_v4 = vld [vmem:[#allocation2] sm:$0x1] }
 0x199   :  { %v1659_v39 = vpop.f32.mrb[79].mxu1  ;;  %v1740_v11 = vmul.f32 %v4658_v47, %v4658_v47  ;;  %v4971_v46 = vld [vmem:[%s7224_s0 + $0x80] sm:$0xff]  }
 0x19a   :  { %v1699_v52 = vadd.f32 %v1698_v26, %v1659_v39  ;;  %v1738_v12 = vmul.f32 %v1659_v39, %v1659_v39  ;;  %v1768_v32 = vadd.f32 %v1767_v56, %v1737_v60  ;;  %v1942_v60 = vld [vmem:[#allocation4] sm:$0x1]  ;;  %v4972_v56 = vld [vmem:[%s7224_s0 + $0x88] sm:$0xff]  }
 0x19c   :  { %v1700_v45 = vadd.f32 %v4657_v5, %v1699_v52  ;;  %v1769_v62 = vadd.f32 %v1768_v32, %v1738_v12  ;;  %v4973_v52 = vld [vmem:[%s7224_s0 + $0x100] sm:$0xff]   ;;  %v4975_v12 = vld [vmem:[%s7224_s0 + $0x90] sm:$0xff]   ;;  %v4974_v32 = vld [vmem:[%s7224_s0 + $0x108] sm:$0xff]  }
 0x19e   :  { %v1701_v3 = vadd.f32 %v4658_v47, %v1700_v45  ;;  %v1770_v57 = vadd.f32 %v1769_v62, %v1739_v55  ;;  %v4977_v45 = vld [vmem:[%s7224_s0 + $0x110] sm:$0xff]   ;;  %v4976_v55 = vld [vmem:[%s7224_s0 + $0x98] sm:$0xff]   ;;  %v4979_v62 = vld [vmem:[%s7224_s0 + $0xa0] sm:$0xff]  }
 0x1a0   :  { %v1702_v9 = vrot.slane %v1701_v3, 4  ;;  %v1771_v34 = vadd.f32 %v1770_v57, %v1740_v11  ;;  %v4981_v11 = vld [vmem:[%s7224_s0 + $0x120] sm:$0xff]   ;;  %v4980_v57 = vld [vmem:[%s7224_s0 + $0xa8] sm:$0xff]  }
 0x1a2   :  { %v1703_v53 = vadd.f32 %v1702_v9, %v1701_v3  ;;  %v1772_v18 = vrot.slane %v1771_v34, 4  ;;  %v4978_v3 = vld [vmem:[%s7224_s0 + $0x118] sm:$0xff]   ;;  %v4983_v9 = vld [vmem:[%s7224_s0 + $0xb0] sm:$0xff]  }
 0x1a4   :  { %v1704_v16 = vrot.slane %v1703_v53, 2  ;;  %v1773_v42 = vadd.f32 %v1772_v18, %v1771_v34  ;;  %v4982_v34 = vld [vmem:[%s7224_s0 + $0x128] sm:$0xff]   ;;  %v4984_v18 = vld [vmem:[%s7224_s0 + $0xb8] sm:$0xff]  }
 0x1a6   :  { %v1705_v23 = vadd.f32 %v1704_v16, %v1703_v53  ;;  %v1774_v43 = vrot.slane %v1773_v42, 2  ;;  %v4985_v53 = vld [vmem:[%s7224_s0 + $0x130] sm:$0xff]   ;;  %v4987_v16 = vld [vmem:[%s7224_s0 + $0xc0] sm:$0xff]  }
 0x1a8   :  { %v1706_v41 = vrot.slane %v1705_v23, 1  ;;  %v1775_v49 = vadd.f32 %v1774_v43, %v1773_v42  ;;  %v4986_v42 = vld [vmem:[%s7224_s0 + $0x138] sm:$0xff]   ;;  %v4988_v43 = vld [vmem:[%s7224_s0 + $0xc8] sm:$0xff]  }
 0x1aa   :  { %v1707_v0 = vadd.f32 %v1706_v41, %v1705_v23  ;;  %v1776_v7 = vrot.slane %v1775_v49, 1  ;;  %v4989_v23 = vld [vmem:[%s7224_s0 + $0x140] sm:$0xff]   ;;  %v4991_v41 = vld [vmem:[%s7224_s0 + $0xd0] sm:$0xff]  }
 0x1ac   :  { %v1708_v48 = vadd.f32 %v1707_v0, %v5673_v24  ;;  %v1777_v6 = vadd.f32 %v1776_v7, %v1775_v49  ;;  %v4894_v24 = vpack.c.bf16 %v1946_v63, %v1945_v1  ;;  %v4990_v49 = vld [vmem:[%s7224_s0 + $0x148] sm:$0xff]   ;;  %v4993_v0 = vld [vmem:[%s7224_s0 + $0x150] sm:$0xff]   ;;  %v4992_v7 = vld [vmem:[%s7224_s0 + $0xd8] sm:$0xff]  }
 0x1ad   :  { %v4996_v1 = vld [vmem:[%s7224_s0 + $0xe8] sm:$0xff]   ;;  %v4999_v63 = vld [vmem:[%s7224_s0 + $0xf0] sm:$0xff]  }
 0x1ae   :  { %4692 = vmatmul.mubr.f32.vlgmr.msra.gmra.mrb[48].mxu0 %v1708_v48  ;;  %v1778_v17 = vadd.f32 %v1777_v6, %v5675_v20  ;;  %v5021_v20 = vld [vmem:[%s7225_s1] sm:$0xff]   ;;  %v4994_v6 = vld [vmem:[%s7224_s0 + $0x158] sm:$0xff]  }
 0x1af   :  { %4733 = vmatprep.mubr.msk.f32.mxu0 %vm5074_vm1, %v5075_v58  ;;  %4895 = vmatpush3.bf16.msra.mxu0 %v4894_v24  ;;  %v4995_v48 = vld [vmem:[%s7224_s0 + $0xe0] sm:$0xff]  }
 0x1b0   :  { %4727 = vmatmul.mubr.f32.vlgmr.msra.gmra.mrb[80].mxu1 %v1778_v17  ;;  %4743 = vmatprep.subr.bf16.mxu0 %v5021_v20  ;;  %v4997_v17 = vld [vmem:[%s7224_s0 + $0x160] sm:$0xff]  }
 0x1b1   :  { %4740 = vmatprep.mubr.msk.f32.mxu1 %vm5074_vm1, %v5075_v58  ;;  %4898 = vmatpush3.bf16.msra.mxu1 %v4894_v24  ;;  %v4998_v24 = vld [vmem:[%s7224_s0 + $0x168] sm:$0xff]  }
 0x1b2   :  { %4777 = vmatprep.subr.bf16.mxu1 %v5021_v20 }
 0x281   :  { %v1861_v25 = vpop.f32.mrb[48].mxu0 }
 0x282   :  { %v1935_v2 = vmul.f32 %v1861_v25, %v1861_v25  ;;  %v4693_v58 = vpop.f32.mrb[49].mxu0 }
 0x283   :  { %v1931_v40 = vpop.f32.mrb[80].mxu1  ;;  %v5002_v58 = vld [vmem:[%s7224_s0 + $0x178] sm:$0xff]  }
 0x284   :  { %v1936_v50 = vsub.f32 %v1931_v40, %v1935_v2  ;;  %v4728_v35 = vpop.f32.mrb[81].mxu1  ;;  %v5003_v2 = vld [vmem:[%s7224_s0 + $0x180] sm:$0xff]   ;;  %v5004_v40 = vld [vmem:[%s7224_s0 + $0x188] sm:$0xff]  }
 0x285   :  { %v5006_v35 = vld [vmem:[%s7224_s0 + $0x198] sm:$0xff]  }
 0x286   :  { %v1937_v5 = vmax.f32 %v1936_v50, 0.0  ;;  %v5005_v50 = vld [vmem:[%s7224_s0 + $0x190] sm:$0xff]  }
 0x288   :  { %v1939_v44 = vadd.f32 1e-05, %v1937_v5  ;;  %v5007_v5 = vld [vmem:[%s7224_s0 + $0x1a0] sm:$0xff]  }
 0x28a   :  { %5019 = vrsqrt.f32 %v1939_v44  ;;  %v5008_v44 = vld [vmem:[%s7224_s0 + $0x1a8] sm:$0xff]  }
 0x294   :  { %v5020_v21 = vpop.eup %5019 }
 0x295   :  { %v1941_v26 = vmul.f32 %v5020_v21, %v1938_v4  ;;  %v5009_v4 = vld [vmem:[%s7224_s0 + $0x1b0] sm:$0xff]   ;;  %v5010_v21 = vld [vmem:[%s7224_s0 + $0x1b8] sm:$0xff]  }
 0x297   :  { %4734 = vmatmul.mubr.msk.f32.vlgmr.msra.gmra.mrb[50].mxu0 %vm171_vm0, %v1941_v26  ;;  %v1943_v47 = vmul.f32 %v1941_v26, %v1861_v25  ;;  %v5000_v25 = vld [vmem:[%s7224_s0 + $0xf8] sm:$0xff]   ;;  %v5012_v26 = vld [vmem:[%s7224_s0 + $0x1c8] sm:$0xff]  }
 0x298   :  { %4744 = vmatpush3.bf16.msra.mxu0 %v5021_v20  ;;  %4745 = vmatprep.mubr.msk.bf16.mxu0 %vm171_vm0, %v4971_v46  ;;  %v5011_v46 = vld [vmem:[%s7224_s0 + $0x1c0] sm:$0xff]  }
 0x299   :  { %v1944_v39 = vsub.f32 %v1942_v60, %v1943_v47  ;;  %4811 = vmatprep.subr.bf16.mxu0 %v5021_v20  ;;  %v5013_v60 = vld [vmem:[%s7224_s0 + $0x1d0] sm:$0xff]   ;;  %v5014_v47 = vld [vmem:[%s7224_s0 + $0x1d8] sm:$0xff]  }
 0x29b   :  { %4741 = vmatmul.mubr.msk.f32.vlgmr.msra.gmra.mrb[82].mxu1 %vm171_vm0, %v1944_v39  ;;  %4746 = vmatmul.mubr.msk.bf16.vlgmr.msra.gmra.mrb[52].mxu0 %vm171_vm0, %v4972_v56  ;;  %v5015_v56 = vld [vmem:[%s7224_s0 + $0x1e0] sm:$0xff]   ;;  %v5016_v39 = vld [vmem:[%s7224_s0 + $0x1e8] sm:$0xff]  }
 0x29c   :  { %4778 = vmatpush3.bf16.msra.mxu1 %v5021_v20  ;;  %4812 = vmatpush3.bf16.msra.mxu0 %v5021_v20  ;;  %v5001_v20 = vld [vmem:[%s7224_s0 + $0x170] sm:$0xff]  }
 0x29d   :  { %4779 = vmatprep.mubr.msk.bf16.mxu1 %vm171_vm0, %v4973_v52  ;;  %4749 = vmatprep.mubr.msk.bf16.mxu0 %vm171_vm0, %v4975_v12  ;;  %v5017_v52 = vld [vmem:[%s7224_s0 + $0x1f0] sm:$0xff]   ;;  %v5018_v12 = vld [vmem:[%s7224_s0 + $0x1f8] sm:$0xff]  }
 0x29f   :  { %4780 = vmatmul.mubr.msk.bf16.vlgmr.msra.gmra.mrb[84].mxu1 %vm171_vm0, %v4974_v32  ;;  %v2094_v32 = vlaneseq }
 0x2a0   :  { %4783 = vmatprep.mubr.msk.bf16.mxu1 %vm171_vm0, %v4977_v45 }
 0x2a1   :  { %v2095_v45 = vshrl.u32 %v2094_v32, 7 }
 0x2a3   :  { %4750 = vmatmul.mubr.msk.bf16.gmra.mrb[56].mxu0 %vm171_vm0, %v4976_v55 }
 0x2a4   :  { %4753 = vmatprep.mubr.msk.bf16.mxu0 %vm171_vm0, %v4979_v62  ;;  %v2096_v62 = vsub.s32 0, %v2095_v45 }
 0x2a7   :  { %4784 = vmatmul.mubr.msk.bf16.gmra.mrb[88].mxu1 %vm171_vm0, %v4978_v3 }
 0x2a8   :  { %4787 = vmatprep.mubr.msk.bf16.mxu1 %vm171_vm0, %v4981_v11 }
 0x2ab   :  { %4754 = vmatmul.mubr.msk.bf16.gmra.mrb[60].mxu0 %vm171_vm0, %v4980_v57 }
 0x2ac   :  { %4757 = vmatprep.mubr.msk.bf16.mxu0 %vm171_vm0, %v4983_v9 }
 0x2af   :  { %4788 = vmatmul.mubr.msk.bf16.gmra.mrb[92].mxu1 %vm171_vm0, %v4982_v34 }
 0x2b0   :  { %4791 = vmatprep.mubr.msk.bf16.mxu1 %vm171_vm0, %v4985_v53 }
 0x2b3   :  { %4758 = vmatmul.mubr.msk.bf16.gmra.mrb[64].mxu0 %vm171_vm0, %v4984_v18 }
 0x2b4   :  { %4761 = vmatprep.mubr.msk.bf16.mxu0 %vm171_vm0, %v4987_v16 }
 0x2b7   :  { %4792 = vmatmul.mubr.msk.bf16.gmra.mrb[96].mxu1 %vm171_vm0, %v4986_v42 }
 0x2b8   :  { %4795 = vmatprep.mubr.msk.bf16.mxu1 %vm171_vm0, %v4989_v23 }
 0x2bb   :  { %4762 = vmatmul.mubr.msk.bf16.gmra.mrb[68].mxu0 %vm171_vm0, %v4988_v43 }
 0x2bc   :  { %4765 = vmatprep.mubr.msk.bf16.mxu0 %vm171_vm0, %v4991_v41 }
 0x2bf   :  { %4796 = vmatmul.mubr.msk.bf16.gmra.mrb[100].mxu1 %vm171_vm0, %v4990_v49 }
 0x2c0   :  { %4799 = vmatprep.mubr.msk.bf16.mxu1 %vm171_vm0, %v4993_v0 }
 0x2c3   :  { %4766 = vmatmul.mubr.msk.bf16.gmra.mrb[72].mxu0 %vm171_vm0, %v4992_v7 }
 0x2c4   :  { %4769 = vmatprep.mubr.msk.bf16.mxu0 %vm171_vm0, %v4995_v48 }
 0x2c7   :  { %4800 = vmatmul.mubr.msk.bf16.gmra.mrb[104].mxu1 %vm171_vm0, %v4994_v6 }
 0x2c8   :  { %4803 = vmatprep.mubr.msk.bf16.mxu1 %vm171_vm0, %v4997_v17  ;;  %v7279_v17 = vld [vmem:[#allocation13_spill] sm:$0xff] }
 0x2cb   :  { %4770 = vmatmul.mubr.msk.bf16.gmra.mrb[76].mxu0 %vm171_vm0, %v4996_v1  ;;  %v7280_v1 = vld [vmem:[#allocation15_spill] sm:$0xff] }
 0x2cc   :  { %4773 = vmatprep.mubr.msk.bf16.mxu0 %vm171_vm0, %v4999_v63  ;;  %v7281_v63 = vld [vmem:[#allocation12_spill] sm:$0xff] }
 0x2cf   :  { %4804 = vmatmul.mubr.msk.bf16.gmra.mrb[108].mxu1 %vm171_vm0, %v4998_v24 }
 0x2d0   :  { %4807 = vmatprep.mubr.msk.bf16.mxu1 %vm171_vm0, %v5001_v20 }
 0x2d3   :  { %4774 = vmatmul.mubr.msk.bf16.gmra.mrb[80].mxu0 %vm171_vm0, %v5000_v25  ;;  %v7283_v25 = vld [vmem:[#allocation17_spill] sm:$0xff] }
 0x2d4   :  { %4813 = vmatprep.mubr.msk.bf16.mxu0 %vm171_vm0, %v5003_v2  ;;  %v7284_v2 = vld [vmem:[#allocation19_spill] sm:$0xff] }
 0x2d7   :  { %4808 = vmatmul.mubr.msk.bf16.gmra.mrb[112].mxu1 %vm171_vm0, %v5002_v58 }
 0x2db   :  { %4814 = vmatmul.mubr.msk.bf16.vlgmr.msra.gmra.mrb[84].mxu0 %vm171_vm0, %v5004_v40  ;;  %v7285_v40 = vld [vmem:[#allocation16_spill] sm:$0xff] }
 0x2dc   :  { %4817 = vmatprep.mubr.msk.bf16.mxu0 %vm171_vm0, %v5005_v50 }
 0x2e3   :  { %4818 = vmatmul.mubr.msk.bf16.gmra.mrb[88].mxu0 %vm171_vm0, %v5006_v35  ;;  %v7286_v35 = vld [vmem:[#allocation18_spill] sm:$0xff] }
 0x2e4   :  { %4821 = vmatprep.mubr.msk.bf16.mxu0 %vm171_vm0, %v5007_v5 }
 0x2eb   :  { %4822 = vmatmul.mubr.msk.bf16.gmra.mrb[92].mxu0 %vm171_vm0, %v5008_v44 }
 0x2ec   :  { %4825 = vmatprep.mubr.msk.bf16.mxu0 %vm171_vm0, %v5009_v4  ;;  %v7288_v4 = vld [vmem:[#allocation9_spill] sm:$0xff] }
 0x2f3   :  { %4826 = vmatmul.mubr.msk.bf16.gmra.mrb[96].mxu0 %vm171_vm0, %v5010_v21 }
 0x2f4   :  { %4829 = vmatprep.mubr.msk.bf16.mxu0 %vm171_vm0, %v5011_v46  ;;  %v7289_v46 = vld [vmem:[#allocation10_spill] sm:$0xff] }
 0x2fb   :  { %4830 = vmatmul.mubr.msk.bf16.gmra.mrb[100].mxu0 %vm171_vm0, %v5012_v26 }
 0x2fc   :  { %4833 = vmatprep.mubr.msk.bf16.mxu0 %vm171_vm0, %v5013_v60  ;;  %v7290_v60 = vld [vmem:[#allocation8_spill] sm:$0xff] }
 0x303   :  { %4834 = vmatmul.mubr.msk.bf16.gmra.mrb[104].mxu0 %vm171_vm0, %v5014_v47 }
 0x304   :  { %4837 = vmatprep.mubr.msk.bf16.mxu0 %vm171_vm0, %v5015_v56 }
 0x30b   :  { %4838 = vmatmul.mubr.msk.bf16.gmra.mrb[108].mxu0 %vm171_vm0, %v5016_v39 }
 0x30c   :  { %4841 = vmatprep.mubr.msk.bf16.mxu0 %vm171_vm0, %v5017_v52 }
 0x313   :  { %4842 = vmatmul.mubr.msk.bf16.gmra.mrb[112].mxu0 %vm171_vm0, %v5018_v12 }
 0x36a   :  { %v2016_v55 = vpop.f32.mrb[50].mxu0 }
 0x36b   :  { %v4735_v3 = vpop.f32.mrb[51].mxu0  ;;  %v5886_v11 = vrot.slane %v2016_v55, %v2096_v62 }
 0x36d   :  { %7277 = vst [vmem:[#allocation20_spill] sm:$0xff] %v5886_v11  ;;  %v2098_v42 = vmul.f32 %v5886_v11, %v5419_v10  ;;  %v2099_v23 = vmul.f32 %v5886_v11, %v5431_v15  ;;  %v2100_v43 = vmul.f32 %v5415_v8, %v5886_v11  ;;  %v2101_v41 = vmul.f32 %v5427_v13, %v5886_v11  ;;  %v7278_v10 = vld [vmem:[#allocation11_spill] sm:$0xff] }
 0x36e   :  { %v2089_v57 = vpop.f32.mrb[82].mxu1  ;;  %v4747_v9 = vpop.f32.mrb[52].mxu0  ;;  %v2102_v0 = vmul.f32 %v5886_v11, %v5455_v30  ;;  %v2103_v7 = vmul.f32 %v5886_v11, %v5468_v37  ;;  %v2104_v48 = vmul.f32 %v5450_v27, %v5886_v11  ;;  %v2105_v6 = vmul.f32 %v7278_v10, %v5886_v11  ;;  %v7282_v30 = vld [vmem:[#allocation14_spill] sm:$0xff] }
 0x36f   :  { %v4742_v34 = vpop.f32.mrb[83].mxu1  ;;  %v2494_v53 = vpop.f32.mrb[53].mxu0  ;;  %v2106_v8 = vmul.f32 %v5886_v11, %v7279_v17  ;;  %v2107_v13 = vmul.f32 %v5886_v11, %v7280_v1  ;;  %v2108_v24 = vmul.f32 %v7281_v63, %v5886_v11  ;;  %v2109_v20 = vmul.f32 %v7282_v30, %v5886_v11 }
 0x370   :  { %v4748_v18 = vpop.f32.mrb[54].mxu0  ;;  %v2110_v27 = vmul.f32 %v5886_v11, %v7283_v25  ;;  %v2111_v58 = vmul.f32 %v5886_v11, %v7284_v2  ;;  %v2112_v50 = vmul.f32 %v7285_v40, %v5886_v11  ;;  %v2113_v5 = vmul.f32 %v7286_v35, %v5886_v11 }
 0x371   :  { %v2497_v16 = vpop.f32.mrb[55].mxu0  ;;  %v2114_v21 = vmul.f32 %v5886_v11, %v7288_v4  ;;  %v2115_v26 = vmul.f32 %v5886_v11, %v7289_v46  ;;  %v2116_v47 = vmul.f32 %v7290_v60, %v5886_v11  ;;  %v2117_v56 = vmul.f32 %v5429_v14, %v5886_v11 }
 0x372   :  { %v4781_v49 = vpop.f32.mrb[84].mxu1  ;;  %v2118_v52 = vmul.f32 %v5886_v11, %v5457_v31  ;;  %v2119_v12 = vmul.f32 %v5886_v11, %v5470_v38  ;;  %v2120_v32 = vmul.f32 %v5452_v28, %v5886_v11  ;;  %v2121_v45 = vmul.f32 %v5466_v36, %v5886_v11 }
 0x373   :  { %v3008_v15 = vpop.f32.mrb[85].mxu1  ;;  %v2122_v3 = vmul.f32 %v5886_v11, %v5493_v54  ;;  %v2123_v14 = vmul.f32 %v5886_v11, %v5506_v61  ;;  %v2124_v31 = vmul.f32 %v5488_v51, %v5886_v11  ;;  %v5948_v34 = vrot.slane %v2089_v57, %v2096_v62 }
 0x374   :  { %v4782_v37 = vpop.f32.mrb[86].mxu1  ;;  %v2125_v28 = vmul.f32 %v5502_v59, %v5886_v11  ;;  %v2126_v36 = vmul.f32 %v5886_v11, %v5529_v22  ;;  %v2127_v10 = vmul.f32 %v5886_v11, %v5542_v33  ;;  %v2128_v54 = vmul.f32 %v5524_v19, %v5886_v11 }
 0x375   :  { %v5920_v44 = vpop.f32.mrb[87].mxu1  ;;  %7293 = vst [vmem:[#allocation12_spill] sm:$0xff] %v5948_v34  ;;  %v2129_v51 = vmul.f32 %v5538_v29, %v5886_v11  ;;  %v5965_v62 = vmul.f32 %v4747_v9, %v5886_v11  ;;  %v5968_v57 = vmul.f32 %v2494_v53, %v5886_v11  ;;  %v5971_v59 = vmul.f32 %v4748_v18, %v5886_v11 }
 0x376   :  { %7287 = vst [vmem:[#allocation11_spill] sm:$0xff] %v5920_v44  ;;  %v5930_v39 = vpop.f32.mrb[56].mxu0  ;;  %v5976_v33 = vmul.f32 %v2497_v16, %v5886_v11  ;;  %v5979_v19 = vmul.f32 %v4781_v49, %v5886_v11  ;;  %v5982_v17 = vmul.f32 %v3008_v15, %v5886_v11  ;;  %v5985_v29 = vmul.f32 %v4782_v37, %v5886_v11 }
 0x377   :  { %7291 = vst [vmem:[#allocation13_spill] sm:$0xff] %v5930_v39  ;;  %v5940_v55 = vpop.f32.mrb[57].mxu0  ;;  %7296 = vst [vmem:[#allocation19_spill] sm:$0xff] %v5965_v62  ;;  %v5990_v53 = vadd.f32 %v5948_v34, %v2098_v42  ;;  %v5993_v18 = vadd.f32 %v5948_v34, %v2099_v23  ;;  %v5996_v16 = vadd.f32 %v5948_v34, %v2100_v43 }
 0x378   :  { %7292 = vst [vmem:[#allocation15_spill] sm:$0xff] %v5940_v55  ;;  %v5950_v38 = vpop.f32.mrb[58].mxu0  ;;  %7297 = vst [vmem:[#allocation16_spill] sm:$0xff] %v5968_v57  ;;  %v5999_v49 = vadd.f32 %v5948_v34, %v2101_v41  ;;  %v6004_v15 = vadd.f32 %v5948_v34, %v2102_v0  ;;  %v6007_v63 = vadd.f32 %v5948_v34, %v2103_v7 }
 0x379   :  { %7294 = vst [vmem:[#allocation14_spill] sm:$0xff] %v5950_v38  ;;  %v5960_v61 = vpop.f32.mrb[59].mxu0  ;;  %7298 = vst [vmem:[#allocation18_spill] sm:$0xff] %v5971_v59  ;;  %v6010_v42 = vadd.f32 %v5948_v34, %v2104_v48  ;;  %v6013_v23 = vadd.f32 %v5948_v34, %v2105_v6  ;;  %v6018_v43 = vadd.f32 %v5948_v34, %v2106_v8  ;;  %vm2166_vm2 = vcmp.ge.f32.partialorder %v5990_v53, 0.0 }
 0x37a   :  { %7295 = vst [vmem:[#allocation17_spill] sm:$0xff] %v5960_v61  ;;  %v5973_v22 = vpop.f32.mrb[88].mxu1  ;;  %7300 = vst [vmem:[#allocation10_spill] sm:$0xff] %v5976_v33  ;;  %v6021_v41 = vadd.f32 %v5948_v34, %v2107_v13  ;;  %v6024_v0 = vadd.f32 %v5948_v34, %v2108_v24  ;;  %v6027_v7 = vadd.f32 %v5948_v34, %v2109_v20  ;;  %vm2167_vm3 = vcmp.ge.f32.partialorder %v5993_v18, 0.0 }
 0x37b   :  { %7299 = vst [vmem:[#allocation9_spill] sm:$0xff] %v5973_v22  ;;  %7301 = vst [vmem:[#allocation8_spill] sm:$0xff] %v5979_v19  ;;  %v5987_v9 = vpop.f32.mrb[89].mxu1  ;;  %v6032_v48 = vadd.f32 %v5948_v34, %v2110_v27  ;;  %v6035_v6 = vadd.f32 %v5948_v34, %v2111_v58  ;;  %v6038_v8 = vadd.f32 %v5948_v34, %v2112_v50  ;;  %vm2168_vm4 = vcmp.ge.f32.partialorder %v5996_v16, 0.0 }
 0x37c   :  { %7302 = vst [vmem:[#allocation21_spill] sm:$0xff] %v5982_v17  ;;  %7303 = vst [vmem:[#allocation22_spill] sm:$0xff] %v5985_v29  ;;  %v6001_v1 = vpop.f32.mrb[90].mxu1  ;;  %v6041_v13 = vadd.f32 %v5948_v34, %v2113_v5  ;;  %v6046_v24 = vadd.f32 %v5948_v34, %v2114_v21  ;;  %v6049_v20 = vadd.f32 %v5948_v34, %v2115_v26  ;;  %vm2169_vm5 = vcmp.ge.f32.partialorder %v5999_v49, 0.0 }
 0x37d   :  { %7304 = vst [vmem:[#allocation23_spill] sm:$0xff] %v5987_v9  ;;  %7305 = vst [vmem:[#allocation24_spill] sm:$0xff] %v6001_v1  ;;  %v6015_v30 = vpop.f32.mrb[91].mxu1  ;;  %v6052_v27 = vadd.f32 %v5948_v34, %v2116_v47  ;;  %v6055_v2 = vadd.f32 %v5948_v34, %v2117_v56  ;;  %v6060_v40 = vadd.f32 %v5948_v34, %v2118_v52  ;;  %v6090_v56 = vld [vmem:[%s7230_s6] ss:$0 sm:$0xff]  ;;  %vm2170_vm6 = vcmp.ge.f32.partialorder %v6004_v15, 0.0 }
 0x37e   :  { %7306 = vst [vmem:[#allocation25_spill] sm:$0xff] %v6015_v30  ;;  %v6029_v37 = vpop.f32.mrb[60].mxu0  ;;  %v6063_v50 = vadd.f32 %v5948_v34, %v2119_v12  ;;  %v6066_v35 = vadd.f32 %v5948_v34, %v2120_v32  ;;  %v6069_v5 = vadd.f32 %v5948_v34, %v2121_v45  ;;  %v6074_v21 = vadd.f32 %v5948_v34, %v2122_v3 }
 0x37f   :  { %7307 = vst [vmem:[#allocation26_spill] sm:$0xff] %v6029_v37  ;;  %v6043_v25 = vpop.f32.mrb[61].mxu0  ;;  %v6077_v46 = vadd.f32 %v5948_v34, %v2123_v14  ;;  %v6080_v26 = vadd.f32 %v5948_v34, %v2124_v31  ;;  %v6083_v60 = vadd.f32 %v5948_v34, %v2125_v28  ;;  %7315 = vst [vmem:[#allocation34_spill] sm:$0xff] %v6090_v56  ;;  %vm2171_vm7 = vcmp.ge.f32.partialorder %v6007_v63, 0.0 }
 0x380   :  { %7308 = vst [vmem:[#allocation27_spill] sm:$0xff] %v6043_v25  ;;  %v6057_v58 = vpop.f32.mrb[62].mxu0  ;;  %7311 = vst [vmem:[#allocation30_spill] sm:$0xff] %v6074_v21  ;;  %v6093_v52 = vadd.f32 %v5948_v34, %v2126_v36  ;;  %v6096_v12 = vadd.f32 %v5948_v34, %v2127_v10  ;;  %v6099_v32 = vadd.f32 %v5948_v34, %v2128_v54  ;;  %vm2172_vm8 = vcmp.ge.f32.partialorder %v6010_v42, 0.0 }
 0x381   :  { %7309 = vst [vmem:[#allocation28_spill] sm:$0xff] %v6057_v58  ;;  %v6071_v4 = vpop.f32.mrb[63].mxu0  ;;  %7312 = vst [vmem:[#allocation31_spill] sm:$0xff] %v6077_v46  ;;  %v6102_v45 = vadd.f32 %v5948_v34, %v2129_v51  ;;  %vm2173_vm9 = vcmp.ge.f32.partialorder %v6013_v23, 0.0  ;;  %vm2174_vm10 = vcmp.ge.f32.partialorder %v6018_v43, 0.0  ;;  %vm2175_vm11 = vcmp.ge.f32.partialorder %v6021_v41, 0.0 }
 0x382   :  { %7310 = vst [vmem:[#allocation29_spill] sm:$0xff] %v6071_v4  ;;  %7313 = vst [vmem:[#allocation32_spill] sm:$0xff] %v6080_v26  ;;  %v6085_v47 = vpop.f32.mrb[92].mxu1  ;;  %vm2176_vm12 = vcmp.ge.f32.partialorder %v6024_v0, 0.0  ;;  %vm2177_vm13 = vcmp.ge.f32.partialorder %v6027_v7, 0.0  ;;  %v2204_v36 = vmul.f32 %v6090_v56, %v5990_v53  ;;  %v2205_v10 = vmul.f32 %v6090_v56, %v5993_v18 }
 0x383   :  { %7314 = vst [vmem:[#allocation33_spill] sm:$0xff] %v6085_v47  ;;  %7316 = vst [vmem:[#allocation35_spill] sm:$0xff] %v6093_v52  ;;  %v6104_v3 = vpop.f32.mrb[93].mxu1  ;;  %v2206_v54 = vmul.f32 %v6090_v56, %v5996_v16  ;;  %v2207_v51 = vmul.f32 %v6090_v56, %v5999_v49  ;;  %v2212_v4 = vmul.f32 %v6090_v56, %v6018_v43  ;;  %vm2194_vm14 = vcmp.ge.f32.partialorder %v6093_v52, 0.0 }
 0x384   :  { %7317 = vst [vmem:[#allocation36_spill] sm:$0xff] %v6096_v12  ;;  %7318 = vst [vmem:[#allocation37_spill] sm:$0xff] %v6099_v32  ;;  %v6110_v14 = vpop.f32.mrb[94].mxu1  ;;  %v2213_v58 = vmul.f32 %v6090_v56, %v6021_v41  ;;  %v2214_v25 = vmul.f32 %v6090_v56, %v6024_v0  ;;  %v2216_v30 = vmul.f32 %v6090_v56, %v6032_v48  ;;  %vm2195_vm15 = vcmp.ge.f32.partialorder %v6096_v12, 0.0 }
 0x385   :  { %7319 = vst [vmem:[#allocation38_spill] sm:$0xff] %v6104_v3  ;;  %7320 = vst [vmem:[#allocation39_spill] sm:$0xff] %v6110_v14  ;;  %v6116_v31 = vpop.f32.mrb[95].mxu1  ;;  %v2209_v14 = vmul.f32 %v6090_v56, %v6007_v63  ;;  %v2210_v3 = vmul.f32 %v6090_v56, %v6010_v42  ;;  %v2217_v1 = vmul.f32 %v6090_v56, %v6035_v6  ;;  %vm2196_vm0 = vcmp.ge.f32.partialorder %v6099_v32, 0.0 }
 0x386   :  { %7321 = vst [vmem:[#allocation40_spill] sm:$0xff] %v6116_v31  ;;  %v6122_v28 = vpop.f32.mrb[64].mxu0  ;;  %v2208_v31 = vmul.f32 %v6090_v56, %v6004_v15  ;;  %v2218_v9 = vmul.f32 %v6090_v56, %v6038_v8  ;;  %vm2197_vm1 = vcmp.ge.f32.partialorder %v6102_v45, 0.0  ;;  %v2220_v61 = vmul.f32 %v6090_v56, %v6046_v24 }
 0x387   :  { %7322 = vst [vmem:[#allocation41_spill] sm:$0xff] %v6122_v28  ;;  %v6136_v28 = vpop.f32.mrb[65].mxu0  ;;  %v2221_v38 = vmul.f32 %v6090_v56, %v6049_v20  ;;  %v2222_v55 = vmul.f32 %v6090_v56, %v6052_v27  ;;  %v2224_v44 = vmul.f32 %v6090_v56, %v6060_v40  ;;  %v2225_v11 = vmul.f32 %v6090_v56, %v6063_v50 }
 0x388   :  { %7323 = vst [vmem:[#allocation42_spill] sm:$0xff] %v6136_v28  ;;  %v2211_v28 = vmul.f32 %v6090_v56, %v6013_v23  ;;  %v6150_v47 = vpop.f32.mrb[66].mxu0  ;;  %v2226_v29 = vmul.f32 %v6090_v56, %v6066_v35  ;;  %v2227_v17 = vmul.f32 %v6090_v56, %v6069_v5  ;;  %v2228_v33 = vmul.f32 %v6090_v56, %v6074_v21 }
 0x389   :  { %7324 = vst [vmem:[#allocation43_spill] sm:$0xff] %v6150_v47  ;;  %v2215_v47 = vmul.f32 %v6090_v56, %v6027_v7  ;;  %v6164_v37 = vpop.f32.mrb[67].mxu0  ;;  %v2230_v59 = vmul.f32 %v6090_v56, %v6080_v26  ;;  %v2231_v57 = vmul.f32 %v6090_v56, %v6083_v60  ;;  %v6216_v34 = vmul.f32 %v6090_v56, %v6093_v52 }
 0x38a   :  { %7325 = vst [vmem:[#allocation44_spill] sm:$0xff] %v6164_v37  ;;  %v2219_v37 = vmul.f32 %v6090_v56, %v6041_v13  ;;  %v6178_v22 = vpop.f32.mrb[96].mxu1  ;;  %v6224_v21 = vmul.f32 %v6090_v56, %v6099_v32  ;;  %v6228_v26 = vmul.f32 %v6090_v56, %v6102_v45  ;;  %v2237_v52 = vsel %vm2167_vm3, %v5993_v18, %v2205_v10  ;;  %v7363_v10 = vld [vmem:[#allocation34_spill] sm:$0xff] }
 0x38b   :  { %7326 = vst [vmem:[#allocation45_spill] sm:$0xff] %v6178_v22  ;;  %v2223_v22 = vmul.f32 %v6090_v56, %v6055_v2  ;;  %v6192_v39 = vpop.f32.mrb[97].mxu1  ;;  %v2239_v32 = vsel %vm2169_vm5, %v5999_v49, %v2207_v51  ;;  %v2242_v18 = vsel %vm2172_vm8, %v6010_v42, %v2210_v3  ;;  %2269 = vst [vmem:[%s7231_s7 + $0x8] sm:$0xff] %v2237_v52  ;;  %vm7332_vm3 = vcmp.ge.f32.partialorder %v6035_v6, 0.0 }
 0x38c   :  { %7327 = vst [vmem:[#allocation46_spill] sm:$0xff] %v6192_v39  ;;  %v6202_v19 = vpop.f32.mrb[98].mxu1  ;;  %v2229_v39 = vmul.f32 %v6090_v56, %v6077_v46  ;;  %2271 = vst [vmem:[%s7231_s7 + $0x18] sm:$0xff] %v2239_v32  ;;  %v2247_v42 = vsel %vm2177_vm13, %v6027_v7, %v2215_v47  ;;  %vm7334_vm5 = vcmp.ge.f32.partialorder %v6041_v13, 0.0  ;;  %vm7337_vm8 = vcmp.ge.f32.partialorder %v6052_v27, 0.0  ;;  %v7358_v47 = vld [vmem:[#allocation8_spill] sm:$0xff] }
 0x38d   :  { %7328 = vst [vmem:[#allocation47_spill] sm:$0xff] %v6202_v19  ;;  %v6212_v62 = vpop.f32.mrb[99].mxu1  ;;  %v6220_v19 = vmul.f32 %v6090_v56, %v6096_v12  ;;  %v2238_v12 = vsel %vm2168_vm4, %v5996_v16, %v2206_v54  ;;  %v2243_v16 = vsel %vm2173_vm9, %v6013_v23, %v2211_v28  ;;  %2274 = vst [vmem:[%s7231_s7 + $0x30] sm:$0xff] %v2242_v18  ;;  %vm7333_vm4 = vcmp.ge.f32.partialorder %v6038_v8, 0.0 }
 0x38e   :  { %7329 = vst [vmem:[#allocation48_spill] sm:$0xff] %v6212_v62  ;;  %v6230_v46 = vpop.f32.mrb[68].mxu0  ;;  %v2236_v62 = vsel %vm2166_vm2, %v5990_v53, %v2204_v36  ;;  %v2241_v53 = vsel %vm2171_vm7, %v6007_v63, %v2209_v14  ;;  %2270 = vst [vmem:[%s7231_s7 + $0x10] sm:$0xff] %v2238_v12  ;;  %v2246_v63 = vsel %vm2176_vm12, %v6024_v0, %v2214_v25  ;;  %vm7331_vm2 = vcmp.ge.f32.partialorder %v6032_v48, 0.0  ;;  %v7359_v12 = vld [vmem:[#allocation21_spill] sm:$0xff]  ;;  %v7361_v14 = vld [vmem:[#allocation20_spill] sm:$0xff] }
 0x38f   :  { %7330 = vst [vmem:[#allocation49_spill] sm:$0xff] %v6230_v46  ;;  %v6244_v56 = vpop.f32.mrb[69].mxu0  ;;  %v2240_v46 = vsel %vm2170_vm6, %v6004_v15, %v2208_v31  ;;  %2268 = vst [vmem:[%s7231_s7] sm:$0xff] %v2236_v62  ;;  %v2244_v15 = vsel %vm2174_vm10, %v6018_v43, %v2212_v4  ;;  %v2245_v62 = vsel %vm2175_vm11, %v6021_v41, %v2213_v58  ;;  %vm7335_vm6 = vcmp.ge.f32.partialorder %v6046_v24, 0.0  ;;  %v7356_v4 = vld [vmem:[#allocation18_spill] sm:$0xff]  ;;  %v7362_v31 = vld [vmem:[#allocation11_spill] sm:$0xff] }
 0x390   :  { %v6270_v49 = vpop.f32.mrb[70].mxu0  ;;  %2272 = vst [vmem:[%s7231_s7 + $0x20] sm:$0xff] %v2240_v46  ;;  %2273 = vst [vmem:[%s7231_s7 + $0x28] sm:$0xff] %v2241_v53  ;;  %v2248_v43 = vsel %vm7331_vm2, %v6032_v48, %v2216_v30  ;;  %v2249_v41 = vsel %vm7332_vm3, %v6035_v6, %v2217_v1  ;;  %v2250_v0 = vsel %vm7333_vm4, %v6038_v8, %v2218_v9  ;;  %vm7336_vm7 = vcmp.ge.f32.partialorder %v6049_v20, 0.0  ;;  %v7357_v46 = vld [vmem:[#allocation10_spill] sm:$0xff] }
 0x391   :  { %2275 = vst [vmem:[%s7231_s7 + $0x38] sm:$0xff] %v2243_v16  ;;  %v6296_v23 = vpop.f32.mrb[71].mxu0  ;;  %v2251_v7 = vsel %vm7334_vm5, %v6041_v13, %v2219_v37  ;;  %2276 = vst [vmem:[%s7231_s7 + $0x40] sm:$0xff] %v2244_v15  ;;  %v2252_v1 = vsel %vm7335_vm6, %v6046_v24, %v2220_v61  ;;  %v2253_v30 = vsel %vm7336_vm7, %v6049_v20, %v2221_v38  ;;  %vm7338_vm9 = vcmp.ge.f32.partialorder %v6055_v2, 0.0  ;;  %v7347_v13 = vld [vmem:[#allocation32_spill] sm:$0xff] }
 0x392   :  { %2277 = vst [vmem:[%s7231_s7 + $0x48] sm:$0xff] %v2245_v62  ;;  %2278 = vst [vmem:[%s7231_s7 + $0x50] sm:$0xff] %v2246_v63  ;;  %v6322_v9 = vpop.f32.mrb[100].mxu1  ;;  %v2254_v37 = vsel %vm7337_vm8, %v6052_v27, %v2222_v55  ;;  %v2255_v48 = vsel %vm7338_vm9, %v6055_v2, %v2223_v22  ;;  %vm7339_vm10 = vcmp.ge.f32.partialorder %v6060_v40, 0.0  ;;  %vm7340_vm11 = vcmp.ge.f32.partialorder %v6063_v50, 0.0  ;;  %v7352_v27 = vld [vmem:[#allocation37_spill] sm:$0xff] }
 0x393   :  { %2279 = vst [vmem:[%s7231_s7 + $0x58] sm:$0xff] %v2247_v42  ;;  %2280 = vst [vmem:[%s7231_s7 + $0x60] sm:$0xff] %v2248_v43  ;;  %v6348_v55 = vpop.f32.mrb[101].mxu1  ;;  %v2256_v38 = vsel %vm7339_vm10, %v6060_v40, %v2224_v44  ;;  %v2257_v61 = vsel %vm7340_vm11, %v6063_v50, %v2225_v11  ;;  %vm7341_vm12 = vcmp.ge.f32.partialorder %v6066_v35, 0.0  ;;  %vm7342_vm13 = vcmp.ge.f32.partialorder %v6069_v5, 0.0  ;;  %v7343_v44 = vld [vmem:[#allocation30_spill] sm:$0xff] }
 0x394   :  { %2281 = vst [vmem:[%s7231_s7 + $0x68] sm:$0xff] %v2249_v41  ;;  %2282 = vst [vmem:[%s7231_s7 + $0x70] sm:$0xff] %v2250_v0  ;;  %v2258_v22 = vsel %vm7341_vm12, %v6066_v35, %v2226_v29  ;;  %v2259_v6 = vsel %vm7342_vm13, %v6069_v5, %v2227_v17  ;;  %v6374_v11 = vpop.f32.mrb[102].mxu1  ;;  %vm7344_vm2 = vcmp.ge.f32.partialorder %v7343_v44, 0.0  ;;  %v7345_v29 = vld [vmem:[#allocation31_spill] sm:$0xff]  ;;  %vm7348_vm4 = vcmp.ge.f32.partialorder %v7347_v13, 0.0 }
 0x395   :  { %2283 = vst [vmem:[%s7231_s7 + $0x78] sm:$0xff] %v2251_v7  ;;  %2284 = vst [vmem:[%s7231_s7 + $0x80] sm:$0xff] %v2252_v1  ;;  %v2260_v17 = vsel %vm7344_vm2, %v7343_v44, %v2228_v33  ;;  %vm7346_vm3 = vcmp.ge.f32.partialorder %v7345_v29, 0.0  ;;  %v2262_v25 = vsel %vm7348_vm4, %v7347_v13, %v2230_v59  ;;  %vm7349_vm5 = vcmp.ge.f32.partialorder %v6083_v60, 0.0  ;;  %v7351_v33 = vld [vmem:[#allocation36_spill] sm:$0xff]  ;;  %v7354_v40 = vld [vmem:[#allocation19_spill] sm:$0xff] }
 0x396   :  { %2285 = vst [vmem:[%s7231_s7 + $0x88] sm:$0xff] %v2253_v30  ;;  %2286 = vst [vmem:[%s7231_s7 + $0x90] sm:$0xff] %v2254_v37  ;;  %v2261_v8 = vsel %vm7346_vm3, %v7345_v29, %v2229_v39  ;;  %v2263_v24 = vsel %vm7349_vm5, %v6083_v60, %v2231_v57  ;;  %v6400_v39 = vpop.f32.mrb[103].mxu1  ;;  %v7350_v57 = vld [vmem:[#allocation35_spill] sm:$0xff]  ;;  %v2265_v20 = vsel %vm2195_vm15, %v7351_v33, %v6220_v19  ;;  %v7353_v19 = vld [vmem:[#allocation12_spill] sm:$0xff] }
 0x397   :  { %2287 = vst [vmem:[%s7231_s7 + $0x98] sm:$0xff] %v2255_v48  ;;  %2288 = vst [vmem:[%s7231_s7 + $0xa0] sm:$0xff] %v2256_v38  ;;  %v2264_v59 = vsel %vm2194_vm14, %v7350_v57, %v6216_v34  ;;  %v2266_v2 = vsel %vm2196_vm0, %v7352_v27, %v6224_v21  ;;  %v2267_v58 = vsel %vm2197_vm1, %v6102_v45, %v6228_v26  ;;  %v6430_v34 = vpop.f32.mrb[72].mxu0  ;;  %v7355_v35 = vld [vmem:[#allocation16_spill] sm:$0xff]  ;;  %v7360_v45 = vld [vmem:[#allocation22_spill] sm:$0xff] }
 0x398   :  { %2289 = vst [vmem:[%s7231_s7 + $0xa8] sm:$0xff] %v2257_v61  ;;  %2290 = vst [vmem:[%s7231_s7 + $0xb0] sm:$0xff] %v2258_v22  ;;  %v2655_v50 = vadd.f32 %v7354_v40, %v7353_v19  ;;  %v2653_v5 = vadd.f32 %v7355_v35, %v7353_v19  ;;  %v2656_v21 = vadd.f32 %v7356_v4, %v7353_v19  ;;  %v6452_v60 = vpop.f32.mrb[73].mxu0  ;;  %v7364_v22 = vld [vmem:[#allocation13_spill] sm:$0xff]  ;;  %v7365_v44 = vld [vmem:[#allocation15_spill] sm:$0xff] }
 0x399   :  { %2291 = vst [vmem:[%s7231_s7 + $0xb8] sm:$0xff] %v2259_v6  ;;  %2292 = vst [vmem:[%s7231_s7 + $0xc0] sm:$0xff] %v2260_v17  ;;  %v2654_v26 = vadd.f32 %v7357_v46, %v7353_v19  ;;  %v3169_v52 = vadd.f32 %v7358_v47, %v7353_v19  ;;  %v3167_v32 = vadd.f32 %v7359_v12, %v7353_v19  ;;  %v6462_v36 = vpop.f32.mrb[74].mxu0  ;;  %v7366_v29 = vld [vmem:[#allocation14_spill] sm:$0xff]  ;;  %v7367_v57 = vld [vmem:[#allocation17_spill] sm:$0xff] }
 0x39a   :  { %2293 = vst [vmem:[%s7231_s7 + $0xc8] sm:$0xff] %v2261_v8  ;;  %2294 = vst [vmem:[%s7231_s7 + $0xd0] sm:$0xff] %v2262_v25  ;;  %v3170_v3 = vadd.f32 %v7360_v45, %v7353_v19  ;;  %v3136_v28 = vmul.f32 %v7362_v31, %v7361_v14  ;;  %vm2687_vm14 = vcmp.ge.f32.partialorder %v2655_v50, 0.0  ;;  %v2719_v54 = vmul.f32 %v7363_v10, %v2655_v50  ;;  %v6466_v53 = vpop.f32.mrb[75].mxu0  ;;  %v6470_v15 = vpop.f32.mrb[104].mxu1  ;;  %v7369_v4 = vld [vmem:[#allocation23_spill] sm:$0xff] }
 0x39b   :  { %2295 = vst [vmem:[%s7231_s7 + $0xd8] sm:$0xff] %v2263_v24  ;;  %2296 = vst [vmem:[%s7231_s7 + $0xe0] sm:$0xff] %v2264_v59  ;;  %vm2685_vm15 = vcmp.ge.f32.partialorder %v2653_v5, 0.0  ;;  %v2717_v51 = vmul.f32 %v7363_v10, %v2653_v5  ;;  %vm2688_vm0 = vcmp.ge.f32.partialorder %v2656_v21, 0.0  ;;  %v2720_v18 = vmul.f32 %v7363_v10, %v2656_v21  ;;  %v6473_v43 = vpop.f32.mrb[105].mxu1  ;;  %v7370_v46 = vld [vmem:[#allocation24_spill] sm:$0xff] }
 0x39c   :  { %2297 = vst [vmem:[%s7231_s7 + $0xe8] sm:$0xff] %v2265_v20  ;;  %2298 = vst [vmem:[%s7231_s7 + $0xf0] sm:$0xff] %v2266_v2  ;;  %vm2686_vm1 = vcmp.ge.f32.partialorder %v2654_v26, 0.0  ;;  %v2718_v16 = vmul.f32 %v7363_v10, %v2654_v26  ;;  %v2751_v62 = vsel %vm2687_vm14, %v2655_v50, %v2719_v54  ;;  %vm3201_vm6 = vcmp.ge.f32.partialorder %v3169_v52, 0.0  ;;  %v6482_v1 = vpop.f32.mrb[106].mxu1 }
 0x39d   :  { %2299 = vst [vmem:[%s7231_s7 + $0xf8] sm:$0xff] %v2267_v58  ;;  %v2749_v63 = vsel %vm2685_vm15, %v2653_v5, %v2717_v51  ;;  %v3233_v42 = vmul.f32 %v7363_v10, %v3169_v52  ;;  %4142 = vst [vmem:[%s7231_s7 + $0x110] sm:$0xff] %v2751_v62  ;;  %v2752_v41 = vsel %vm2688_vm0, %v2656_v21, %v2720_v18  ;;  %vm3199_vm7 = vcmp.ge.f32.partialorder %v3167_v32, 0.0  ;;  %v6492_v38 = vpop.f32.mrb[107].mxu1  ;;  %v7368_v58 = vld [vmem:[#allocation9_spill] sm:$0xff] }
 0x39e   :  { %4140 = vst [vmem:[%s7231_s7 + $0x100] sm:$0xff] %v2749_v63  ;;  %v2750_v0 = vsel %vm2686_vm1, %v2654_v26, %v2718_v16  ;;  %v3231_v7 = vmul.f32 %v7363_v10, %v3167_v32  ;;  %4143 = vst [vmem:[%s7231_s7 + $0x118] sm:$0xff] %v2752_v41  ;;  %vm3202_vm8 = vcmp.ge.f32.partialorder %v3170_v3, 0.0  ;;  %v3234_v37 = vmul.f32 %v7363_v10, %v3170_v3  ;;  %v6503_v13 = vpop.f32.mrb[76].mxu0  ;;  %v7371_v41 = vld [vmem:[#allocation25_spill] sm:$0xff] }
 0x39f   :  { %4141 = vst [vmem:[%s7231_s7 + $0x108] sm:$0xff] %v2750_v0  ;;  %v3265_v30 = vsel %vm3201_vm6, %v3169_v52, %v3233_v42  ;;  %v3168_v48 = vadd.f32 %v3136_v28, %v7353_v19  ;;  %v2627_v6 = vmul.f32 %v7364_v22, %v7361_v14  ;;  %v2625_v17 = vmul.f32 %v7365_v44, %v7361_v14  ;;  %v6511_v33 = vpop.f32.mrb[77].mxu0 }
 0x3a0   :  { %4238 = vst [vmem:[%s7231_s7 + $0x210] sm:$0xff] %v3265_v30  ;;  %v3263_v61 = vsel %vm3199_vm7, %v3167_v32, %v3231_v7  ;;  %v2628_v8 = vmul.f32 %v7366_v29, %v7361_v14  ;;  %v3266_v25 = vsel %vm3202_vm8, %v3170_v3, %v3234_v37  ;;  %v2626_v59 = vmul.f32 %v7367_v57, %v7361_v14  ;;  %v6521_v50 = vpop.f32.mrb[78].mxu0  ;;  %v7374_v57 = vld [vmem:[#allocation28_spill] sm:$0xff] }
 0x3a1   :  { %4236 = vst [vmem:[%s7231_s7 + $0x200] sm:$0xff] %v3263_v61  ;;  %vm3200_vm9 = vcmp.ge.f32.partialorder %v3168_v48, 0.0  ;;  %v3232_v24 = vmul.f32 %v7363_v10, %v3168_v48  ;;  %4239 = vst [vmem:[%s7231_s7 + $0x218] sm:$0xff] %v3266_v25  ;;  %v2659_v20 = vadd.f32 %v2627_v6, %v7353_v19  ;;  %v2657_v27 = vadd.f32 %v2625_v17, %v7353_v19  ;;  %v6528_v47 = vpop.f32.mrb[79].mxu0  ;;  %v7372_v6 = vld [vmem:[#allocation26_spill] sm:$0xff]  ;;  %v7373_v25 = vld [vmem:[#allocation27_spill] sm:$0xff] }
 0x3a2   :  { %v2660_v2 = vadd.f32 %v2628_v8, %v7353_v19  ;;  %v3141_v40 = vmul.f32 %v7368_v58, %v7361_v14  ;;  %v2658_v5 = vadd.f32 %v2626_v59, %v7353_v19  ;;  %v3139_v21 = vmul.f32 %v7369_v4, %v7361_v14  ;;  %v6535_v32 = vpop.f32.mrb[108].mxu1  ;;  %v7375_v4 = vld [vmem:[#allocation29_spill] sm:$0xff] }
 0x3a3   :  { %v3264_v35 = vsel %vm3200_vm9, %v3168_v48, %v3232_v24  ;;  %v3142_v26 = vmul.f32 %v7370_v46, %v7361_v14  ;;  %vm2691_vm10 = vcmp.ge.f32.partialorder %v2659_v20, 0.0  ;;  %v2723_v52 = vmul.f32 %v7363_v10, %v2659_v20  ;;  %v6539_v31 = vpop.f32.mrb[109].mxu1  ;;  %v7376_v46 = vld [vmem:[#allocation33_spill] sm:$0xff] }
 0x3a4   :  { %4237 = vst [vmem:[%s7231_s7 + $0x208] sm:$0xff] %v3264_v35  ;;  %vm2689_vm11 = vcmp.ge.f32.partialorder %v2657_v27, 0.0  ;;  %v2721_v12 = vmul.f32 %v7363_v10, %v2657_v27  ;;  %vm2692_vm12 = vcmp.ge.f32.partialorder %v2660_v2, 0.0  ;;  %v2724_v45 = vmul.f32 %v7363_v10, %v2660_v2  ;;  %v6543_v16 = vpop.f32.mrb[110].mxu1 }
 0x3a5   :  { %vm2690_vm13 = vcmp.ge.f32.partialorder %v2658_v5, 0.0  ;;  %v2722_v3 = vmul.f32 %v7363_v10, %v2658_v5  ;;  %v2755_v28 = vsel %vm2691_vm10, %v2659_v20, %v2723_v52  ;;  %v3173_v51 = vadd.f32 %v3141_v40, %v7353_v19  ;;  %v6554_v7 = vpop.f32.mrb[111].mxu1 }
 0x3a6   :  { %v2753_v54 = vsel %vm2689_vm11, %v2657_v27, %v2721_v12  ;;  %v3171_v18 = vadd.f32 %v3139_v21, %v7353_v19  ;;  %4146 = vst [vmem:[%s7231_s7 + $0x130] sm:$0xff] %v2755_v28  ;;  %v2756_v62 = vsel %vm2692_vm12, %v2660_v2, %v2724_v45  ;;  %v3174_v42 = vadd.f32 %v3142_v26, %v7353_v19  ;;  %v6564_v48 = vpop.f32.mrb[80].mxu0 }
 0x3a7   :  { %4144 = vst [vmem:[%s7231_s7 + $0x120] sm:$0xff] %v2753_v54  ;;  %v2754_v63 = vsel %vm2690_vm13, %v2658_v5, %v2722_v3  ;;  %v3140_v0 = vmul.f32 %v7371_v41, %v7361_v14  ;;  %4147 = vst [vmem:[%s7231_s7 + $0x138] sm:$0xff] %v2756_v62  ;;  %vm3205_vm2 = vcmp.ge.f32.partialorder %v3173_v51, 0.0  ;;  %v3237_v30 = vmul.f32 %v7363_v10, %v3173_v51  ;;  %v6570_v17 = vpop.f32.mrb[81].mxu0  ;;  %v7377_v3 = vld [vmem:[#allocation38_spill] sm:$0xff] }
 0x3a8   :  { %4145 = vst [vmem:[%s7231_s7 + $0x128] sm:$0xff] %v2754_v63  ;;  %vm3203_vm3 = vcmp.ge.f32.partialorder %v3171_v18, 0.0  ;;  %v3235_v37 = vmul.f32 %v7363_v10, %v3171_v18  ;;  %vm3206_vm4 = vcmp.ge.f32.partialorder %v3174_v42, 0.0  ;;  %v3238_v61 = vmul.f32 %v7363_v10, %v3174_v42  ;;  %v6576_v20 = vpop.f32.mrb[82].mxu0 }
 0x3a9   :  { %v3172_v22 = vadd.f32 %v3140_v0, %v7353_v19  ;;  %v2631_v44 = vmul.f32 %v7372_v6, %v7361_v14  ;;  %v3269_v29 = vsel %vm3205_vm2, %v3173_v51, %v3237_v30  ;;  %v2629_v24 = vmul.f32 %v7373_v25, %v7361_v14  ;;  %v6586_v40 = vpop.f32.mrb[83].mxu0 }
 0x3aa   :  { %v3267_v8 = vsel %vm3203_vm3, %v3171_v18, %v3235_v37  ;;  %v2632_v59 = vmul.f32 %v7374_v57, %v7361_v14  ;;  %4242 = vst [vmem:[%s7231_s7 + $0x230] sm:$0xff] %v3269_v29  ;;  %v3270_v27 = vsel %vm3206_vm4, %v3174_v42, %v3238_v61  ;;  %v2630_v21 = vmul.f32 %v7375_v4, %v7361_v14  ;;  %v6597_v52 = vpop.f32.mrb[112].mxu1  ;;  %v7380_v4 = vld [vmem:[#allocation41_spill] sm:$0xff] }
 0x3ab   :  { %4240 = vst [vmem:[%s7231_s7 + $0x220] sm:$0xff] %v3267_v8  ;;  %vm3204_vm5 = vcmp.ge.f32.partialorder %v3172_v22, 0.0  ;;  %v3236_v2 = vmul.f32 %v7363_v10, %v3172_v22  ;;  %v2663_v58 = vadd.f32 %v2631_v44, %v7353_v19  ;;  %4243 = vst [vmem:[%s7231_s7 + $0x238] sm:$0xff] %v3270_v27  ;;  %v2661_v35 = vadd.f32 %v2629_v24, %v7353_v19  ;;  %v6602_v54 = vpop.f32.mrb[113].mxu1  ;;  %v7379_v44 = vld [vmem:[#allocation40_spill] sm:$0xff] }
 0x3ac   :  { %v2664_v5 = vadd.f32 %v2632_v59, %v7353_v19  ;;  %v3145_v26 = vmul.f32 %v7376_v46, %v7361_v14  ;;  %v3143_v28 = vmul.f32 %v7377_v3, %v7361_v14  ;;  %v6609_v62 = vpop.f32.mrb[114].mxu1  ;;  %v2662_v42 = vadd.f32 %v2630_v21, %v7353_v19  ;;  %v7381_v46 = vld [vmem:[#allocation42_spill] sm:$0xff] }
 0x3ad   :  { %v3268_v12 = vsel %vm3204_vm5, %v3172_v22, %v3236_v2  ;;  %vm2695_vm14 = vcmp.ge.f32.partialorder %v2663_v58, 0.0  ;;  %v2727_v45 = vmul.f32 %v7363_v10, %v2663_v58  ;;  %vm2693_vm15 = vcmp.ge.f32.partialorder %v2661_v35, 0.0  ;;  %v6614_v30 = vpop.f32.mrb[115].mxu1  ;;  %v7378_v22 = vld [vmem:[#allocation39_spill] sm:$0xff] }
 0x3ae   :  { %4241 = vst [vmem:[%s7231_s7 + $0x228] sm:$0xff] %v3268_v12  ;;  %v2725_v51 = vmul.f32 %v7363_v10, %v2661_v35  ;;  %vm2696_vm0 = vcmp.ge.f32.partialorder %v2664_v5, 0.0  ;;  %v2728_v18 = vmul.f32 %v7363_v10, %v2664_v5  ;;  %v3177_v41 = vadd.f32 %v3145_v26, %v7353_v19  ;;  %v6623_v8 = vpop.f32.mrb[84].mxu0 }
 0x3af   :  { %v2759_v63 = vsel %vm2695_vm14, %v2663_v58, %v2727_v45  ;;  %v3175_v0 = vadd.f32 %v3143_v28, %v7353_v19  ;;  %v3146_v6 = vmul.f32 %v7378_v22, %v7361_v14  ;;  %v3144_v29 = vmul.f32 %v7379_v44, %v7361_v14  ;;  %v6633_v57 = vpop.f32.mrb[85].mxu0 }
 0x3b0   :  { %4150 = vst [vmem:[%s7231_s7 + $0x150] sm:$0xff] %v2759_v63  ;;  %v2757_v37 = vsel %vm2693_vm15, %v2661_v35, %v2725_v51  ;;  %v2760_v61 = vsel %vm2696_vm0, %v2664_v5, %v2728_v18  ;;  %vm2694_vm1 = vcmp.ge.f32.partialorder %v2662_v42, 0.0  ;;  %v2726_v25 = vmul.f32 %v7363_v10, %v2662_v42  ;;  %v6638_v58 = vpop.f32.mrb[86].mxu0  ;;  %v7382_v63 = vld [vmem:[#allocation43_spill] sm:$0xff] }
 0x3b1   :  { %4148 = vst [vmem:[%s7231_s7 + $0x140] sm:$0xff] %v2757_v37  ;;  %4151 = vst [vmem:[%s7231_s7 + $0x158] sm:$0xff] %v2760_v61  ;;  %vm3209_vm6 = vcmp.ge.f32.partialorder %v3177_v41, 0.0  ;;  %v3241_v24 = vmul.f32 %v7363_v10, %v3177_v41  ;;  %vm3207_vm7 = vcmp.ge.f32.partialorder %v3175_v0, 0.0  ;;  %v3239_v59 = vmul.f32 %v7363_v10, %v3175_v0  ;;  %v6644_v12 = vpop.f32.mrb[87].mxu0  ;;  %v7384_v61 = vld [vmem:[#allocation45_spill] sm:$0xff] }
 0x3b2   :  { %v3178_v27 = vadd.f32 %v3146_v6, %v7353_v19  ;;  %v3176_v2 = vadd.f32 %v3144_v29, %v7353_v19  ;;  %v2758_v35 = vsel %vm2694_vm1, %v2662_v42, %v2726_v25  ;;  %v2635_v21 = vmul.f32 %v7380_v4, %v7361_v14  ;;  %v7385_v6 = vld [vmem:[#allocation46_spill] sm:$0xff] }
 0x3b3   :  { %v3273_v5 = vsel %vm3209_vm6, %v3177_v41, %v3241_v24  ;;  %v2633_v26 = vmul.f32 %v7381_v46, %v7361_v14  ;;  %4149 = vst [vmem:[%s7231_s7 + $0x148] sm:$0xff] %v2758_v35  ;;  %v3271_v45 = vsel %vm3207_vm7, %v3175_v0, %v3239_v59  ;;  %v2636_v42 = vmul.f32 %v7382_v63, %v7361_v14  ;;  %v7383_v0 = vld [vmem:[#allocation44_spill] sm:$0xff] }
 0x3b4   :  { %4246 = vst [vmem:[%s7231_s7 + $0x250] sm:$0xff] %v3273_v5  ;;  %vm3210_vm8 = vcmp.ge.f32.partialorder %v3178_v27, 0.0  ;;  %v3242_v3 = vmul.f32 %v7363_v10, %v3178_v27  ;;  %vm3208_vm9 = vcmp.ge.f32.partialorder %v3176_v2, 0.0  ;;  %4244 = vst [vmem:[%s7231_s7 + $0x240] sm:$0xff] %v3271_v45  ;;  %v3240_v28 = vmul.f32 %v7363_v10, %v3176_v2 }
 0x3b5   :  { %v2667_v51 = vadd.f32 %v2635_v21, %v7353_v19  ;;  %v2665_v18 = vadd.f32 %v2633_v26, %v7353_v19  ;;  %v2634_v37 = vmul.f32 %v7383_v0, %v7361_v14  ;;  %v3149_v22 = vmul.f32 %v7384_v61, %v7361_v14  ;;  %v7386_v21 = vld [vmem:[#allocation47_spill] sm:$0xff]  ;;  %v7387_v26 = vld [vmem:[#allocation48_spill] sm:$0xff] }
 0x3b6   :  { %v3274_v41 = vsel %vm3210_vm8, %v3178_v27, %v3242_v3  ;;  %v3147_v44 = vmul.f32 %v7385_v6, %v7361_v14  ;;  %v3272_v29 = vsel %vm3208_vm9, %v3176_v2, %v3240_v28  ;;  %v2668_v59 = vadd.f32 %v2636_v42, %v7353_v19  ;;  %v6678_v5 = vpop.f32.mrb[88].mxu0 }
 0x3b7   :  { %4247 = vst [vmem:[%s7231_s7 + $0x258] sm:$0xff] %v3274_v41  ;;  %vm2699_vm10 = vcmp.ge.f32.partialorder %v2667_v51, 0.0  ;;  %v2731_v25 = vmul.f32 %v7363_v10, %v2667_v51  ;;  %vm2697_vm11 = vcmp.ge.f32.partialorder %v2665_v18, 0.0  ;;  %4245 = vst [vmem:[%s7231_s7 + $0x248] sm:$0xff] %v3272_v29  ;;  %v2729_v24 = vmul.f32 %v7363_v10, %v2665_v18  ;;  %v6685_v3 = vpop.f32.mrb[89].mxu0  ;;  %v7388_v29 = vld [vmem:[#allocation49_spill] sm:$0xff] }
 0x3b8   :  { %v2666_v27 = vadd.f32 %v2634_v37, %v7353_v19  ;;  %v3181_v35 = vadd.f32 %v3149_v22, %v7353_v19  ;;  %v3179_v2 = vadd.f32 %v3147_v44, %v7353_v19  ;;  %v3150_v46 = vmul.f32 %v7386_v21, %v7361_v14 }
 0x3b9   :  { %v2763_v4 = vsel %vm2699_vm10, %v2667_v51, %v2731_v25  ;;  %v3148_v45 = vmul.f32 %v7387_v26, %v7361_v14  ;;  %v2761_v28 = vsel %vm2697_vm11, %v2665_v18, %v2729_v24  ;;  %vm2700_vm12 = vcmp.ge.f32.partialorder %v2668_v59, 0.0  ;;  %v6691_v51 = vpop.f32.mrb[90].mxu0 }
 0x3ba   :  { %4154 = vst [vmem:[%s7231_s7 + $0x170] sm:$0xff] %v2763_v4  ;;  %v2732_v63 = vmul.f32 %v7363_v10, %v2668_v59  ;;  %vm2698_vm13 = vcmp.ge.f32.partialorder %v2666_v27, 0.0  ;;  %4152 = vst [vmem:[%s7231_s7 + $0x160] sm:$0xff] %v2761_v28  ;;  %v2730_v42 = vmul.f32 %v7363_v10, %v2666_v27  ;;  %vm3213_vm2 = vcmp.ge.f32.partialorder %v3181_v35, 0.0  ;;  %v6698_v0 = vpop.f32.mrb[91].mxu0 }
 0x3bb   :  { %v3245_v41 = vmul.f32 %v7363_v10, %v3181_v35  ;;  %vm3211_vm3 = vcmp.ge.f32.partialorder %v3179_v2, 0.0  ;;  %v3243_v18 = vmul.f32 %v7363_v10, %v3179_v2  ;;  %v3182_v61 = vadd.f32 %v3150_v46, %v7353_v19 }
 0x3bc   :  { %v2764_v37 = vsel %vm2700_vm12, %v2668_v59, %v2732_v63  ;;  %v3180_v22 = vadd.f32 %v3148_v45, %v7353_v19  ;;  %v2762_v6 = vsel %vm2698_vm13, %v2666_v27, %v2730_v42  ;;  %v2639_v25 = vmul.f32 %v7388_v29, %v7361_v14 }
 0x3bd   :  { %4155 = vst [vmem:[%s7231_s7 + $0x178] sm:$0xff] %v2764_v37  ;;  %v3277_v44 = vsel %vm3213_vm2, %v3181_v35, %v3245_v41  ;;  %v2637_v24 = vmul.f32 %v6244_v56, %v7361_v14  ;;  %4153 = vst [vmem:[%s7231_s7 + $0x168] sm:$0xff] %v2762_v6  ;;  %v3275_v59 = vsel %vm3211_vm3, %v3179_v2, %v3243_v18  ;;  %vm3214_vm4 = vcmp.ge.f32.partialorder %v3182_v61, 0.0 }
 0x3be   :  { %4250 = vst [vmem:[%s7231_s7 + $0x270] sm:$0xff] %v3277_v44  ;;  %v3246_v4 = vmul.f32 %v7363_v10, %v3182_v61  ;;  %vm3212_vm5 = vcmp.ge.f32.partialorder %v3180_v22, 0.0  ;;  %4248 = vst [vmem:[%s7231_s7 + $0x260] sm:$0xff] %v3275_v59  ;;  %v3244_v27 = vmul.f32 %v7363_v10, %v3180_v22  ;;  %v2671_v56 = vadd.f32 %v2639_v25, %v7353_v19  ;;  %v6731_v28 = vpop.f32.mrb[92].mxu0 }
 0x3bf   :  { %v2669_v35 = vadd.f32 %v2637_v24, %v7353_v19  ;;  %v2640_v21 = vmul.f32 %v6270_v49, %v7361_v14  ;;  %v2638_v2 = vmul.f32 %v6296_v23, %v7361_v14  ;;  %v3153_v26 = vmul.f32 %v6322_v9, %v7361_v14  ;;  %v6737_v42 = vpop.f32.mrb[93].mxu0 }
 0x3c0   :  { %v3278_v46 = vsel %vm3214_vm4, %v3182_v61, %v3246_v4  ;;  %v3151_v45 = vmul.f32 %v6348_v55, %v7361_v14  ;;  %v3276_v63 = vsel %vm3212_vm5, %v3180_v22, %v3244_v27  ;;  %vm2703_vm14 = vcmp.ge.f32.partialorder %v2671_v56, 0.0  ;;  %v6746_v37 = vpop.f32.mrb[94].mxu0 }
 0x3c1   :  { %4251 = vst [vmem:[%s7231_s7 + $0x278] sm:$0xff] %v3278_v46  ;;  %v2735_v49 = vmul.f32 %v7363_v10, %v2671_v56  ;;  %vm2701_vm15 = vcmp.ge.f32.partialorder %v2669_v35, 0.0  ;;  %4249 = vst [vmem:[%s7231_s7 + $0x268] sm:$0xff] %v3276_v63  ;;  %v2733_v23 = vmul.f32 %v7363_v10, %v2669_v35  ;;  %v2672_v9 = vadd.f32 %v2640_v21, %v7353_v19  ;;  %v6753_v44 = vpop.f32.mrb[95].mxu0 }
 0x3c2   :  { %v2670_v55 = vadd.f32 %v2638_v2, %v7353_v19  ;;  %v3185_v41 = vadd.f32 %v3153_v26, %v7353_v19  ;;  %v3183_v61 = vadd.f32 %v3151_v45, %v7353_v19  ;;  %v3154_v22 = vmul.f32 %v6374_v11, %v7361_v14 }
 0x3c3   :  { %v2767_v18 = vsel %vm2703_vm14, %v2671_v56, %v2735_v49  ;;  %v3152_v6 = vmul.f32 %v6400_v39, %v7361_v14  ;;  %v2765_v29 = vsel %vm2701_vm15, %v2669_v35, %v2733_v23  ;;  %vm2704_vm0 = vcmp.ge.f32.partialorder %v2672_v9, 0.0 }
 0x3c4   :  { %4158 = vst [vmem:[%s7231_s7 + $0x190] sm:$0xff] %v2767_v18  ;;  %v2736_v25 = vmul.f32 %v7363_v10, %v2672_v9  ;;  %vm2702_vm1 = vcmp.ge.f32.partialorder %v2670_v55, 0.0  ;;  %4156 = vst [vmem:[%s7231_s7 + $0x180] sm:$0xff] %v2765_v29  ;;  %v2734_v11 = vmul.f32 %v7363_v10, %v2670_v55  ;;  %vm3217_vm6 = vcmp.ge.f32.partialorder %v3185_v41, 0.0 }
 0x3c5   :  { %v3249_v39 = vmul.f32 %v7363_v10, %v3185_v41  ;;  %vm3215_vm7 = vcmp.ge.f32.partialorder %v3183_v61, 0.0  ;;  %v3247_v59 = vmul.f32 %v7363_v10, %v3183_v61  ;;  %v3186_v4 = vadd.f32 %v3154_v22, %v7353_v19 }
 0x3c6   :  { %v2768_v24 = vsel %vm2704_vm0, %v2672_v9, %v2736_v25  ;;  %v3184_v27 = vadd.f32 %v3152_v6, %v7353_v19  ;;  %v2766_v56 = vsel %vm2702_vm1, %v2670_v55, %v2734_v11  ;;  %v2643_v21 = vmul.f32 %v6430_v34, %v7361_v14  ;;  %v6781_v45 = vpop.f32.mrb[96].mxu0 }
 0x3c7   :  { %4159 = vst [vmem:[%s7231_s7 + $0x198] sm:$0xff] %v2768_v24  ;;  %v3281_v35 = vsel %vm3217_vm6, %v3185_v41, %v3249_v39  ;;  %v2641_v46 = vmul.f32 %v6452_v60, %v7361_v14  ;;  %4157 = vst [vmem:[%s7231_s7 + $0x188] sm:$0xff] %v2766_v56  ;;  %v3279_v2 = vsel %vm3215_vm7, %v3183_v61, %v3247_v59  ;;  %vm3218_vm8 = vcmp.ge.f32.partialorder %v3186_v4, 0.0  ;;  %v6791_v23 = vpop.f32.mrb[97].mxu0 }
 0x3c8   :  { %4254 = vst [vmem:[%s7231_s7 + $0x290] sm:$0xff] %v3281_v35  ;;  %v3250_v26 = vmul.f32 %v7363_v10, %v3186_v4  ;;  %vm3216_vm9 = vcmp.ge.f32.partialorder %v3184_v27, 0.0  ;;  %4252 = vst [vmem:[%s7231_s7 + $0x280] sm:$0xff] %v3279_v2  ;;  %v3248_v34 = vmul.f32 %v7363_v10, %v3184_v27  ;;  %v2675_v60 = vadd.f32 %v2643_v21, %v7353_v19  ;;  %v6799_v61 = vpop.f32.mrb[98].mxu0 }
 0x3c9   :  { %v2673_v63 = vadd.f32 %v2641_v46, %v7353_v19  ;;  %v2644_v49 = vmul.f32 %v6462_v36, %v7361_v14  ;;  %v2642_v55 = vmul.f32 %v6466_v53, %v7361_v14  ;;  %v3157_v41 = vmul.f32 %v6470_v15, %v7361_v14  ;;  %v6805_v6 = vpop.f32.mrb[99].mxu0 }
 0x3ca   :  { %v3282_v9 = vsel %vm3218_vm8, %v3186_v4, %v3250_v26  ;;  %v3155_v18 = vmul.f32 %v6473_v43, %v7361_v14  ;;  %v3280_v22 = vsel %vm3216_vm9, %v3184_v27, %v3248_v34  ;;  %vm2707_vm10 = vcmp.ge.f32.partialorder %v2675_v60, 0.0 }
 0x3cb   :  { %4255 = vst [vmem:[%s7231_s7 + $0x298] sm:$0xff] %v3282_v9  ;;  %v2739_v36 = vmul.f32 %v7363_v10, %v2675_v60  ;;  %vm2705_vm11 = vcmp.ge.f32.partialorder %v2673_v63, 0.0  ;;  %4253 = vst [vmem:[%s7231_s7 + $0x288] sm:$0xff] %v3280_v22  ;;  %v2737_v53 = vmul.f32 %v7363_v10, %v2673_v63  ;;  %v2676_v15 = vadd.f32 %v2644_v49, %v7353_v19 }
 0x3cc   :  { %v2674_v43 = vadd.f32 %v2642_v55, %v7353_v19  ;;  %v3189_v29 = vadd.f32 %v3157_v41, %v7353_v19  ;;  %v3187_v11 = vadd.f32 %v3155_v18, %v7353_v19  ;;  %v3158_v39 = vmul.f32 %v6482_v1, %v7361_v14 }
 0x3cd   :  { %v2771_v25 = vsel %vm2707_vm10, %v2675_v60, %v2739_v36  ;;  %v3156_v24 = vmul.f32 %v6492_v38, %v7361_v14  ;;  %v2769_v59 = vsel %vm2705_vm11, %v2673_v63, %v2737_v53  ;;  %vm2708_vm12 = vcmp.ge.f32.partialorder %v2676_v15, 0.0 }
 0x3ce   :  { %4162 = vst [vmem:[%s7231_s7 + $0x1b0] sm:$0xff] %v2771_v25  ;;  %v2740_v4 = vmul.f32 %v7363_v10, %v2676_v15  ;;  %vm2706_vm13 = vcmp.ge.f32.partialorder %v2674_v43, 0.0  ;;  %4160 = vst [vmem:[%s7231_s7 + $0x1a0] sm:$0xff] %v2769_v59  ;;  %v2738_v27 = vmul.f32 %v7363_v10, %v2674_v43  ;;  %vm3221_vm2 = vcmp.ge.f32.partialorder %v3189_v29, 0.0  ;;  %v6831_v46 = vpop.f32.mrb[100].mxu0 }
 0x3cf   :  { %v3253_v1 = vmul.f32 %v7363_v10, %v3189_v29  ;;  %vm3219_vm3 = vcmp.ge.f32.partialorder %v3187_v11, 0.0  ;;  %v3251_v56 = vmul.f32 %v7363_v10, %v3187_v11  ;;  %v3190_v35 = vadd.f32 %v3158_v39, %v7353_v19  ;;  %v6840_v63 = vpop.f32.mrb[101].mxu0 }
 0x3d0   :  { %v2772_v38 = vsel %vm2708_vm12, %v2676_v15, %v2740_v4  ;;  %v3188_v21 = vadd.f32 %v3156_v24, %v7353_v19  ;;  %v2770_v2 = vsel %vm2706_vm13, %v2674_v43, %v2738_v27  ;;  %v2647_v34 = vmul.f32 %v6503_v13, %v7361_v14  ;;  %v6849_v55 = vpop.f32.mrb[102].mxu0 }
 0x3d1   :  { %4163 = vst [vmem:[%s7231_s7 + $0x1b8] sm:$0xff] %v2772_v38  ;;  %v3285_v26 = vsel %vm3221_vm2, %v3189_v29, %v3253_v1  ;;  %v2645_v60 = vmul.f32 %v6511_v33, %v7361_v14  ;;  %4161 = vst [vmem:[%s7231_s7 + $0x1a8] sm:$0xff] %v2770_v2  ;;  %v3283_v49 = vsel %vm3219_vm3, %v3187_v11, %v3251_v56  ;;  %vm3222_vm4 = vcmp.ge.f32.partialorder %v3190_v35, 0.0  ;;  %v6859_v22 = vpop.f32.mrb[103].mxu0 }
 0x3d2   :  { %4258 = vst [vmem:[%s7231_s7 + $0x2b0] sm:$0xff] %v3285_v26  ;;  %v3254_v9 = vmul.f32 %v7363_v10, %v3190_v35  ;;  %vm3220_vm5 = vcmp.ge.f32.partialorder %v3188_v21, 0.0  ;;  %4256 = vst [vmem:[%s7231_s7 + $0x2a0] sm:$0xff] %v3283_v49  ;;  %v3252_v13 = vmul.f32 %v7363_v10, %v3188_v21  ;;  %v2679_v33 = vadd.f32 %v2647_v34, %v7353_v19 }
 0x3d3   :  { %v2677_v41 = vadd.f32 %v2645_v60, %v7353_v19  ;;  %v2648_v18 = vmul.f32 %v6521_v50, %v7361_v14  ;;  %v2646_v53 = vmul.f32 %v6528_v47, %v7361_v14  ;;  %v3161_v15 = vmul.f32 %v6535_v32, %v7361_v14 }
 0x3d4   :  { %v3286_v36 = vsel %vm3222_vm4, %v3190_v35, %v3254_v9  ;;  %v3159_v43 = vmul.f32 %v6539_v31, %v7361_v14  ;;  %v3284_v29 = vsel %vm3220_vm5, %v3188_v21, %v3252_v13  ;;  %vm2711_vm14 = vcmp.ge.f32.partialorder %v2679_v33, 0.0 }
 0x3d5   :  { %4259 = vst [vmem:[%s7231_s7 + $0x2b8] sm:$0xff] %v3286_v36  ;;  %v2743_v50 = vmul.f32 %v7363_v10, %v2679_v33  ;;  %vm2709_vm15 = vcmp.ge.f32.partialorder %v2677_v41, 0.0  ;;  %4257 = vst [vmem:[%s7231_s7 + $0x2a8] sm:$0xff] %v3284_v29  ;;  %v2741_v47 = vmul.f32 %v7363_v10, %v2677_v41  ;;  %v2680_v32 = vadd.f32 %v2648_v18, %v7353_v19 }
 0x3d6   :  { %v2678_v25 = vadd.f32 %v2646_v53, %v7353_v19  ;;  %v3193_v31 = vadd.f32 %v3161_v15, %v7353_v19  ;;  %v3191_v39 = vadd.f32 %v3159_v43, %v7353_v19  ;;  %v3162_v24 = vmul.f32 %v6543_v16, %v7361_v14  ;;  %v6887_v1 = vpop.f32.mrb[104].mxu0 }
 0x3d7   :  { %v2775_v11 = vsel %vm2711_vm14, %v2679_v33, %v2743_v50  ;;  %v3160_v59 = vmul.f32 %v6554_v7, %v7361_v14  ;;  %v2773_v4 = vsel %vm2709_vm15, %v2677_v41, %v2741_v47  ;;  %vm2712_vm0 = vcmp.ge.f32.partialorder %v2680_v32, 0.0  ;;  %v6894_v38 = vpop.f32.mrb[105].mxu0  ;;  %v6919_v33 = vld [vmem:[%s7230_s6] ss:$0 sm:$0xff] }
 0x3d8   :  { %4166 = vst [vmem:[%s7231_s7 + $0x1d0] sm:$0xff] %v2775_v11  ;;  %v2744_v27 = vmul.f32 %v7363_v10, %v2680_v32  ;;  %vm2710_vm1 = vcmp.ge.f32.partialorder %v2678_v25, 0.0  ;;  %4164 = vst [vmem:[%s7231_s7 + $0x1c0] sm:$0xff] %v2773_v4  ;;  %v2742_v16 = vmul.f32 %v7363_v10, %v2678_v25  ;;  %vm3225_vm6 = vcmp.ge.f32.partialorder %v3193_v31, 0.0  ;;  %v6899_v26 = vpop.f32.mrb[106].mxu0 }
 0x3d9   :  { %v3257_v7 = vmul.f32 %v7363_v10, %v3193_v31  ;;  %vm3223_vm7 = vcmp.ge.f32.partialorder %v3191_v39, 0.0  ;;  %v3255_v35 = vmul.f32 %v7363_v10, %v3191_v39  ;;  %v3194_v21 = vadd.f32 %v3162_v24, %v7353_v19  ;;  %v6908_v13 = vpop.f32.mrb[107].mxu0 }
 0x3da   :  { %v2776_v56 = vsel %vm2712_vm0, %v2680_v32, %v2744_v27  ;;  %v3192_v2 = vadd.f32 %v3160_v59, %v7353_v19  ;;  %v2774_v34 = vsel %vm2710_vm1, %v2678_v25, %v2742_v16  ;;  %v2651_v49 = vmul.f32 %v6564_v48, %v7361_v14 }
 0x3db   :  { %4167 = vst [vmem:[%s7231_s7 + $0x1d8] sm:$0xff] %v2776_v56  ;;  %v3289_v60 = vsel %vm3225_vm6, %v3193_v31, %v3257_v7  ;;  %v2649_v9 = vmul.f32 %v6570_v17, %v7361_v14  ;;  %4165 = vst [vmem:[%s7231_s7 + $0x1c8] sm:$0xff] %v2774_v34  ;;  %v3287_v10 = vsel %vm3223_vm7, %v3191_v39, %v3255_v35  ;;  %vm3226_vm8 = vcmp.ge.f32.partialorder %v3194_v21, 0.0 }
 0x3dc   :  { %4262 = vst [vmem:[%s7231_s7 + $0x2d0] sm:$0xff] %v3289_v60  ;;  %v3258_v48 = vmul.f32 %v6919_v33, %v3194_v21  ;;  %vm3224_vm9 = vcmp.ge.f32.partialorder %v3192_v2, 0.0  ;;  %4260 = vst [vmem:[%s7231_s7 + $0x2c0] sm:$0xff] %v3287_v10  ;;  %v3256_v17 = vmul.f32 %v6919_v33, %v3192_v2  ;;  %v2683_v41 = vadd.f32 %v2651_v49, %v7353_v19 }
 0x3dd   :  { %v2681_v18 = vadd.f32 %v2649_v9, %v7353_v19  ;;  %v2652_v36 = vmul.f32 %v6576_v20, %v7361_v14  ;;  %v2650_v15 = vmul.f32 %v6586_v40, %v7361_v14  ;;  %v3165_v43 = vmul.f32 %v6597_v52, %v7361_v14 }
 0x3de   :  { %v3290_v53 = vsel %vm3226_vm8, %v3194_v21, %v3258_v48  ;;  %v3163_v29 = vmul.f32 %v6602_v54, %v7361_v14  ;;  %v3288_v50 = vsel %vm3224_vm9, %v3192_v2, %v3256_v17  ;;  %vm2715_vm10 = vcmp.ge.f32.partialorder %v2683_v41, 0.0  ;;  %v6947_v32 = vpop.f32.mrb[108].mxu0 }
 0x3df   :  { %4263 = vst [vmem:[%s7231_s7 + $0x2d8] sm:$0xff] %v3290_v53  ;;  %v2747_v47 = vmul.f32 %v6919_v33, %v2683_v41  ;;  %vm2713_vm11 = vcmp.ge.f32.partialorder %v2681_v18, 0.0  ;;  %4261 = vst [vmem:[%s7231_s7 + $0x2c8] sm:$0xff] %v3288_v50  ;;  %v2745_v20 = vmul.f32 %v6919_v33, %v2681_v18  ;;  %v2684_v40 = vadd.f32 %v2652_v36, %v7353_v19  ;;  %v6954_v24 = vpop.f32.mrb[109].mxu0 }
 0x3e0   :  { %v2682_v52 = vadd.f32 %v2650_v15, %v7353_v19  ;;  %v3197_v54 = vadd.f32 %v3165_v43, %v7353_v19  ;;  %v3195_v31 = vadd.f32 %v3163_v29, %v7353_v19  ;;  %v3166_v11 = vmul.f32 %v6609_v62, %v7361_v14  ;;  %v6960_v27 = vpop.f32.mrb[110].mxu0 }
 0x3e1   :  { %v2779_v25 = vsel %vm2715_vm10, %v2683_v41, %v2747_v47  ;;  %v3164_v39 = vmul.f32 %v6614_v30, %v7361_v14  ;;  %v2777_v59 = vsel %vm2713_vm11, %v2681_v18, %v2745_v20  ;;  %vm2716_vm12 = vcmp.ge.f32.partialorder %v2684_v40, 0.0  ;;  %v6967_v16 = vpop.f32.mrb[111].mxu0 }
 0x3e2   :  { %4170 = vst [vmem:[%s7231_s7 + $0x1f0] sm:$0xff] %v2779_v25  ;;  %v2748_v4 = vmul.f32 %v6919_v33, %v2684_v40  ;;  %vm2714_vm13 = vcmp.ge.f32.partialorder %v2682_v52, 0.0  ;;  %4168 = vst [vmem:[%s7231_s7 + $0x1e0] sm:$0xff] %v2777_v59  ;;  %v2746_v62 = vmul.f32 %v6919_v33, %v2682_v52  ;;  %vm3229_vm2 = vcmp.ge.f32.partialorder %v3197_v54, 0.0 }
 0x3e3   :  { %v3261_v30 = vmul.f32 %v6919_v33, %v3197_v54  ;;  %vm3227_vm3 = vcmp.ge.f32.partialorder %v3195_v31, 0.0  ;;  %v3259_v56 = vmul.f32 %v6919_v33, %v3195_v31  ;;  %v3198_v35 = vadd.f32 %v3166_v11, %v7353_v19 }
 0x3e4   :  { %v2780_v7 = vsel %vm2716_vm12, %v2684_v40, %v2748_v4  ;;  %v3196_v21 = vadd.f32 %v3164_v39, %v7353_v19  ;;  %v2778_v2 = vsel %vm2714_vm13, %v2682_v52, %v2746_v62  ;;  %v3651_v60 = vmul.f32 %v6623_v8, %v7361_v14 }
 0x3e5   :  { %4171 = vst [vmem:[%s7231_s7 + $0x1f8] sm:$0xff] %v2780_v7  ;;  %v3293_v34 = vsel %vm3229_vm2, %v3197_v54, %v3261_v30  ;;  %v3649_v49 = vmul.f32 %v6633_v57, %v7361_v14  ;;  %4169 = vst [vmem:[%s7231_s7 + $0x1e8] sm:$0xff] %v2778_v2  ;;  %v3291_v9 = vsel %vm3227_vm3, %v3195_v31, %v3259_v56  ;;  %vm3230_vm4 = vcmp.ge.f32.partialorder %v3198_v35, 0.0 }
 0x3e6   :  { %4266 = vst [vmem:[%s7231_s7 + $0x2f0] sm:$0xff] %v3293_v34  ;;  %v3262_v10 = vmul.f32 %v6919_v33, %v3198_v35  ;;  %vm3228_vm5 = vcmp.ge.f32.partialorder %v3196_v21, 0.0  ;;  %4264 = vst [vmem:[%s7231_s7 + $0x2e0] sm:$0xff] %v3291_v9  ;;  %v3260_v8 = vmul.f32 %v6919_v33, %v3196_v21  ;;  %v3683_v57 = vadd.f32 %v3651_v60, %v7353_v19  ;;  %v7000_v15 = vpop.f32.mrb[112].mxu0 }
 0x3e7   :  { %v3681_v48 = vadd.f32 %v3649_v49, %v7353_v19  ;;  %v3652_v17 = vmul.f32 %v6638_v58, %v7361_v14  ;;  %v3650_v18 = vmul.f32 %v6644_v12, %v7361_v14  ;;  %v3655_v36 = vmul.f32 %v6678_v5, %v7361_v14  ;;  %v7006_v29 = vpop.f32.mrb[113].mxu0 }
 0x3e8   :  { %v3294_v41 = vsel %vm3230_vm4, %v3198_v35, %v3262_v10  ;;  %v3653_v53 = vmul.f32 %v6685_v3, %v7361_v14  ;;  %v3292_v43 = vsel %vm3228_vm5, %v3196_v21, %v3260_v8  ;;  %vm3715_vm14 = vcmp.ge.f32.partialorder %v3683_v57, 0.0  ;;  %v7015_v47 = vpop.f32.mrb[114].mxu0 }
 0x3e9   :  { %4267 = vst [vmem:[%s7231_s7 + $0x2f8] sm:$0xff] %v3294_v41  ;;  %v3747_v58 = vmul.f32 %v6919_v33, %v3683_v57  ;;  %vm3713_vm15 = vcmp.ge.f32.partialorder %v3681_v48, 0.0  ;;  %4265 = vst [vmem:[%s7231_s7 + $0x2e8] sm:$0xff] %v3292_v43  ;;  %v3745_v12 = vmul.f32 %v6919_v33, %v3681_v48  ;;  %v3684_v5 = vadd.f32 %v3652_v17, %v7353_v19  ;;  %v7022_v25 = vpop.f32.mrb[115].mxu0 }
 0x3ea   :  { %v3682_v3 = vadd.f32 %v3650_v18, %v7353_v19  ;;  %v3687_v50 = vadd.f32 %v3655_v36, %v7353_v19  ;;  %v3685_v40 = vadd.f32 %v3653_v53, %v7353_v19  ;;  %v3656_v52 = vmul.f32 %v6691_v51, %v7361_v14 }
 0x3eb   :  { %v3779_v20 = vsel %vm3715_vm14, %v3683_v57, %v3747_v58  ;;  %v3654_v54 = vmul.f32 %v6698_v0, %v7361_v14  ;;  %v3777_v31 = vsel %vm3713_vm15, %v3681_v48, %v3745_v12  ;;  %vm3716_vm0 = vcmp.ge.f32.partialorder %v3684_v5, 0.0 }
 0x3ec   :  { %4334 = vst [vmem:[%s7231_s7 + $0x310] sm:$0xff] %v3779_v20  ;;  %v3748_v11 = vmul.f32 %v6919_v33, %v3684_v5  ;;  %vm3714_vm1 = vcmp.ge.f32.partialorder %v3682_v3, 0.0  ;;  %4332 = vst [vmem:[%s7231_s7 + $0x300] sm:$0xff] %v3777_v31  ;;  %v3746_v51 = vmul.f32 %v6919_v33, %v3682_v3  ;;  %vm3719_vm6 = vcmp.ge.f32.partialorder %v3687_v50, 0.0 }
 0x3ed   :  { %v3751_v0 = vmul.f32 %v6919_v33, %v3687_v50  ;;  %vm3717_vm7 = vcmp.ge.f32.partialorder %v3685_v40, 0.0  ;;  %v3749_v59 = vmul.f32 %v6919_v33, %v3685_v40  ;;  %v3688_v4 = vadd.f32 %v3656_v52, %v7353_v19 }
 0x3ee   :  { %v3780_v39 = vsel %vm3716_vm0, %v3684_v5, %v3748_v11  ;;  %v3686_v62 = vadd.f32 %v3654_v54, %v7353_v19  ;;  %v3778_v30 = vsel %vm3714_vm1, %v3682_v3, %v3746_v51  ;;  %v3659_v56 = vmul.f32 %v6731_v28, %v7361_v14 }
 0x3ef   :  { %4335 = vst [vmem:[%s7231_s7 + $0x318] sm:$0xff] %v3780_v39  ;;  %v3783_v7 = vsel %vm3719_vm6, %v3687_v50, %v3751_v0  ;;  %v3657_v35 = vmul.f32 %v6737_v42, %v7361_v14  ;;  %4333 = vst [vmem:[%s7231_s7 + $0x308] sm:$0xff] %v3778_v30  ;;  %v3781_v21 = vsel %vm3717_vm7, %v3685_v40, %v3749_v59  ;;  %vm3720_vm8 = vcmp.ge.f32.partialorder %v3688_v4, 0.0 }
 0x3f0   :  { %4338 = vst [vmem:[%s7231_s7 + $0x330] sm:$0xff] %v3783_v7  ;;  %v3752_v2 = vmul.f32 %v6919_v33, %v3688_v4  ;;  %vm3718_vm9 = vcmp.ge.f32.partialorder %v3686_v62, 0.0  ;;  %4336 = vst [vmem:[%s7231_s7 + $0x320] sm:$0xff] %v3781_v21  ;;  %v3750_v28 = vmul.f32 %v6919_v33, %v3686_v62  ;;  %v3691_v42 = vadd.f32 %v3659_v56, %v7353_v19 }
 0x3f1   :  { %v3689_v34 = vadd.f32 %v3657_v35, %v7353_v19  ;;  %v3660_v60 = vmul.f32 %v6746_v37, %v7361_v14  ;;  %v3658_v9 = vmul.f32 %v6753_v44, %v7361_v14  ;;  %v3663_v10 = vmul.f32 %v6781_v45, %v7361_v14 }
 0x3f2   :  { %v3784_v49 = vsel %vm3720_vm8, %v3688_v4, %v3752_v2  ;;  %v3661_v8 = vmul.f32 %v6791_v23, %v7361_v14  ;;  %v3782_v57 = vsel %vm3718_vm9, %v3686_v62, %v3750_v28  ;;  %vm3723_vm10 = vcmp.ge.f32.partialorder %v3691_v42, 0.0 }
 0x3f3   :  { %4339 = vst [vmem:[%s7231_s7 + $0x338] sm:$0xff] %v3784_v49  ;;  %v3755_v48 = vmul.f32 %v6919_v33, %v3691_v42  ;;  %vm3721_vm11 = vcmp.ge.f32.partialorder %v3689_v34, 0.0  ;;  %4337 = vst [vmem:[%s7231_s7 + $0x328] sm:$0xff] %v3782_v57  ;;  %v3753_v37 = vmul.f32 %v6919_v33, %v3689_v34  ;;  %v3692_v44 = vadd.f32 %v3660_v60, %v7353_v19 }
 0x3f4   :  { %v3690_v45 = vadd.f32 %v3658_v9, %v7353_v19  ;;  %v3695_v23 = vadd.f32 %v3663_v10, %v7353_v19  ;;  %v3693_v41 = vadd.f32 %v3661_v8, %v7353_v19  ;;  %v3664_v18 = vmul.f32 %v6799_v61, %v7361_v14 }
 0x3f5   :  { %v3787_v17 = vsel %vm3723_vm10, %v3691_v42, %v3755_v48  ;;  %v3662_v36 = vmul.f32 %v6805_v6, %v7361_v14  ;;  %v3785_v53 = vsel %vm3721_vm11, %v3689_v34, %v3753_v37  ;;  %vm3724_vm12 = vcmp.ge.f32.partialorder %v3692_v44, 0.0 }
 0x3f6   :  { %4342 = vst [vmem:[%s7231_s7 + $0x350] sm:$0xff] %v3787_v17  ;;  %v3756_v43 = vmul.f32 %v6919_v33, %v3692_v44  ;;  %vm3722_vm13 = vcmp.ge.f32.partialorder %v3690_v45, 0.0  ;;  %4340 = vst [vmem:[%s7231_s7 + $0x340] sm:$0xff] %v3785_v53  ;;  %v3754_v58 = vmul.f32 %v6919_v33, %v3690_v45  ;;  %vm3727_vm2 = vcmp.ge.f32.partialorder %v3695_v23, 0.0 }
 0x3f7   :  { %v3759_v61 = vmul.f32 %v6919_v33, %v3695_v23  ;;  %vm3725_vm3 = vcmp.ge.f32.partialorder %v3693_v41, 0.0  ;;  %v3757_v12 = vmul.f32 %v6919_v33, %v3693_v41  ;;  %v3696_v5 = vadd.f32 %v3664_v18, %v7353_v19 }
 0x3f8   :  { %v3788_v6 = vsel %vm3724_vm12, %v3692_v44, %v3756_v43  ;;  %v3694_v3 = vadd.f32 %v3662_v36, %v7353_v19  ;;  %v3786_v50 = vsel %vm3722_vm13, %v3690_v45, %v3754_v58  ;;  %v3667_v40 = vmul.f32 %v6831_v46, %v7361_v14 }
 0x3f9   :  { %4343 = vst [vmem:[%s7231_s7 + $0x358] sm:$0xff] %v3788_v6  ;;  %v3791_v20 = vsel %vm3727_vm2, %v3695_v23, %v3759_v61  ;;  %v3665_v52 = vmul.f32 %v6840_v63, %v7361_v14  ;;  %4341 = vst [vmem:[%s7231_s7 + $0x348] sm:$0xff] %v3786_v50  ;;  %v3789_v54 = vsel %vm3725_vm3, %v3693_v41, %v3757_v12  ;;  %vm3728_vm4 = vcmp.ge.f32.partialorder %v3696_v5, 0.0 }
 0x3fa   :  { %4346 = vst [vmem:[%s7231_s7 + $0x370] sm:$0xff] %v3791_v20  ;;  %v3760_v31 = vmul.f32 %v6919_v33, %v3696_v5  ;;  %vm3726_vm5 = vcmp.ge.f32.partialorder %v3694_v3, 0.0  ;;  %4344 = vst [vmem:[%s7231_s7 + $0x360] sm:$0xff] %v3789_v54  ;;  %v3758_v46 = vmul.f32 %v6919_v33, %v3694_v3  ;;  %v3699_v63 = vadd.f32 %v3667_v40, %v7353_v19 }
 0x3fb   :  { %v3697_v11 = vadd.f32 %v3665_v52, %v7353_v19  ;;  %v3668_v51 = vmul.f32 %v6849_v55, %v7361_v14  ;;  %v3666_v39 = vmul.f32 %v6859_v22, %v7361_v14  ;;  %v3671_v59 = vmul.f32 %v6887_v1, %v7361_v14 }
 0x3fc   :  { %v3792_v0 = vsel %vm3728_vm4, %v3696_v5, %v3760_v31  ;;  %v3669_v4 = vmul.f32 %v6894_v38, %v7361_v14  ;;  %v3790_v62 = vsel %vm3726_vm5, %v3694_v3, %v3758_v46  ;;  %vm3731_vm14 = vcmp.ge.f32.partialorder %v3699_v63, 0.0 }
 0x3fd   :  { %4347 = vst [vmem:[%s7231_s7 + $0x378] sm:$0xff] %v3792_v0  ;;  %v3763_v30 = vmul.f32 %v6919_v33, %v3699_v63  ;;  %vm3729_vm15 = vcmp.ge.f32.partialorder %v3697_v11, 0.0  ;;  %4345 = vst [vmem:[%s7231_s7 + $0x368] sm:$0xff] %v3790_v62  ;;  %v3761_v55 = vmul.f32 %v6919_v33, %v3697_v11  ;;  %v3700_v22 = vadd.f32 %v3668_v51, %v7353_v19 }
 0x3fe   :  { %v3698_v1 = vadd.f32 %v3666_v39, %v7353_v19  ;;  %v3703_v38 = vadd.f32 %v3671_v59, %v7353_v19  ;;  %v3701_v56 = vadd.f32 %v3669_v4, %v7353_v19  ;;  %v3672_v35 = vmul.f32 %v6899_v26, %v7361_v14 }
 0x3ff   :  { %v3795_v7 = vsel %vm3731_vm14, %v3699_v63, %v3763_v30  ;;  %v3670_v21 = vmul.f32 %v6908_v13, %v7361_v14  ;;  %v3793_v2 = vsel %vm3729_vm15, %v3697_v11, %v3761_v55  ;;  %vm3732_vm0 = vcmp.ge.f32.partialorder %v3700_v22, 0.0 }
 0x400   :  { %4350 = vst [vmem:[%s7231_s7 + $0x390] sm:$0xff] %v3795_v7  ;;  %v3764_v28 = vmul.f32 %v6919_v33, %v3700_v22  ;;  %vm3730_vm1 = vcmp.ge.f32.partialorder %v3698_v1, 0.0  ;;  %4348 = vst [vmem:[%s7231_s7 + $0x380] sm:$0xff] %v3793_v2  ;;  %v3762_v42 = vmul.f32 %v6919_v33, %v3698_v1  ;;  %vm3735_vm6 = vcmp.ge.f32.partialorder %v3703_v38, 0.0 }
 0x401   :  { %v3767_v26 = vmul.f32 %v6919_v33, %v3703_v38  ;;  %vm3733_vm7 = vcmp.ge.f32.partialorder %v3701_v56, 0.0  ;;  %v3765_v34 = vmul.f32 %v6919_v33, %v3701_v56  ;;  %v3704_v60 = vadd.f32 %v3672_v35, %v7353_v19 }
 0x402   :  { %v3796_v13 = vsel %vm3732_vm0, %v3700_v22, %v3764_v28  ;;  %v3702_v49 = vadd.f32 %v3670_v21, %v7353_v19  ;;  %v3794_v9 = vsel %vm3730_vm1, %v3698_v1, %v3762_v42  ;;  %v3675_v8 = vmul.f32 %v6947_v32, %v7361_v14 }
 0x403   :  { %4351 = vst [vmem:[%s7231_s7 + $0x398] sm:$0xff] %v3796_v13  ;;  %v3799_v10 = vsel %vm3735_vm6, %v3703_v38, %v3767_v26  ;;  %v3673_v57 = vmul.f32 %v6954_v24, %v7361_v14  ;;  %4349 = vst [vmem:[%s7231_s7 + $0x388] sm:$0xff] %v3794_v9  ;;  %v3797_v48 = vsel %vm3733_vm7, %v3701_v56, %v3765_v34  ;;  %vm3736_vm8 = vcmp.ge.f32.partialorder %v3704_v60, 0.0 }
 0x404   :  { %4354 = vst [vmem:[%s7231_s7 + $0x3b0] sm:$0xff] %v3799_v10  ;;  %v3768_v37 = vmul.f32 %v6919_v33, %v3704_v60  ;;  %vm3734_vm9 = vcmp.ge.f32.partialorder %v3702_v49, 0.0  ;;  %4352 = vst [vmem:[%s7231_s7 + $0x3a0] sm:$0xff] %v3797_v48  ;;  %v3766_v32 = vmul.f32 %v6919_v33, %v3702_v49  ;;  %v3707_v24 = vadd.f32 %v3675_v8, %v7353_v19 }
 0x405   :  { %v3705_v44 = vadd.f32 %v3673_v57, %v7353_v19  ;;  %v3676_v45 = vmul.f32 %v6960_v27, %v7361_v14  ;;  %v3674_v17 = vmul.f32 %v6967_v16, %v7361_v14  ;;  %v3679_v41 = vmul.f32 %v7000_v15, %v7361_v14 }
 0x406   :  { %v3800_v23 = vsel %vm3736_vm8, %v3704_v60, %v3768_v37  ;;  %v3677_v18 = vmul.f32 %v7006_v29, %v7361_v14  ;;  %v3798_v36 = vsel %vm3734_vm9, %v3702_v49, %v3766_v32  ;;  %vm3739_vm10 = vcmp.ge.f32.partialorder %v3707_v24, 0.0 }
 0x407   :  { %4355 = vst [vmem:[%s7231_s7 + $0x3b8] sm:$0xff] %v3800_v23  ;;  %v3771_v53 = vmul.f32 %v6919_v33, %v3707_v24  ;;  %vm3737_vm11 = vcmp.ge.f32.partialorder %v3705_v44, 0.0  ;;  %4353 = vst [vmem:[%s7231_s7 + $0x3a8] sm:$0xff] %v3798_v36  ;;  %v3769_v27 = vmul.f32 %v6919_v33, %v3705_v44  ;;  %v3708_v16 = vadd.f32 %v3676_v45, %v7353_v19 }
 0x408   :  { %v3706_v15 = vadd.f32 %v3674_v17, %v7353_v19  ;;  %v3711_v29 = vadd.f32 %v3679_v41, %v7353_v19  ;;  %v3709_v58 = vadd.f32 %v3677_v18, %v7353_v19  ;;  %v3680_v61 = vmul.f32 %v7015_v47, %v7361_v14 }
 0x409   :  { %v3803_v43 = vsel %vm3739_vm10, %v3707_v24, %v3771_v53  ;;  %v3678_v6 = vmul.f32 %v7022_v25, %v7361_v14  ;;  %v3801_v12 = vsel %vm3737_vm11, %v3705_v44, %v3769_v27  ;;  %vm3740_vm12 = vcmp.ge.f32.partialorder %v3708_v16, 0.0 }
 0x40a   :  { %4358 = vst [vmem:[%s7231_s7 + $0x3d0] sm:$0xff] %v3803_v43  ;;  %v3772_v5 = vmul.f32 %v6919_v33, %v3708_v16  ;;  %vm3738_vm13 = vcmp.ge.f32.partialorder %v3706_v15, 0.0  ;;  %4356 = vst [vmem:[%s7231_s7 + $0x3c0] sm:$0xff] %v3801_v12  ;;  %v3770_v3 = vmul.f32 %v6919_v33, %v3706_v15  ;;  %vm3743_vm2 = vcmp.ge.f32.partialorder %v3711_v29, 0.0 }
 0x40b   :  { %v3775_v47 = vmul.f32 %v6919_v33, %v3711_v29  ;;  %vm3741_vm3 = vcmp.ge.f32.partialorder %v3709_v58, 0.0  ;;  %v3773_v25 = vmul.f32 %v6919_v33, %v3709_v58  ;;  %v3712_v50 = vadd.f32 %v3680_v61, %v7353_v19 }
 0x40c   :  { %v3804_v14 = vsel %vm3740_vm12, %v3708_v16, %v3772_v5  ;;  %v3710_v20 = vadd.f32 %v3678_v6, %v7353_v19  ;;  %v3802_v40 = vsel %vm3738_vm13, %v3706_v15, %v3770_v3 }
 0x40d   :  { %4359 = vst [vmem:[%s7231_s7 + $0x3d8] sm:$0xff] %v3804_v14  ;;  %v3807_v52 = vsel %vm3743_vm2, %v3711_v29, %v3775_v47  ;;  %4357 = vst [vmem:[%s7231_s7 + $0x3c8] sm:$0xff] %v3802_v40  ;;  %v3805_v54 = vsel %vm3741_vm3, %v3709_v58, %v3773_v25  ;;  %vm3744_vm4 = vcmp.ge.f32.partialorder %v3712_v50, 0.0  ;;  %v3776_v31 = vmul.f32 %v6919_v33, %v3712_v50 }
 0x40e   :  { %4362 = vst [vmem:[%s7231_s7 + $0x3f0] sm:$0xff] %v3807_v52  ;;  %vm3742_vm5 = vcmp.ge.f32.partialorder %v3710_v20, 0.0  ;;  %4360 = vst [vmem:[%s7231_s7 + $0x3e0] sm:$0xff] %v3805_v54  ;;  %v3774_v19 = vmul.f32 %v6919_v33, %v3710_v20 }
 0x40f   :  { %v3808_v46 = vsel %vm3744_vm4, %v3712_v50, %v3776_v31 }
 0x410   :  { %4363 = vst [vmem:[%s7231_s7 + $0x3f8] sm:$0xff] %v3808_v46  ;;  %v3806_v63 = vsel %vm3742_vm5, %v3710_v20, %v3774_v19 }
 0x411   :  { %4361 = vst [vmem:[%s7231_s7 + $0x3e8] sm:$0xff] %v3806_v63 }
 0x412   :  { %3846 = vsyncpa [#allocation3], 1 }
 0x413   :  { %3847 = vsyncpa [#allocation5], 1 }

</bundles_post_ra>
